<compile_context>
chip_gen: v7x
topology: tpu7x:2x2x1
jax: 0.10.0
libtpu: 0.0.40
codegen_flags: <defaults>
</compile_context>

<pallas_src>
import jax
import jax.numpy as jnp
from jax.experimental import pallas as pl
from jax.experimental.pallas import tpu as pltpu

TB = 256        # batch tile (rows per grid step)
IN_PAD = 896    # 784 padded to 7 * 128
OUT_PAD = 128   # final layer padded to one full lane vreg


def mlp_kernel(x_ref,
               w1_ref, b1_ref,
               w2_ref, b2_ref,
               w3_ref, b3_ref,
               w4_ref, b4_ref,
               w5_ref, b5_ref,
               out_ref):
    # x tile is bf16 (TB, 896); weights are bf16; biases f32; accumulate in f32.
    h = x_ref[...]
    h = jnp.maximum(
        jnp.dot(h, w1_ref[...], preferred_element_type=jnp.float32) + b1_ref[...], 0.0)
    h = jnp.maximum(
        jnp.dot(h.astype(jnp.bfloat16), w2_ref[...],
                preferred_element_type=jnp.float32) + b2_ref[...], 0.0)
    h = jnp.maximum(
        jnp.dot(h.astype(jnp.bfloat16), w3_ref[...],
                preferred_element_type=jnp.float32) + b3_ref[...], 0.0)
    h = jnp.maximum(
        jnp.dot(h.astype(jnp.bfloat16), w4_ref[...],
                preferred_element_type=jnp.float32) + b4_ref[...], 0.0)
    # Final layer: no ReLU (logits). N is padded to 128 lanes (cols 10..127 are zero).
    out_ref[...] = (
        jnp.dot(h.astype(jnp.bfloat16), w5_ref[...],
                preferred_element_type=jnp.float32) + b5_ref[...]
    ).astype(out_ref.dtype)


def _prepare_kernel_params(params):
    """Pad layer-1 K dim to 896 and layer-5 N dim to 128; cast weights to bf16."""
    kparams = []
    n = len(params)
    for i, (w, b) in enumerate(params):
        if i == 0:
            w = jnp.zeros((IN_PAD, w.shape[1]), w.dtype).at[: w.shape[0], :].set(w)
        if i == n - 1:
            w = jnp.zeros((w.shape[0], OUT_PAD), w.dtype).at[:, : w.shape[1]].set(w)
            b = jnp.zeros((1, OUT_PAD), b.dtype).at[:, : b.shape[1]].set(b)
        kparams.append((w.astype(jnp.bfloat16), b.astype(jnp.float32)))
    return kparams


@jax.jit
def softmax_mlp_forward(x, params):
    """x: [B, 1, 28, 28] or [B, 784] float32. params: list of (W_t[in,out], b[1,out]) f32."""
    x2 = x.reshape(-1, 784)
    B = x2.shape[0]
    n_tiles = pl.cdiv(B, TB)
    pB = n_tiles * TB

    # Pad batch to a multiple of TB and features 784 -> 896; store activations in bf16.
    x_p = jnp.zeros((pB, IN_PAD), jnp.bfloat16).at[:B, :784].set(x2.astype(jnp.bfloat16))

    kparams = _prepare_kernel_params(params)

    flat_args = [x_p]
    in_specs = [pl.BlockSpec((TB, IN_PAD), lambda i: (i, 0))]
    for w, b in kparams:
        flat_args += [w, b]
        # Weights / biases: full-array blocks, same block every grid step (VMEM-resident).
        in_specs.append(pl.BlockSpec(w.shape, lambda i: (0, 0)))
        in_specs.append(pl.BlockSpec(b.shape, lambda i: (0, 0)))

    out = pl.pallas_call(
        mlp_kernel,
        out_shape=jax.ShapeDtypeStruct((pB, OUT_PAD), jnp.float32),
        grid=(n_tiles,),
        in_specs=in_specs,
        out_specs=pl.BlockSpec((TB, OUT_PAD), lambda i: (i, 0)),
        compiler_params=pltpu.CompilerParams(
            dimension_semantics=("parallel",)),
    )(*flat_args)

    return out[:B, :10]


def init_params(key):
    """Deterministic init mimicking torch.nn.Linear default (uniform +/- 1/sqrt(fan_in))."""
    dims = [784, 512, 256, 128, 64, 10]
    params = []
    for i in range(5):
        fan_in, fan_out = dims[i], dims[i + 1]
        key, kw, kb = jax.random.split(key, 3)
        bound = 1.0 / (fan_in ** 0.5)
        # Stored already transposed: [in, out]
        w_t = jax.random.uniform(kw, (fan_in, fan_out), jnp.float32, -bound, bound)
        b = jax.random.uniform(kb, (1, fan_out), jnp.float32, -bound, bound)
        params.append((w_t, b))
    return params


def reference_forward(x, params):
    """Pure-JAX reference matching the kernel's bf16-operand / f32-accumulate matmuls."""
    h = x.reshape(-1, 784).astype(jnp.float32)
    for i, (w, b) in enumerate(params):
        h = jnp.dot(h.astype(jnp.bfloat16), w.astype(jnp.bfloat16),
                    preferred_element_type=jnp.float32) + b
        if i < 4:
            h = jnp.maximum(h, 0.0)
    return h


if __name__ == "__main__":
    key = jax.random.PRNGKey(0)
    kx, kp = jax.random.split(key)

    # Input consistent with the module's x.view(-1, 784): MNIST-like NCHW.
    x = jax.random.normal(kx, (2, 1, 28, 28), dtype=jnp.float32)
    params = init_params(kp)

    out = softmax_mlp_forward(x, params)
    out = jax.block_until_ready(out)

    ref = reference_forward(x, params)
    assert out.shape == (2, 10)
    assert jnp.allclose(out, ref, atol=2e-3, rtol=2e-3), "mismatch vs JAX reference"

    print("KERNEL_OK")
</pallas_src>

<mosaic_0001>
module attributes {stable_mosaic.version = 11 : i64} {
  func.func @mlp_kernel(%arg0: i32, %arg1: memref<256x896xbf16, #tpu.memory_space<vmem>>, %arg2: memref<896x512xbf16, #tpu.memory_space<vmem>>, %arg3: memref<1x512xf32, #tpu.memory_space<vmem>>, %arg4: memref<512x256xbf16, #tpu.memory_space<vmem>>, %arg5: memref<1x256xf32, #tpu.memory_space<vmem>>, %arg6: memref<256x128xbf16, #tpu.memory_space<vmem>>, %arg7: memref<1x128xf32, #tpu.memory_space<vmem>>, %arg8: memref<128x64xbf16, #tpu.memory_space<vmem>>, %arg9: memref<1x64xf32, #tpu.memory_space<vmem>>, %arg10: memref<64x128xbf16, #tpu.memory_space<vmem>>, %arg11: memref<1x128xf32, #tpu.memory_space<vmem>>, %arg12: memref<256x128xf32, #tpu.memory_space<vmem>>) attributes {dimension_semantics = [#tpu.dimension_semantics<parallel>], iteration_bounds = array<i64: 1>, scalar_prefetch = 0 : i64, scratch_operands = 0 : i64, tpu.core_type = #tpu.core_type<tc>, window_params = [{transform_indices = @transform_0, window_bounds = array<i64: 256, 896>}, {pipeline_mode = #tpu.pipeline_mode<synchronous>, transform_indices = @transform_1, window_bounds = array<i64: 896, 512>}, {pipeline_mode = #tpu.pipeline_mode<synchronous>, transform_indices = @transform_2, window_bounds = array<i64: 1, 512>}, {pipeline_mode = #tpu.pipeline_mode<synchronous>, transform_indices = @transform_3, window_bounds = array<i64: 512, 256>}, {pipeline_mode = #tpu.pipeline_mode<synchronous>, transform_indices = @transform_4, window_bounds = array<i64: 1, 256>}, {pipeline_mode = #tpu.pipeline_mode<synchronous>, transform_indices = @transform_5, window_bounds = array<i64: 256, 128>}, {pipeline_mode = #tpu.pipeline_mode<synchronous>, transform_indices = @transform_6, window_bounds = array<i64: 1, 128>}, {pipeline_mode = #tpu.pipeline_mode<synchronous>, transform_indices = @transform_7, window_bounds = array<i64: 128, 64>}, {pipeline_mode = #tpu.pipeline_mode<synchronous>, transform_indices = @transform_8, window_bounds = array<i64: 1, 64>}, {pipeline_mode = #tpu.pipeline_mode<synchronous>, transform_indices = @transform_9, window_bounds = array<i64: 64, 128>}, {pipeline_mode = #tpu.pipeline_mode<synchronous>, transform_indices = @transform_10, window_bounds = array<i64: 1, 128>}, {transform_indices = @transform_11, window_bounds = array<i64: 256, 128>}]} {
    %c0 = arith.constant 0 : index
    %c0_0 = arith.constant 0 : index
    %0 = vector.load %arg1[%c0, %c0_0] : memref<256x896xbf16, #tpu.memory_space<vmem>>, vector<256x896xbf16>
    %c0_1 = arith.constant 0 : index
    %c0_2 = arith.constant 0 : index
    %1 = vector.load %arg2[%c0_1, %c0_2] : memref<896x512xbf16, #tpu.memory_space<vmem>>, vector<896x512xbf16>
    %cst = arith.constant dense<0.000000e+00> : vector<256x512xf32>
    %2 = tpu.matmul %0, %1, %cst {dimension_numbers = #tpu.dot_dimension_numbers<[1], [0], [0], [1], [0, 0, 1, 1], [], []>} : vector<256x896xbf16>, vector<896x512xbf16>, vector<256x512xf32> -> vector<256x512xf32>
    %c0_3 = arith.constant 0 : index
    %c0_4 = arith.constant 0 : index
    %3 = vector.load %arg3[%c0_3, %c0_4] : memref<1x512xf32, #tpu.memory_space<vmem>>, vector<1x512xf32>
    %4 = vector.broadcast %3 : vector<1x512xf32> to vector<256x512xf32>
    %5 = arith.addf %2, %4 : vector<256x512xf32>
    %cst_5 = arith.constant 0.000000e+00 : f32
    %6 = vector.broadcast %cst_5 : f32 to vector<256x512xf32>
    %7 = arith.maximumf %5, %6 : vector<256x512xf32>
    %8 = arith.truncf %7 : vector<256x512xf32> to vector<256x512xbf16>
    %c0_6 = arith.constant 0 : index
    %c0_7 = arith.constant 0 : index
    %9 = vector.load %arg4[%c0_6, %c0_7] : memref<512x256xbf16, #tpu.memory_space<vmem>>, vector<512x256xbf16>
    %cst_8 = arith.constant dense<0.000000e+00> : vector<256x256xf32>
    %10 = tpu.matmul %8, %9, %cst_8 {dimension_numbers = #tpu.dot_dimension_numbers<[1], [0], [0], [1], [0, 0, 1, 1], [], []>} : vector<256x512xbf16>, vector<512x256xbf16>, vector<256x256xf32> -> vector<256x256xf32>
    %c0_9 = arith.constant 0 : index
    %c0_10 = arith.constant 0 : index
    %11 = vector.load %arg5[%c0_9, %c0_10] : memref<1x256xf32, #tpu.memory_space<vmem>>, vector<1x256xf32>
    %12 = vector.broadcast %11 : vector<1x256xf32> to vector<256x256xf32>
    %13 = arith.addf %10, %12 : vector<256x256xf32>
    %cst_11 = arith.constant 0.000000e+00 : f32
    %14 = vector.broadcast %cst_11 : f32 to vector<256x256xf32>
    %15 = arith.maximumf %13, %14 : vector<256x256xf32>
    %16 = arith.truncf %15 : vector<256x256xf32> to vector<256x256xbf16>
    %c0_12 = arith.constant 0 : index
    %c0_13 = arith.constant 0 : index
    %17 = vector.load %arg6[%c0_12, %c0_13] : memref<256x128xbf16, #tpu.memory_space<vmem>>, vector<256x128xbf16>
    %cst_14 = arith.constant dense<0.000000e+00> : vector<256x128xf32>
    %18 = tpu.matmul %16, %17, %cst_14 {dimension_numbers = #tpu.dot_dimension_numbers<[1], [0], [0], [1], [0, 0, 1, 1], [], []>} : vector<256x256xbf16>, vector<256x128xbf16>, vector<256x128xf32> -> vector<256x128xf32>
    %c0_15 = arith.constant 0 : index
    %c0_16 = arith.constant 0 : index
    %19 = vector.load %arg7[%c0_15, %c0_16] : memref<1x128xf32, #tpu.memory_space<vmem>>, vector<1x128xf32>
    %20 = vector.broadcast %19 : vector<1x128xf32> to vector<256x128xf32>
    %21 = arith.addf %18, %20 : vector<256x128xf32>
    %cst_17 = arith.constant 0.000000e+00 : f32
    %22 = vector.broadcast %cst_17 : f32 to vector<256x128xf32>
    %23 = arith.maximumf %21, %22 : vector<256x128xf32>
    %24 = arith.truncf %23 : vector<256x128xf32> to vector<256x128xbf16>
    %c0_18 = arith.constant 0 : index
    %c0_19 = arith.constant 0 : index
    %25 = vector.load %arg8[%c0_18, %c0_19] : memref<128x64xbf16, #tpu.memory_space<vmem>>, vector<128x64xbf16>
    %cst_20 = arith.constant dense<0.000000e+00> : vector<256x64xf32>
    %26 = tpu.matmul %24, %25, %cst_20 {dimension_numbers = #tpu.dot_dimension_numbers<[1], [0], [0], [1], [0, 0, 1, 1], [], []>} : vector<256x128xbf16>, vector<128x64xbf16>, vector<256x64xf32> -> vector<256x64xf32>
    %c0_21 = arith.constant 0 : index
    %c0_22 = arith.constant 0 : index
    %27 = vector.load %arg9[%c0_21, %c0_22] : memref<1x64xf32, #tpu.memory_space<vmem>>, vector<1x64xf32>
    %28 = vector.broadcast %27 : vector<1x64xf32> to vector<256x64xf32>
    %29 = arith.addf %26, %28 : vector<256x64xf32>
    %cst_23 = arith.constant 0.000000e+00 : f32
    %30 = vector.broadcast %cst_23 : f32 to vector<256x64xf32>
    %31 = arith.maximumf %29, %30 : vector<256x64xf32>
    %32 = arith.truncf %31 : vector<256x64xf32> to vector<256x64xbf16>
    %c0_24 = arith.constant 0 : index
    %c0_25 = arith.constant 0 : index
    %33 = vector.load %arg10[%c0_24, %c0_25] : memref<64x128xbf16, #tpu.memory_space<vmem>>, vector<64x128xbf16>
    %cst_26 = arith.constant dense<0.000000e+00> : vector<256x128xf32>
    %34 = tpu.matmul %32, %33, %cst_26 {dimension_numbers = #tpu.dot_dimension_numbers<[1], [0], [0], [1], [0, 0, 1, 1], [], []>} : vector<256x64xbf16>, vector<64x128xbf16>, vector<256x128xf32> -> vector<256x128xf32>
    %c0_27 = arith.constant 0 : index
    %c0_28 = arith.constant 0 : index
    %35 = vector.load %arg11[%c0_27, %c0_28] : memref<1x128xf32, #tpu.memory_space<vmem>>, vector<1x128xf32>
    %36 = vector.broadcast %35 : vector<1x128xf32> to vector<256x128xf32>
    %37 = arith.addf %34, %36 : vector<256x128xf32>
    %c0_29 = arith.constant 0 : index
    %c0_30 = arith.constant 0 : index
    %38 = vector.load %arg12[%c0_29, %c0_30] : memref<256x128xf32, #tpu.memory_space<vmem>>, vector<256x128xf32>
    tpu.vector_store %arg12[%c0_29, %c0_30], %37 {strides = array<i32>} : memref<256x128xf32, #tpu.memory_space<vmem>>, vector<256x128xf32>,
    return
  }
  func.func @transform_0(%arg0: i32) -> (i32, i32) {
    %c0_i32 = arith.constant 0 : i32
    %c0_i32_0 = arith.constant 0 : i32
    return %arg0, %c0_i32 : i32, i32
  }
  func.func @transform_1(%arg0: i32) -> (i32, i32) {
    %c0_i32 = arith.constant 0 : i32
    %c0_i32_0 = arith.constant 0 : i32
    %c0_i32_1 = arith.constant 0 : i32
    return %c0_i32, %c0_i32_0 : i32, i32
  }
  func.func @transform_2(%arg0: i32) -> (i32, i32) {
    %c0_i32 = arith.constant 0 : i32
    %c0_i32_0 = arith.constant 0 : i32
    %c0_i32_1 = arith.constant 0 : i32
    return %c0_i32, %c0_i32_0 : i32, i32
  }
  func.func @transform_3(%arg0: i32) -> (i32, i32) {
    %c0_i32 = arith.constant 0 : i32
    %c0_i32_0 = arith.constant 0 : i32
    %c0_i32_1 = arith.constant 0 : i32
    return %c0_i32, %c0_i32_0 : i32, i32
  }
  func.func @transform_4(%arg0: i32) -> (i32, i32) {
    %c0_i32 = arith.constant 0 : i32
    %c0_i32_0 = arith.constant 0 : i32
    %c0_i32_1 = arith.constant 0 : i32
    return %c0_i32, %c0_i32_0 : i32, i32
  }
  func.func @transform_5(%arg0: i32) -> (i32, i32) {
    %c0_i32 = arith.constant 0 : i32
    %c0_i32_0 = arith.constant 0 : i32
    %c0_i32_1 = arith.constant 0 : i32
    return %c0_i32, %c0_i32_0 : i32, i32
  }
  func.func @transform_6(%arg0: i32) -> (i32, i32) {
    %c0_i32 = arith.constant 0 : i32
    %c0_i32_0 = arith.constant 0 : i32
    %c0_i32_1 = arith.constant 0 : i32
    return %c0_i32, %c0_i32_0 : i32, i32
  }
  func.func @transform_7(%arg0: i32) -> (i32, i32) {
    %c0_i32 = arith.constant 0 : i32
    %c0_i32_0 = arith.constant 0 : i32
    %c0_i32_1 = arith.constant 0 : i32
    return %c0_i32, %c0_i32_0 : i32, i32
  }
  func.func @transform_8(%arg0: i32) -> (i32, i32) {
    %c0_i32 = arith.constant 0 : i32
    %c0_i32_0 = arith.constant 0 : i32
    %c0_i32_1 = arith.constant 0 : i32
    return %c0_i32, %c0_i32_0 : i32, i32
  }
  func.func @transform_9(%arg0: i32) -> (i32, i32) {
    %c0_i32 = arith.constant 0 : i32
    %c0_i32_0 = arith.constant 0 : i32
    %c0_i32_1 = arith.constant 0 : i32
    return %c0_i32, %c0_i32_0 : i32, i32
  }
  func.func @transform_10(%arg0: i32) -> (i32, i32) {
    %c0_i32 = arith.constant 0 : i32
    %c0_i32_0 = arith.constant 0 : i32
    %c0_i32_1 = arith.constant 0 : i32
    return %c0_i32, %c0_i32_0 : i32, i32
  }
  func.func @transform_11(%arg0: i32) -> (i32, i32) {
    %c0_i32 = arith.constant 0 : i32
    %c0_i32_0 = arith.constant 0 : i32
    return %arg0, %c0_i32 : i32, i32
  }
}

</mosaic_0001>

<bundles_post_ra>
// kernel: softmax_mlp_forward.1
= control target key start
LH: loop header
LB: loop body
LE: loop exit
PB: predicated region body
PF: predicated region fallthrough
CT: control target
= control target key end

     0   :  { %vm5386_vm0 = vcmask 523264   ;;  %s9498_s1 = inlined_call_operand.vmem [shape: bf16[896,512], index: 1, kind: input, shape index: {}]   ;;  %s9499_s0 = inlined_call_operand.vmem [shape: bf16[256,896], index: 0, kind: input, shape index: {}]   ;;  %s9500_s3 = inlined_call_operand.vmem [shape: bf16[512,256], index: 3, kind: input, shape index: {}]   ;;  %s9501_s2 = inlined_call_operand.vmem [shape: f32[1,512], index: 2, kind: input, shape index: {}]   ;;  %s9502_s5 = inlined_call_operand.vmem [shape: bf16[256,128], index: 5, kind: input, shape index: {}]   ;;  %s9503_s4 = inlined_call_operand.vmem [shape: f32[1,256], index: 4, kind: input, shape index: {}]   ;;  %s9504_s7 = inlined_call_operand.vmem [shape: bf16[128,64], index: 7, kind: input, shape index: {}]   ;;  %s9505_s6 = inlined_call_operand.vmem [shape: f32[1,128], index: 6, kind: input, shape index: {}]   ;;  %s9506_s9 = inlined_call_operand.vmem [shape: bf16[64,128], index: 9, kind: input, shape index: {}]   ;;  %s9507_s8 = inlined_call_operand.vmem [shape: f32[1,64], index: 8, kind: input, shape index: {}]   ;;  %s9508_s10 = inlined_call_operand.vmem [shape: f32[1,128], index: 10, kind: input, shape index: {}]   ;;  %s9509_s11 = inlined_call_operand.vmem [shape: f32[256,128], index: 11, kind: output, shape index: {}]  }
   0x1   :  { %v6964_v0 = vld [vmem:[%s9498_s1 + $0x4] ss:$16 sps:$4 sm:$0xff]   ;;  %v6966_v1 = vld [vmem:[%s9498_s1 + $0xc] ss:$16 sps:$4 sm:$0xff]   ;;  %v6968_v2 = vld [vmem:[%s9498_s1] ss:$16 sps:$4 sm:$0xff]  }
   0x2   :  { %2109 = vmatprep.subr.bf16.mxu0 %v6964_v0  ;;  %v6969_v3 = vld [vmem:[%s9498_s1 + $0x8] ss:$16 sps:$4 sm:$0xff]   ;;  %2881 = vmatprep.subr.bf16.mxu1 %v6966_v1  ;;  %v6970_v4 = vld [vmem:[%s9498_s1 + $0x24] ss:$16 sps:$4 sm:$0xff]   ;;  %v6972_v5 = vld [vmem:[%s9498_s1 + $0x2c] ss:$16 sps:$4 sm:$0xff]  }
   0x3   :  { %2110 = vmatpush1.bf16.msra.mxu0 %v6968_v2  ;;  %2882 = vmatpush1.bf16.msra.mxu1 %v6969_v3  ;;  %v6974_v6 = vld [vmem:[%s9498_s1 + $0x20] ss:$16 sps:$4 sm:$0xff]   ;;  %v6975_v7 = vld [vmem:[%s9498_s1 + $0x28] ss:$16 sps:$4 sm:$0xff]   ;;  %v6976_v8 = vld [vmem:[%s9498_s1 + $0x44] ss:$16 sps:$4 sm:$0xff]  }
   0x4   :  { %2111 = vmatprep.subr.bf16.mxu0 %v6970_v4  ;;  %2883 = vmatprep.subr.bf16.mxu1 %v6972_v5  ;;  %v6978_v9 = vld [vmem:[%s9498_s1 + $0x4c] ss:$16 sps:$4 sm:$0xff]   ;;  %v6980_v10 = vld [vmem:[%s9498_s1 + $0x40] ss:$16 sps:$4 sm:$0xff]   ;;  %v6981_v11 = vld [vmem:[%s9498_s1 + $0x48] ss:$16 sps:$4 sm:$0xff]  }
   0x5   :  { %v6982_v12 = vld [vmem:[%s9498_s1 + $0x64] ss:$16 sps:$4 sm:$0xff]   ;;  %v6984_v13 = vld [vmem:[%s9498_s1 + $0x6c] ss:$16 sps:$4 sm:$0xff]   ;;  %v6986_v14 = vld [vmem:[%s9498_s1 + $0x60] ss:$16 sps:$4 sm:$0xff]  }
   0x6   :  { %v6987_v15 = vld [vmem:[%s9498_s1 + $0x68] ss:$16 sps:$4 sm:$0xff]   ;;  %v6988_v16 = vld [vmem:[%s9498_s1 + $0x84] ss:$16 sps:$4 sm:$0xff]   ;;  %v6990_v17 = vld [vmem:[%s9498_s1 + $0x8c] ss:$16 sps:$4 sm:$0xff]  }
   0x7   :  { %2112 = vmatpush1.bf16.msra.mxu0 %v6974_v6  ;;  %2884 = vmatpush1.bf16.msra.mxu1 %v6975_v7  ;;  %v6992_v18 = vld [vmem:[%s9498_s1 + $0x80] ss:$16 sps:$4 sm:$0xff]   ;;  %v6993_v19 = vld [vmem:[%s9498_s1 + $0x88] ss:$16 sps:$4 sm:$0xff]   ;;  %v6994_v20 = vld [vmem:[%s9498_s1 + $0xa4] ss:$16 sps:$4 sm:$0xff]  }
   0x8   :  { %2113 = vmatprep.subr.bf16.mxu0 %v6976_v8  ;;  %2885 = vmatprep.subr.bf16.mxu1 %v6978_v9  ;;  %v6996_v21 = vld [vmem:[%s9498_s1 + $0xac] ss:$16 sps:$4 sm:$0xff]   ;;  %v6998_v22 = vld [vmem:[%s9498_s1 + $0xa0] ss:$16 sps:$4 sm:$0xff]   ;;  %v6999_v23 = vld [vmem:[%s9498_s1 + $0xa8] ss:$16 sps:$4 sm:$0xff]  }
   0x9   :  { %v7000_v24 = vld [vmem:[%s9498_s1 + $0xc4] ss:$16 sps:$4 sm:$0xff]   ;;  %v7002_v25 = vld [vmem:[%s9498_s1 + $0xcc] ss:$16 sps:$4 sm:$0xff]   ;;  %v7004_v26 = vld [vmem:[%s9498_s1 + $0xc0] ss:$16 sps:$4 sm:$0xff]  }
   0xa   :  { %v7005_v27 = vld [vmem:[%s9498_s1 + $0xc8] ss:$16 sps:$4 sm:$0xff]   ;;  %v7006_v28 = vld [vmem:[%s9498_s1 + $0xe4] ss:$16 sps:$4 sm:$0xff]   ;;  %v7008_v29 = vld [vmem:[%s9498_s1 + $0xec] ss:$16 sps:$4 sm:$0xff]  }
   0xb   :  { %2114 = vmatpush1.bf16.msra.mxu0 %v6980_v10  ;;  %2886 = vmatpush1.bf16.msra.mxu1 %v6981_v11  ;;  %v7010_v30 = vld [vmem:[%s9498_s1 + $0xe0] ss:$16 sps:$4 sm:$0xff]   ;;  %v7011_v31 = vld [vmem:[%s9498_s1 + $0xe8] ss:$16 sps:$4 sm:$0xff]   ;;  %v7012_v32 = vld [vmem:[%s9498_s1 + $0x104] ss:$16 sps:$4 sm:$0xff]  }
   0xc   :  { %2115 = vmatprep.subr.bf16.mxu0 %v6982_v12  ;;  %2887 = vmatprep.subr.bf16.mxu1 %v6984_v13  ;;  %v7014_v33 = vld [vmem:[%s9498_s1 + $0x10c] ss:$16 sps:$4 sm:$0xff]   ;;  %v7016_v34 = vld [vmem:[%s9498_s1 + $0x100] ss:$16 sps:$4 sm:$0xff]   ;;  %v7017_v35 = vld [vmem:[%s9498_s1 + $0x108] ss:$16 sps:$4 sm:$0xff]  }
   0xd   :  { %v7018_v36 = vld [vmem:[%s9498_s1 + $0x124] ss:$16 sps:$4 sm:$0xff]   ;;  %v7020_v37 = vld [vmem:[%s9498_s1 + $0x12c] ss:$16 sps:$4 sm:$0xff]   ;;  %v7022_v38 = vld [vmem:[%s9498_s1 + $0x120] ss:$16 sps:$4 sm:$0xff]  }
   0xe   :  { %v7023_v39 = vld [vmem:[%s9498_s1 + $0x128] ss:$16 sps:$4 sm:$0xff]   ;;  %v7024_v40 = vld [vmem:[%s9498_s1 + $0x144] ss:$16 sps:$4 sm:$0xff]   ;;  %v7026_v41 = vld [vmem:[%s9498_s1 + $0x14c] ss:$16 sps:$4 sm:$0xff]  }
   0xf   :  { %2116 = vmatpush1.bf16.msra.mxu0 %v6986_v14  ;;  %2888 = vmatpush1.bf16.msra.mxu1 %v6987_v15  ;;  %v7028_v42 = vld [vmem:[%s9498_s1 + $0x140] ss:$16 sps:$4 sm:$0xff]   ;;  %v7029_v43 = vld [vmem:[%s9498_s1 + $0x148] ss:$16 sps:$4 sm:$0xff]   ;;  %v7030_v44 = vld [vmem:[%s9498_s1 + $0x164] ss:$16 sps:$4 sm:$0xff]  }
  0x10   :  { %2117 = vmatprep.subr.bf16.mxu0 %v6988_v16  ;;  %2889 = vmatprep.subr.bf16.mxu1 %v6990_v17  ;;  %v7032_v45 = vld [vmem:[%s9498_s1 + $0x16c] ss:$16 sps:$4 sm:$0xff]   ;;  %v7034_v46 = vld [vmem:[%s9498_s1 + $0x160] ss:$16 sps:$4 sm:$0xff]   ;;  %v7035_v47 = vld [vmem:[%s9498_s1 + $0x168] ss:$16 sps:$4 sm:$0xff]  }
  0x11   :  { %v7062_v48 = vld [vmem:[%s9499_s0 + $0x4] ss:$28 sps:$4 sm:$0xff]   ;;  %v7038_v50 = vld [vmem:[%s9498_s1 + $0x18c] ss:$16 sps:$4 sm:$0xff]   ;;  %v7041_v52 = vld [vmem:[%s9498_s1 + $0x188] ss:$16 sps:$4 sm:$0xff]  }
  0x12   :  { %v7036_v49 = vld [vmem:[%s9498_s1 + $0x184] ss:$16 sps:$4 sm:$0xff]   ;;  %2141 = vmatprep.mubr.bf16.mxu0 %v7062_v48  ;;  %2913 = vmatprep.mubr.bf16.mxu1 %v7062_v48  ;;  %v7040_v51 = vld [vmem:[%s9498_s1 + $0x180] ss:$16 sps:$4 sm:$0xff]   ;;  %v7044_v54 = vld [vmem:[%s9498_s1 + $0x1ac] ss:$16 sps:$4 sm:$0xff]  }
  0x13   :  { %2118 = vmatpush1.bf16.msra.mxu0 %v6992_v18  ;;  %2890 = vmatpush1.bf16.msra.mxu1 %v6993_v19  ;;  %v7042_v53 = vld [vmem:[%s9498_s1 + $0x1a4] ss:$16 sps:$4 sm:$0xff]   ;;  %v7046_v55 = vld [vmem:[%s9498_s1 + $0x1a0] ss:$16 sps:$4 sm:$0xff]   ;;  %v7047_v56 = vld [vmem:[%s9498_s1 + $0x1a8] ss:$16 sps:$4 sm:$0xff]  }
  0x14   :  { %2119 = vmatprep.subr.bf16.mxu0 %v6994_v20  ;;  %2891 = vmatprep.subr.bf16.mxu1 %v6996_v21  ;;  %v7048_v57 = vld [vmem:[%s9498_s1 + $0x1c4] ss:$16 sps:$4 sm:$0xff]   ;;  %v7050_v58 = vld [vmem:[%s9498_s1 + $0x1cc] ss:$16 sps:$4 sm:$0xff]   ;;  %v7052_v59 = vld [vmem:[%s9498_s1 + $0x1c0] ss:$16 sps:$4 sm:$0xff]  }
  0x15   :  { %v7053_v60 = vld [vmem:[%s9498_s1 + $0x1c8] ss:$16 sps:$4 sm:$0xff]   ;;  %v7054_v61 = vld [vmem:[%s9498_s1 + $0x1e4] ss:$16 sps:$4 sm:$0xff]   ;;  %v7056_v62 = vld [vmem:[%s9498_s1 + $0x1ec] ss:$16 sps:$4 sm:$0xff]  }
  0x16   :  { %v7058_v63 = vld [vmem:[%s9498_s1 + $0x1e0] ss:$16 sps:$4 sm:$0xff]   ;;  %v7059_v0 = vld [vmem:[%s9498_s1 + $0x1e8] ss:$16 sps:$4 sm:$0xff]   ;;  %v7065_v1 = vld [vmem:[%s9498_s1 + $0x204] ss:$16 sps:$4 sm:$0xff]  }
  0x17   :  { %2120 = vmatpush1.bf16.msra.mxu0 %v6998_v22  ;;  %2892 = vmatpush1.bf16.msra.mxu1 %v6999_v23  ;;  %v7060_v2 = vld [vmem:[%s9499_s0] ss:$28 sps:$4 sm:$0xff]   ;;  %v7071_v5 = vld [vmem:[%s9498_s1 + $0x224] ss:$16 sps:$4 sm:$0xff]   ;;  %v7114_v7 = vld [vmem:[%s9498_s1 + $0x208] ss:$16 sps:$4 sm:$0xff]  }
  0x18   :  { %2121 = vmatprep.subr.bf16.mxu0 %v7000_v24  ;;  %2893 = vmatprep.subr.bf16.mxu1 %v7002_v25  ;;  %v7063_v3 = vld [vmem:[%s9498_s1 + $0x200] ss:$16 sps:$4 sm:$0xff]   ;;  %v7066_v4 = vld [vmem:[%s9499_s0 + $0x3c] ss:$28 sps:$4 sm:$0xff]   ;;  %v7077_v9 = vld [vmem:[%s9498_s1 + $0x244] ss:$16 sps:$4 sm:$0xff]  }
  0x19   :  { %v7069_v6 = vld [vmem:[%s9498_s1 + $0x220] ss:$16 sps:$4 sm:$0xff]   ;;  %v7116_v8 = vld [vmem:[%s9498_s1 + $0x20c] ss:$16 sps:$4 sm:$0xff]   ;;  %v7068_v11 = vld [vmem:[%s9499_s0 + $0x38] ss:$28 sps:$4 sm:$0xff]  }
  0x1a   :  { %v7119_v10 = vld [vmem:[%s9498_s1 + $0x22c] ss:$16 sps:$4 sm:$0xff]   ;;  %v7072_v12 = vld [vmem:[%s9499_s0 + $0x74] ss:$28 sps:$4 sm:$0xff]   ;;  %v7117_v14 = vld [vmem:[%s9498_s1 + $0x228] ss:$16 sps:$4 sm:$0xff]  }
  0x1b   :  { %2122 = vmatpush1.bf16.msra.mxu0 %v7004_v26  ;;  %2894 = vmatpush1.bf16.msra.mxu1 %v7005_v27  ;;  %v7075_v13 = vld [vmem:[%s9498_s1 + $0x240] ss:$16 sps:$4 sm:$0xff]   ;;  %v7083_v15 = vld [vmem:[%s9498_s1 + $0x264] ss:$16 sps:$4 sm:$0xff]   ;;  %v7128_v16 = vld [vmem:[%s9498_s1 + $0x24c] ss:$16 sps:$4 sm:$0xff]  }
  0x1c   :  { %2123 = vmatprep.subr.bf16.mxu0 %v7006_v28  ;;  %2895 = vmatprep.subr.bf16.mxu1 %v7008_v29  ;;  %v7081_v17 = vld [vmem:[%s9498_s1 + $0x260] ss:$16 sps:$4 sm:$0xff]   ;;  %v7126_v18 = vld [vmem:[%s9498_s1 + $0x248] ss:$16 sps:$4 sm:$0xff]   ;;  %v7089_v19 = vld [vmem:[%s9498_s1 + $0x284] ss:$16 sps:$4 sm:$0xff]  }
  0x1d   :  { %v7131_v20 = vld [vmem:[%s9498_s1 + $0x26c] ss:$16 sps:$4 sm:$0xff]   ;;  %v7087_v23 = vld [vmem:[%s9498_s1 + $0x280] ss:$16 sps:$4 sm:$0xff]   ;;  %v7129_v24 = vld [vmem:[%s9498_s1 + $0x268] ss:$16 sps:$4 sm:$0xff]  }
  0x1e   :  { %v7074_v21 = vld [vmem:[%s9499_s0 + $0x70] ss:$28 sps:$4 sm:$0xff]   ;;  %v7095_v25 = vld [vmem:[%s9498_s1 + $0x2a4] ss:$16 sps:$4 sm:$0xff]   ;;  %v7138_v28 = vld [vmem:[%s9498_s1 + $0x288] ss:$16 sps:$4 sm:$0xff]  }
  0x1f   :  { %2124 = vmatpush1.bf16.msra.mxu0 %v7010_v30  ;;  %2896 = vmatpush1.bf16.msra.mxu1 %v7011_v31  ;;  %v7078_v22 = vld [vmem:[%s9499_s0 + $0xac] ss:$28 sps:$4 sm:$0xff]   ;;  %v7093_v27 = vld [vmem:[%s9498_s1 + $0x2a0] ss:$16 sps:$4 sm:$0xff]   ;;  %v7101_v29 = vld [vmem:[%s9498_s1 + $0x2c4] ss:$16 sps:$4 sm:$0xff]  }
  0x20   :  { %2125 = vmatprep.subr.bf16.mxu0 %v7012_v32  ;;  %2897 = vmatprep.subr.bf16.mxu1 %v7014_v33  ;;  %v7140_v26 = vld [vmem:[%s9498_s1 + $0x28c] ss:$16 sps:$4 sm:$0xff]   ;;  %v7080_v31 = vld [vmem:[%s9499_s0 + $0xa8] ss:$28 sps:$4 sm:$0xff]   ;;  %v7099_v33 = vld [vmem:[%s9498_s1 + $0x2c0] ss:$16 sps:$4 sm:$0xff]  }
  0x21   :  { %v7143_v30 = vld [vmem:[%s9498_s1 + $0x2ac] ss:$16 sps:$4 sm:$0xff]   ;;  %v7084_v32 = vld [vmem:[%s9499_s0 + $0xe4] ss:$28 sps:$4 sm:$0xff]   ;;  %v7162_v48 = vld [vmem:[%s9498_s1 + $0x308] ss:$16 sps:$4 sm:$0xff]  }
  0x23   :  { %2126 = vmatpush1.bf16.msra.mxu0 %v7016_v34  ;;  %2898 = vmatpush1.bf16.msra.mxu1 %v7017_v35  ;;  %v7141_v34 = vld [vmem:[%s9498_s1 + $0x2a8] ss:$16 sps:$4 sm:$0xff]   ;;  %v7107_v35 = vld [vmem:[%s9498_s1 + $0x2e4] ss:$16 sps:$4 sm:$0xff]  }
  0x24   :  { %2127 = vmatprep.subr.bf16.mxu0 %v7018_v36  ;;  %2899 = vmatprep.subr.bf16.mxu1 %v7020_v37  ;;  %v7152_v36 = vld [vmem:[%s9498_s1 + $0x2cc] ss:$16 sps:$4 sm:$0xff]   ;;  %v7105_v37 = vld [vmem:[%s9498_s1 + $0x2e0] ss:$16 sps:$4 sm:$0xff]  }
  0x27   :  { %2128 = vmatpush1.bf16.msra.mxu0 %v7022_v38  ;;  %2900 = vmatpush1.bf16.msra.mxu1 %v7023_v39  ;;  %v7150_v38 = vld [vmem:[%s9498_s1 + $0x2c8] ss:$16 sps:$4 sm:$0xff]   ;;  %v7113_v39 = vld [vmem:[%s9498_s1 + $0x304] ss:$16 sps:$4 sm:$0xff]  }
  0x28   :  { %2129 = vmatprep.subr.bf16.mxu0 %v7024_v40  ;;  %2901 = vmatprep.subr.bf16.mxu1 %v7026_v41  ;;  %v7155_v40 = vld [vmem:[%s9498_s1 + $0x2ec] ss:$16 sps:$4 sm:$0xff]  }
  0x29   :  { %v7086_v41 = vld [vmem:[%s9499_s0 + $0xe0] ss:$28 sps:$4 sm:$0xff]  }
  0x2b   :  { %2130 = vmatpush1.bf16.msra.mxu0 %v7028_v42  ;;  %2902 = vmatpush1.bf16.msra.mxu1 %v7029_v43  ;;  %v7090_v42 = vld [vmem:[%s9499_s0 + $0x11c] ss:$28 sps:$4 sm:$0xff]   ;;  %v7111_v43 = vld [vmem:[%s9498_s1 + $0x300] ss:$16 sps:$4 sm:$0xff]  }
  0x2c   :  { %2131 = vmatprep.subr.bf16.mxu0 %v7030_v44  ;;  %2903 = vmatprep.subr.bf16.mxu1 %v7032_v45  ;;  %v7153_v44 = vld [vmem:[%s9498_s1 + $0x2e8] ss:$16 sps:$4 sm:$0xff]   ;;  %v7125_v45 = vld [vmem:[%s9498_s1 + $0x324] ss:$16 sps:$4 sm:$0xff]  }
  0x2f   :  { %2132 = vmatpush1.bf16.msra.mxu0 %v7034_v46  ;;  %2904 = vmatpush1.bf16.msra.mxu1 %v7035_v47  ;;  %v7164_v46 = vld [vmem:[%s9498_s1 + $0x30c] ss:$16 sps:$4 sm:$0xff]   ;;  %v7123_v47 = vld [vmem:[%s9498_s1 + $0x320] ss:$16 sps:$4 sm:$0xff]  }
  0x30   :  { %2133 = vmatprep.subr.bf16.mxu0 %v7036_v49  ;;  %2905 = vmatprep.subr.bf16.mxu1 %v7038_v50  ;;  %v7137_v49 = vld [vmem:[%s9498_s1 + $0x344] ss:$16 sps:$4 sm:$0xff]   ;;  %v7167_v50 = vld [vmem:[%s9498_s1 + $0x32c] ss:$16 sps:$4 sm:$0xff]  }
  0x33   :  { %2134 = vmatpush1.bf16.msra.mxu0 %v7040_v51  ;;  %2906 = vmatpush1.bf16.msra.mxu1 %v7041_v52  ;;  %v7092_v51 = vld [vmem:[%s9499_s0 + $0x118] ss:$28 sps:$4 sm:$0xff]  }
  0x34   :  { %2135 = vmatprep.subr.bf16.mxu0 %v7042_v53  ;;  %2907 = vmatprep.subr.bf16.mxu1 %v7044_v54  ;;  %v7096_v52 = vld [vmem:[%s9499_s0 + $0x154] ss:$28 sps:$4 sm:$0xff]   ;;  %v7165_v54 = vld [vmem:[%s9498_s1 + $0x328] ss:$16 sps:$4 sm:$0xff]  }
  0x35   :  { %v7135_v53 = vld [vmem:[%s9498_s1 + $0x340] ss:$16 sps:$4 sm:$0xff]  }
  0x37   :  { %2136 = vmatpush1.bf16.msra.mxu0 %v7046_v55  ;;  %2908 = vmatpush1.bf16.msra.mxu1 %v7047_v56  ;;  %v7149_v55 = vld [vmem:[%s9498_s1 + $0x364] ss:$16 sps:$4 sm:$0xff]   ;;  %v7176_v56 = vld [vmem:[%s9498_s1 + $0x34c] ss:$16 sps:$4 sm:$0xff]  }
  0x38   :  { %2137 = vmatprep.subr.bf16.mxu0 %v7048_v57  ;;  %2909 = vmatprep.subr.bf16.mxu1 %v7050_v58  ;;  %v7147_v57 = vld [vmem:[%s9498_s1 + $0x360] ss:$16 sps:$4 sm:$0xff]   ;;  %v7174_v58 = vld [vmem:[%s9498_s1 + $0x348] ss:$16 sps:$4 sm:$0xff]  }
  0x3b   :  { %2138 = vmatpush1.bf16.msra.mxu0 %v7052_v59  ;;  %2910 = vmatpush1.bf16.msra.mxu1 %v7053_v60  ;;  %v7161_v59 = vld [vmem:[%s9498_s1 + $0x384] ss:$16 sps:$4 sm:$0xff]   ;;  %v7179_v60 = vld [vmem:[%s9498_s1 + $0x36c] ss:$16 sps:$4 sm:$0xff]  }
  0x3c   :  { %2139 = vmatprep.subr.bf16.mxu0 %v7054_v61  ;;  %2911 = vmatprep.subr.bf16.mxu1 %v7056_v62  ;;  %v7098_v61 = vld [vmem:[%s9499_s0 + $0x150] ss:$28 sps:$4 sm:$0xff]  }
  0x3d   :  { %v7102_v62 = vld [vmem:[%s9499_s0 + $0x18c] ss:$28 sps:$4 sm:$0xff]  }
  0x3f   :  { %2140 = vmatpush1.bf16.msra.mxu0 %v7058_v63  ;;  %2912 = vmatpush1.bf16.msra.mxu1 %v7059_v0  ;;  %v7159_v63 = vld [vmem:[%s9498_s1 + $0x380] ss:$16 sps:$4 sm:$0xff]   ;;  %v7177_v0 = vld [vmem:[%s9498_s1 + $0x368] ss:$16 sps:$4 sm:$0xff]  }
  0x40   :  { %2302 = vmatprep.subr.bf16.mxu0 %v7065_v1  ;;  %3074 = vmatprep.subr.bf16.mxu1 %v7116_v8  ;;  %v7173_v1 = vld [vmem:[%s9498_s1 + $0x3a4] ss:$16 sps:$4 sm:$0xff]  }
  0x41   :  { %v7108_v8 = vld [vmem:[%s9499_s0 + $0x1c4] ss:$28 sps:$4 sm:$0xff]  }
  0x42   :  { %2142 = vmatmul.mubr.bf16.vlgmr.msra.gmra.mrb[0].mxu0 %v7060_v2  ;;  %2914 = vmatmul.mubr.bf16.vlgmr.msra.gmra.mrb[0].mxu1 %v7060_v2  ;;  %v7188_v2 = vld [vmem:[%s9498_s1 + $0x38c] ss:$16 sps:$4 sm:$0xff]  }
  0x43   :  { %2303 = vmatpush1.bf16.msra.mxu0 %v7063_v3  ;;  %2151 = vmatprep.mubr.bf16.mxu0 %v7066_v4  ;;  %v7171_v3 = vld [vmem:[%s9498_s1 + $0x3a0] ss:$16 sps:$4 sm:$0xff]  }
  0x44   :  { %2923 = vmatprep.mubr.bf16.mxu1 %v7066_v4  ;;  %2304 = vmatprep.subr.bf16.mxu0 %v7071_v5  ;;  %v7186_v4 = vld [vmem:[%s9498_s1 + $0x388] ss:$16 sps:$4 sm:$0xff]   ;;  %v7185_v5 = vld [vmem:[%s9498_s1 + $0x3c4] ss:$16 sps:$4 sm:$0xff]  }
  0x45   :  { %3075 = vmatpush1.bf16.msra.mxu1 %v7114_v7  ;;  %v7104_v7 = vld [vmem:[%s9499_s0 + $0x188] ss:$28 sps:$4 sm:$0xff]  }
  0x46   :  { %3076 = vmatprep.subr.bf16.mxu1 %v7119_v10  ;;  %v7189_v10 = vld [vmem:[%s9498_s1 + $0x3a8] ss:$16 sps:$4 sm:$0xff]  }
  0x47   :  { %2305 = vmatpush1.bf16.msra.mxu0 %v7069_v6  ;;  %v7191_v6 = vld [vmem:[%s9498_s1 + $0x3ac] ss:$16 sps:$4 sm:$0xff]  }
  0x48   :  { %2306 = vmatprep.subr.bf16.mxu0 %v7077_v9  ;;  %v7183_v9 = vld [vmem:[%s9498_s1 + $0x3c0] ss:$16 sps:$4 sm:$0xff]  }
  0x49   :  { %3077 = vmatpush1.bf16.msra.mxu1 %v7117_v14  ;;  %v7198_v14 = vld [vmem:[%s9498_s1 + $0x3c8] ss:$16 sps:$4 sm:$0xff]  }
  0x4a   :  { %2152 = vmatmul.mubr.bf16.gmra.mrb[4].mxu0 %v7068_v11  ;;  %2924 = vmatmul.mubr.bf16.gmra.mrb[4].mxu1 %v7068_v11  ;;  %v7197_v11 = vld [vmem:[%s9498_s1 + $0x3e4] ss:$16 sps:$4 sm:$0xff]  }
  0x4b   :  { %2161 = vmatprep.mubr.bf16.mxu0 %v7072_v12  ;;  %2933 = vmatprep.mubr.bf16.mxu1 %v7072_v12  ;;  %v7200_v12 = vld [vmem:[%s9498_s1 + $0x3cc] ss:$16 sps:$4 sm:$0xff]  }
  0x4c   :  { %2307 = vmatpush1.bf16.msra.mxu0 %v7075_v13  ;;  %3078 = vmatprep.subr.bf16.mxu1 %v7128_v16  ;;  %v7195_v13 = vld [vmem:[%s9498_s1 + $0x3e0] ss:$16 sps:$4 sm:$0xff]   ;;  %v7209_v16 = vld [vmem:[%s9498_s1 + $0x404] ss:$16 sps:$4 sm:$0xff]  }
  0x4d   :  { %2308 = vmatprep.subr.bf16.mxu0 %v7083_v15  ;;  %3079 = vmatpush1.bf16.msra.mxu1 %v7126_v18  ;;  %v7203_v15 = vld [vmem:[%s9498_s1 + $0x3ec] ss:$16 sps:$4 sm:$0xff]  }
  0x4e   :  { %3080 = vmatprep.subr.bf16.mxu1 %v7131_v20  ;;  %v7120_v18 = vld [vmem:[%s9499_s0 + $0x1fc] ss:$28 sps:$4 sm:$0xff]  }
  0x4f   :  { %v7260_v20 = vld [vmem:[%s9498_s1 + $0x40c] ss:$16 sps:$4 sm:$0xff]  }
  0x50   :  { %2309 = vmatpush1.bf16.msra.mxu0 %v7081_v17  ;;  %v7110_v17 = vld [vmem:[%s9499_s0 + $0x1c0] ss:$28 sps:$4 sm:$0xff]  }
  0x51   :  { %2310 = vmatprep.subr.bf16.mxu0 %v7089_v19  ;;  %3081 = vmatpush1.bf16.msra.mxu1 %v7129_v24  ;;  %v7201_v19 = vld [vmem:[%s9498_s1 + $0x3e8] ss:$16 sps:$4 sm:$0xff]  }
  0x52   :  { %2162 = vmatmul.mubr.bf16.gmra.mrb[8].mxu0 %v7074_v21  ;;  %2934 = vmatmul.mubr.bf16.gmra.mrb[8].mxu1 %v7074_v21  ;;  %v7122_v21 = vld [vmem:[%s9499_s0 + $0x1f8] ss:$28 sps:$4 sm:$0xff]   ;;  %v7144_v24 = vld [vmem:[%s9499_s0 + $0x26c] ss:$28 sps:$4 sm:$0xff]  }
  0x53   :  { %2171 = vmatprep.mubr.bf16.mxu0 %v7078_v22  ;;  %2943 = vmatprep.mubr.bf16.mxu1 %v7078_v22  ;;  %v7132_v22 = vld [vmem:[%s9499_s0 + $0x234] ss:$28 sps:$4 sm:$0xff]  }
  0x54   :  { %2311 = vmatpush1.bf16.msra.mxu0 %v7087_v23  ;;  %3082 = vmatprep.subr.bf16.mxu1 %v7140_v26  ;;  %v7134_v23 = vld [vmem:[%s9499_s0 + $0x230] ss:$28 sps:$4 sm:$0xff]   ;;  %v7156_v26 = vld [vmem:[%s9499_s0 + $0x2a4] ss:$28 sps:$4 sm:$0xff]  }
  0x55   :  { %2312 = vmatprep.subr.bf16.mxu0 %v7095_v25  ;;  %3083 = vmatpush1.bf16.msra.mxu1 %v7138_v28  ;;  %v7146_v25 = vld [vmem:[%s9499_s0 + $0x268] ss:$28 sps:$4 sm:$0xff]   ;;  %v7168_v28 = vld [vmem:[%s9499_s0 + $0x2dc] ss:$28 sps:$4 sm:$0xff]  }
  0x56   :  { %3084 = vmatprep.subr.bf16.mxu1 %v7143_v30  ;;  %v7180_v30 = vld [vmem:[%s9499_s0 + $0x314] ss:$28 sps:$4 sm:$0xff]  }
  0x58   :  { %2313 = vmatpush1.bf16.msra.mxu0 %v7093_v27  ;;  %v7158_v27 = vld [vmem:[%s9499_s0 + $0x2a0] ss:$28 sps:$4 sm:$0xff]  }
  0x59   :  { %2314 = vmatprep.subr.bf16.mxu0 %v7101_v29  ;;  %3085 = vmatpush1.bf16.msra.mxu1 %v7141_v34  ;;  %v7170_v29 = vld [vmem:[%s9499_s0 + $0x2d8] ss:$28 sps:$4 sm:$0xff]   ;;  %v7206_v34 = vld [vmem:[%s9499_s0 + $0xc] ss:$28 sps:$4 sm:$0xff]  }
  0x5a   :  { %2172 = vmatmul.mubr.bf16.gmra.mrb[12].mxu0 %v7080_v31  ;;  %2944 = vmatmul.mubr.bf16.gmra.mrb[12].mxu1 %v7080_v31  ;;  %v7182_v31 = vld [vmem:[%s9499_s0 + $0x310] ss:$28 sps:$4 sm:$0xff]  }
  0x5b   :  { %2181 = vmatprep.mubr.bf16.mxu0 %v7084_v32  ;;  %2953 = vmatprep.mubr.bf16.mxu1 %v7084_v32  ;;  %v7192_v32 = vld [vmem:[%s9499_s0 + $0x34c] ss:$28 sps:$4 sm:$0xff]  }
  0x5c   :  { %2315 = vmatpush1.bf16.msra.mxu0 %v7099_v33  ;;  %3086 = vmatprep.subr.bf16.mxu1 %v7152_v36  ;;  %v7194_v33 = vld [vmem:[%s9499_s0 + $0x348] ss:$28 sps:$4 sm:$0xff]   ;;  %v7207_v36 = vld [vmem:[%s9498_s1 + $0x400] ss:$16 sps:$4 sm:$0xff]  }
  0x5d   :  { %2316 = vmatprep.subr.bf16.mxu0 %v7107_v35  ;;  %3087 = vmatpush1.bf16.msra.mxu1 %v7150_v38  ;;  %v7204_v35 = vld [vmem:[%s9499_s0 + $0x8] ss:$28 sps:$4 sm:$0xff]  }
  0x5e   :  { %3088 = vmatprep.subr.bf16.mxu1 %v7155_v40  ;;  %v7215_v38 = vld [vmem:[%s9498_s1 + $0x424] ss:$16 sps:$4 sm:$0xff]   ;;  %v7213_v40 = vld [vmem:[%s9498_s1 + $0x420] ss:$16 sps:$4 sm:$0xff]  }
  0x60   :  { %2317 = vmatpush1.bf16.msra.mxu0 %v7105_v37  ;;  %v7210_v37 = vld [vmem:[%s9499_s0 + $0x44] ss:$28 sps:$4 sm:$0xff]  }
  0x61   :  { %2318 = vmatprep.subr.bf16.mxu0 %v7113_v39  ;;  %3089 = vmatpush1.bf16.msra.mxu1 %v7153_v44  ;;  %v7258_v39 = vld [vmem:[%s9498_s1 + $0x408] ss:$16 sps:$4 sm:$0xff]  }
  0x62   :  { %2182 = vmatmul.mubr.bf16.gmra.mrb[16].mxu0 %v7086_v41  ;;  %2954 = vmatmul.mubr.bf16.gmra.mrb[16].mxu1 %v7086_v41  ;;  %v7263_v41 = vld [vmem:[%s9498_s1 + $0x42c] ss:$16 sps:$4 sm:$0xff]   ;;  %v7261_v44 = vld [vmem:[%s9498_s1 + $0x428] ss:$16 sps:$4 sm:$0xff]  }
  0x63   :  { %2191 = vmatprep.mubr.bf16.mxu0 %v7090_v42  ;;  %2963 = vmatprep.mubr.bf16.mxu1 %v7090_v42  ;;  %v7221_v42 = vld [vmem:[%s9498_s1 + $0x444] ss:$16 sps:$4 sm:$0xff]  }
  0x64   :  { %2319 = vmatpush1.bf16.msra.mxu0 %v7111_v43  ;;  %3090 = vmatprep.subr.bf16.mxu1 %v7164_v46  ;;  %v7212_v43 = vld [vmem:[%s9499_s0 + $0x40] ss:$28 sps:$4 sm:$0xff]  }
  0x65   :  { %2320 = vmatprep.subr.bf16.mxu0 %v7125_v45  ;;  %3091 = vmatpush1.bf16.msra.mxu1 %v7162_v48  ;;  %v7216_v45 = vld [vmem:[%s9499_s0 + $0x7c] ss:$28 sps:$4 sm:$0xff]   ;;  %v7219_v46 = vld [vmem:[%s9498_s1 + $0x440] ss:$16 sps:$4 sm:$0xff]   ;;  %v7227_v48 = vld [vmem:[%s9498_s1 + $0x464] ss:$16 sps:$4 sm:$0xff]  }
  0x66   :  { %3092 = vmatprep.subr.bf16.mxu1 %v7167_v50  ;;  %v7275_v50 = vld [vmem:[%s9498_s1 + $0x46c] ss:$16 sps:$4 sm:$0xff]  }
  0x68   :  { %2321 = vmatpush1.bf16.msra.mxu0 %v7123_v47  ;;  %v7272_v47 = vld [vmem:[%s9498_s1 + $0x44c] ss:$16 sps:$4 sm:$0xff]  }
  0x69   :  { %2322 = vmatprep.subr.bf16.mxu0 %v7137_v49  ;;  %3093 = vmatpush1.bf16.msra.mxu1 %v7165_v54  ;;  %v7270_v49 = vld [vmem:[%s9498_s1 + $0x448] ss:$16 sps:$4 sm:$0xff]  }
  0x6a   :  { %2192 = vmatmul.mubr.bf16.gmra.mrb[20].mxu0 %v7092_v51  ;;  %2964 = vmatmul.mubr.bf16.gmra.mrb[20].mxu1 %v7092_v51  ;;  %v7225_v51 = vld [vmem:[%s9498_s1 + $0x460] ss:$16 sps:$4 sm:$0xff]   ;;  %v7218_v54 = vld [vmem:[%s9499_s0 + $0x78] ss:$28 sps:$4 sm:$0xff]  }
  0x6b   :  { %2201 = vmatprep.mubr.bf16.mxu0 %v7096_v52  ;;  %2973 = vmatprep.mubr.bf16.mxu1 %v7096_v52  ;;  %v7233_v52 = vld [vmem:[%s9498_s1 + $0x484] ss:$16 sps:$4 sm:$0xff]  }
  0x6c   :  { %2323 = vmatpush1.bf16.msra.mxu0 %v7135_v53  ;;  %3094 = vmatprep.subr.bf16.mxu1 %v7176_v56  ;;  %v7273_v53 = vld [vmem:[%s9498_s1 + $0x468] ss:$16 sps:$4 sm:$0xff]   ;;  %v7231_v56 = vld [vmem:[%s9498_s1 + $0x480] ss:$16 sps:$4 sm:$0xff]  }
  0x6d   :  { %2324 = vmatprep.subr.bf16.mxu0 %v7149_v55  ;;  %3095 = vmatpush1.bf16.msra.mxu1 %v7174_v58  ;;  %v7222_v55 = vld [vmem:[%s9499_s0 + $0xb4] ss:$28 sps:$4 sm:$0xff]  }
  0x6e   :  { %3096 = vmatprep.subr.bf16.mxu1 %v7179_v60  ;;  %v7239_v58 = vld [vmem:[%s9498_s1 + $0x4a4] ss:$16 sps:$4 sm:$0xff]   ;;  %v7287_v60 = vld [vmem:[%s9498_s1 + $0x4ac] ss:$16 sps:$4 sm:$0xff]  }
  0x70   :  { %2325 = vmatpush1.bf16.msra.mxu0 %v7147_v57  ;;  %v7284_v57 = vld [vmem:[%s9498_s1 + $0x48c] ss:$16 sps:$4 sm:$0xff]  }
  0x71   :  { %2326 = vmatprep.subr.bf16.mxu0 %v7161_v59  ;;  %3097 = vmatpush1.bf16.msra.mxu1 %v7177_v0  ;;  %v7282_v59 = vld [vmem:[%s9498_s1 + $0x488] ss:$16 sps:$4 sm:$0xff]   ;;  %v7224_v0 = vld [vmem:[%s9499_s0 + $0xb0] ss:$28 sps:$4 sm:$0xff]  }
  0x72   :  { %2202 = vmatmul.mubr.bf16.gmra.mrb[24].mxu0 %v7098_v61  ;;  %2974 = vmatmul.mubr.bf16.gmra.mrb[24].mxu1 %v7098_v61  ;;  %v7237_v61 = vld [vmem:[%s9498_s1 + $0x4a0] ss:$16 sps:$4 sm:$0xff]  }
  0x73   :  { %2211 = vmatprep.mubr.bf16.mxu0 %v7102_v62  ;;  %2983 = vmatprep.mubr.bf16.mxu1 %v7102_v62  ;;  %v7245_v62 = vld [vmem:[%s9498_s1 + $0x4c4] ss:$16 sps:$4 sm:$0xff]  }
  0x74   :  { %2327 = vmatpush1.bf16.msra.mxu0 %v7159_v63  ;;  %3098 = vmatprep.subr.bf16.mxu1 %v7188_v2  ;;  %v7285_v63 = vld [vmem:[%s9498_s1 + $0x4a8] ss:$16 sps:$4 sm:$0xff]   ;;  %v7243_v2 = vld [vmem:[%s9498_s1 + $0x4c0] ss:$16 sps:$4 sm:$0xff]  }
  0x75   :  { %2328 = vmatprep.subr.bf16.mxu0 %v7173_v1  ;;  %3099 = vmatpush1.bf16.msra.mxu1 %v7186_v4  ;;  %v7228_v1 = vld [vmem:[%s9499_s0 + $0xec] ss:$28 sps:$4 sm:$0xff]   ;;  %v7251_v4 = vld [vmem:[%s9498_s1 + $0x4e4] ss:$16 sps:$4 sm:$0xff]  }
  0x76   :  { %3100 = vmatprep.subr.bf16.mxu1 %v7191_v6  ;;  %v7299_v6 = vld [vmem:[%s9498_s1 + $0x4ec] ss:$16 sps:$4 sm:$0xff]  }
  0x78   :  { %2329 = vmatpush1.bf16.msra.mxu0 %v7171_v3  ;;  %v7296_v3 = vld [vmem:[%s9498_s1 + $0x4cc] ss:$16 sps:$4 sm:$0xff]  }
  0x79   :  { %2330 = vmatprep.subr.bf16.mxu0 %v7185_v5  ;;  %3101 = vmatpush1.bf16.msra.mxu1 %v7189_v10  ;;  %v7294_v5 = vld [vmem:[%s9498_s1 + $0x4c8] ss:$16 sps:$4 sm:$0xff]  }
  0x7a   :  { %2212 = vmatmul.mubr.bf16.gmra.mrb[28].mxu0 %v7104_v7  ;;  %2984 = vmatmul.mubr.bf16.gmra.mrb[28].mxu1 %v7104_v7  ;;  %v7249_v7 = vld [vmem:[%s9498_s1 + $0x4e0] ss:$16 sps:$4 sm:$0xff]   ;;  %v7230_v10 = vld [vmem:[%s9499_s0 + $0xe8] ss:$28 sps:$4 sm:$0xff]  }
  0x7b   :  { %2221 = vmatprep.mubr.bf16.mxu0 %v7108_v8  ;;  %2993 = vmatprep.mubr.bf16.mxu1 %v7108_v8  ;;  %v7257_v8 = vld [vmem:[%s9498_s1 + $0x504] ss:$16 sps:$4 sm:$0xff]  }
  0x7c   :  { %2331 = vmatpush1.bf16.msra.mxu0 %v7183_v9  ;;  %3102 = vmatprep.subr.bf16.mxu1 %v7200_v12  ;;  %v7297_v9 = vld [vmem:[%s9498_s1 + $0x4e8] ss:$16 sps:$4 sm:$0xff]   ;;  %v7255_v12 = vld [vmem:[%s9498_s1 + $0x500] ss:$16 sps:$4 sm:$0xff]  }
  0x7d   :  { %2332 = vmatprep.subr.bf16.mxu0 %v7197_v11  ;;  %3103 = vmatpush1.bf16.msra.mxu1 %v7198_v14  ;;  %v7234_v11 = vld [vmem:[%s9499_s0 + $0x124] ss:$28 sps:$4 sm:$0xff]  }
  0x7e   :  { %3104 = vmatprep.subr.bf16.mxu1 %v7203_v15  ;;  %v7269_v14 = vld [vmem:[%s9498_s1 + $0x524] ss:$16 sps:$4 sm:$0xff]   ;;  %v7306_v15 = vld [vmem:[%s9498_s1 + $0x508] ss:$16 sps:$4 sm:$0xff]  }
  0x80   :  { %2333 = vmatpush1.bf16.msra.mxu0 %v7195_v13  ;;  %v7308_v13 = vld [vmem:[%s9498_s1 + $0x50c] ss:$16 sps:$4 sm:$0xff]  }
  0x81   :  { %2495 = vmatprep.subr.bf16.mxu0 %v7209_v16  ;;  %3105 = vmatpush1.bf16.msra.mxu1 %v7201_v19  ;;  %v7311_v16 = vld [vmem:[%s9498_s1 + $0x52c] ss:$16 sps:$4 sm:$0xff]   ;;  %v7309_v19 = vld [vmem:[%s9498_s1 + $0x528] ss:$16 sps:$4 sm:$0xff]  }
  0x82   :  { %2222 = vmatmul.mubr.bf16.gmra.mrb[32].mxu0 %v7110_v17  ;;  %2994 = vmatmul.mubr.bf16.gmra.mrb[32].mxu1 %v7110_v17  ;;  %v7267_v17 = vld [vmem:[%s9498_s1 + $0x520] ss:$16 sps:$4 sm:$0xff]  }
  0x83   :  { %2231 = vmatprep.mubr.bf16.mxu0 %v7120_v18  ;;  %3003 = vmatprep.mubr.bf16.mxu1 %v7120_v18  ;;  %v7281_v18 = vld [vmem:[%s9498_s1 + $0x544] ss:$16 sps:$4 sm:$0xff]  }
  0x84   :  { %3267 = vmatprep.subr.bf16.mxu1 %v7260_v20  ;;  %v7236_v20 = vld [vmem:[%s9499_s0 + $0x120] ss:$28 sps:$4 sm:$0xff]  }
  0x8a   :  { %2232 = vmatmul.mubr.bf16.gmra.mrb[36].mxu0 %v7122_v21  ;;  %3004 = vmatmul.mubr.bf16.gmra.mrb[36].mxu1 %v7122_v21  ;;  %v7240_v21 = vld [vmem:[%s9499_s0 + $0x15c] ss:$28 sps:$4 sm:$0xff]  }
  0x8b   :  { %2241 = vmatprep.mubr.bf16.mxu0 %v7132_v22  ;;  %3013 = vmatprep.mubr.bf16.mxu1 %v7132_v22  ;;  %v7279_v22 = vld [vmem:[%s9498_s1 + $0x540] ss:$16 sps:$4 sm:$0xff]  }
  0x92   :  { %2242 = vmatmul.mubr.bf16.gmra.mrb[40].mxu0 %v7134_v23  ;;  %3014 = vmatmul.mubr.bf16.gmra.mrb[40].mxu1 %v7134_v23  ;;  %v7320_v23 = vld [vmem:[%s9498_s1 + $0x54c] ss:$16 sps:$4 sm:$0xff]  }
  0x93   :  { %2251 = vmatprep.mubr.bf16.mxu0 %v7144_v24  ;;  %3023 = vmatprep.mubr.bf16.mxu1 %v7144_v24  ;;  %v7293_v24 = vld [vmem:[%s9498_s1 + $0x564] ss:$16 sps:$4 sm:$0xff]  }
  0x9a   :  { %2252 = vmatmul.mubr.bf16.gmra.mrb[44].mxu0 %v7146_v25  ;;  %3024 = vmatmul.mubr.bf16.gmra.mrb[44].mxu1 %v7146_v25  ;;  %v7318_v25 = vld [vmem:[%s9498_s1 + $0x548] ss:$16 sps:$4 sm:$0xff]  }
  0x9b   :  { %2261 = vmatprep.mubr.bf16.mxu0 %v7156_v26  ;;  %3033 = vmatprep.mubr.bf16.mxu1 %v7156_v26  ;;  %v7323_v26 = vld [vmem:[%s9498_s1 + $0x56c] ss:$16 sps:$4 sm:$0xff]  }
  0xa2   :  { %2262 = vmatmul.mubr.bf16.gmra.mrb[48].mxu0 %v7158_v27  ;;  %3034 = vmatmul.mubr.bf16.gmra.mrb[48].mxu1 %v7158_v27  ;;  %v7291_v27 = vld [vmem:[%s9498_s1 + $0x560] ss:$16 sps:$4 sm:$0xff]  }
  0xa3   :  { %2271 = vmatprep.mubr.bf16.mxu0 %v7168_v28  ;;  %3043 = vmatprep.mubr.bf16.mxu1 %v7168_v28  ;;  %v7305_v28 = vld [vmem:[%s9498_s1 + $0x584] ss:$16 sps:$4 sm:$0xff]  }
  0xaa   :  { %2272 = vmatmul.mubr.bf16.gmra.mrb[52].mxu0 %v7170_v29  ;;  %3044 = vmatmul.mubr.bf16.gmra.mrb[52].mxu1 %v7170_v29  ;;  %v7321_v29 = vld [vmem:[%s9498_s1 + $0x568] ss:$16 sps:$4 sm:$0xff]  }
  0xab   :  { %2281 = vmatprep.mubr.bf16.mxu0 %v7180_v30  ;;  %3053 = vmatprep.mubr.bf16.mxu1 %v7180_v30  ;;  %v7242_v30 = vld [vmem:[%s9499_s0 + $0x158] ss:$28 sps:$4 sm:$0xff]  }
  0xb2   :  { %2282 = vmatmul.mubr.bf16.gmra.mrb[56].mxu0 %v7182_v31  ;;  %3054 = vmatmul.mubr.bf16.gmra.mrb[56].mxu1 %v7182_v31  ;;  %v7246_v31 = vld [vmem:[%s9499_s0 + $0x194] ss:$28 sps:$4 sm:$0xff]  }
  0xb3   :  { %2291 = vmatprep.mubr.bf16.mxu0 %v7192_v32  ;;  %3063 = vmatprep.mubr.bf16.mxu1 %v7192_v32  ;;  %v7303_v32 = vld [vmem:[%s9498_s1 + $0x580] ss:$16 sps:$4 sm:$0xff]  }
  0xba   :  { %2292 = vmatmul.mubr.bf16.gmra.mrb[60].mxu0 %v7194_v33  ;;  %3064 = vmatmul.mubr.bf16.gmra.mrb[60].mxu1 %v7194_v33  ;;  %v7332_v33 = vld [vmem:[%s9498_s1 + $0x58c] ss:$16 sps:$4 sm:$0xff]  }
  0xbb   :  { %2334 = vmatprep.mubr.bf16.mxu0 %v7206_v34  ;;  %3106 = vmatprep.mubr.bf16.mxu1 %v7206_v34  ;;  %v7317_v34 = vld [vmem:[%s9498_s1 + $0x5a4] ss:$16 sps:$4 sm:$0xff]  }
  0xc2   :  { %2335 = vmatmul.mubr.bf16.vlgmr.msra.gmra.mrb[0].mxu0 %v7204_v35  ;;  %3107 = vmatmul.mubr.bf16.vlgmr.msra.gmra.mrb[0].mxu1 %v7204_v35  ;;  %v7330_v35 = vld [vmem:[%s9498_s1 + $0x588] ss:$16 sps:$4 sm:$0xff]  }
  0xc3   :  { %2496 = vmatpush1.bf16.msra.mxu0 %v7207_v36  ;;  %2344 = vmatprep.mubr.bf16.mxu0 %v7210_v37  ;;  %v7335_v36 = vld [vmem:[%s9498_s1 + $0x5ac] ss:$16 sps:$4 sm:$0xff]  }
  0xc4   :  { %3116 = vmatprep.mubr.bf16.mxu1 %v7210_v37  ;;  %2497 = vmatprep.subr.bf16.mxu0 %v7215_v38  ;;  %v7315_v37 = vld [vmem:[%s9498_s1 + $0x5a0] ss:$16 sps:$4 sm:$0xff]   ;;  %v7329_v38 = vld [vmem:[%s9498_s1 + $0x5c4] ss:$16 sps:$4 sm:$0xff]  }
  0xc5   :  { %3268 = vmatpush1.bf16.msra.mxu1 %v7258_v39  ;;  %v7333_v39 = vld [vmem:[%s9498_s1 + $0x5a8] ss:$16 sps:$4 sm:$0xff]  }
  0xc6   :  { %3269 = vmatprep.subr.bf16.mxu1 %v7263_v41  ;;  %v7252_v41 = vld [vmem:[%s9499_s0 + $0x1cc] ss:$28 sps:$4 sm:$0xff]  }
  0xc7   :  { %2498 = vmatpush1.bf16.msra.mxu0 %v7213_v40  ;;  %v7248_v40 = vld [vmem:[%s9499_s0 + $0x190] ss:$28 sps:$4 sm:$0xff]  }
  0xc8   :  { %2499 = vmatprep.subr.bf16.mxu0 %v7221_v42  ;;  %v7327_v42 = vld [vmem:[%s9498_s1 + $0x5c0] ss:$16 sps:$4 sm:$0xff]  }
  0xc9   :  { %3270 = vmatpush1.bf16.msra.mxu1 %v7261_v44  ;;  %v7341_v44 = vld [vmem:[%s9498_s1 + $0x5e4] ss:$16 sps:$4 sm:$0xff]  }
  0xca   :  { %2345 = vmatmul.mubr.bf16.gmra.mrb[4].mxu0 %v7212_v43  ;;  %3117 = vmatmul.mubr.bf16.gmra.mrb[4].mxu1 %v7212_v43  ;;  %v7344_v43 = vld [vmem:[%s9498_s1 + $0x5cc] ss:$16 sps:$4 sm:$0xff]  }
  0xcb   :  { %2354 = vmatprep.mubr.bf16.mxu0 %v7216_v45  ;;  %3126 = vmatprep.mubr.bf16.mxu1 %v7216_v45  ;;  %v7342_v45 = vld [vmem:[%s9498_s1 + $0x5c8] ss:$16 sps:$4 sm:$0xff]  }
  0xcc   :  { %2500 = vmatpush1.bf16.msra.mxu0 %v7219_v46  ;;  %3271 = vmatprep.subr.bf16.mxu1 %v7272_v47  ;;  %v7347_v46 = vld [vmem:[%s9498_s1 + $0x5ec] ss:$16 sps:$4 sm:$0xff]   ;;  %v7339_v47 = vld [vmem:[%s9498_s1 + $0x5e0] ss:$16 sps:$4 sm:$0xff]  }
  0xcd   :  { %2501 = vmatprep.subr.bf16.mxu0 %v7227_v48  ;;  %3272 = vmatpush1.bf16.msra.mxu1 %v7270_v49  ;;  %v7345_v48 = vld [vmem:[%s9498_s1 + $0x5e8] ss:$16 sps:$4 sm:$0xff]   ;;  %v7353_v49 = vld [vmem:[%s9498_s1 + $0x604] ss:$16 sps:$4 sm:$0xff]  }
  0xce   :  { %3273 = vmatprep.subr.bf16.mxu1 %v7275_v50  ;;  %v7254_v50 = vld [vmem:[%s9499_s0 + $0x1c8] ss:$28 sps:$4 sm:$0xff]  }
  0xd0   :  { %2502 = vmatpush1.bf16.msra.mxu0 %v7225_v51  ;;  %v7264_v51 = vld [vmem:[%s9499_s0 + $0x204] ss:$28 sps:$4 sm:$0xff]  }
  0xd1   :  { %2503 = vmatprep.subr.bf16.mxu0 %v7233_v52  ;;  %3274 = vmatpush1.bf16.msra.mxu1 %v7273_v53  ;;  %v7266_v52 = vld [vmem:[%s9499_s0 + $0x200] ss:$28 sps:$4 sm:$0xff]  }
  0xd2   :  { %2355 = vmatmul.mubr.bf16.gmra.mrb[8].mxu0 %v7218_v54  ;;  %3127 = vmatmul.mubr.bf16.gmra.mrb[8].mxu1 %v7218_v54  ;;  %v7276_v53 = vld [vmem:[%s9499_s0 + $0x23c] ss:$28 sps:$4 sm:$0xff]  }
  0xd3   :  { %2364 = vmatprep.mubr.bf16.mxu0 %v7222_v55  ;;  %3136 = vmatprep.mubr.bf16.mxu1 %v7222_v55  ;;  %v7278_v54 = vld [vmem:[%s9499_s0 + $0x238] ss:$28 sps:$4 sm:$0xff]  }
  0xd4   :  { %2504 = vmatpush1.bf16.msra.mxu0 %v7231_v56  ;;  %3275 = vmatprep.subr.bf16.mxu1 %v7284_v57  ;;  %v7288_v55 = vld [vmem:[%s9499_s0 + $0x274] ss:$28 sps:$4 sm:$0xff]   ;;  %v7300_v57 = vld [vmem:[%s9499_s0 + $0x2ac] ss:$28 sps:$4 sm:$0xff]  }
  0xd5   :  { %2505 = vmatprep.subr.bf16.mxu0 %v7239_v58  ;;  %3276 = vmatpush1.bf16.msra.mxu1 %v7282_v59  ;;  %v7290_v56 = vld [vmem:[%s9499_s0 + $0x270] ss:$28 sps:$4 sm:$0xff]   ;;  %v7302_v58 = vld [vmem:[%s9499_s0 + $0x2a8] ss:$28 sps:$4 sm:$0xff]  }
  0xd6   :  { %3277 = vmatprep.subr.bf16.mxu1 %v7287_v60  ;;  %v7312_v59 = vld [vmem:[%s9499_s0 + $0x2e4] ss:$28 sps:$4 sm:$0xff]   ;;  %v7410_v60 = vld [vmem:[%s9498_s1 + $0x60c] ss:$16 sps:$4 sm:$0xff]  }
  0xd8   :  { %2506 = vmatpush1.bf16.msra.mxu0 %v7237_v61  ;;  %v7314_v61 = vld [vmem:[%s9499_s0 + $0x2e0] ss:$28 sps:$4 sm:$0xff]  }
  0xd9   :  { %2507 = vmatprep.subr.bf16.mxu0 %v7245_v62  ;;  %3278 = vmatpush1.bf16.msra.mxu1 %v7285_v63  ;;  %v7324_v62 = vld [vmem:[%s9499_s0 + $0x31c] ss:$28 sps:$4 sm:$0xff]  }
  0xda   :  { %2365 = vmatmul.mubr.bf16.gmra.mrb[12].mxu0 %v7224_v0  ;;  %3137 = vmatmul.mubr.bf16.gmra.mrb[12].mxu1 %v7224_v0  ;;  %v7326_v63 = vld [vmem:[%s9499_s0 + $0x318] ss:$28 sps:$4 sm:$0xff]  }
  0xdb   :  { %2374 = vmatprep.mubr.bf16.mxu0 %v7228_v1  ;;  %3146 = vmatprep.mubr.bf16.mxu1 %v7228_v1  ;;  %v7336_v0 = vld [vmem:[%s9499_s0 + $0x354] ss:$28 sps:$4 sm:$0xff]  }
  0xdc   :  { %2508 = vmatpush1.bf16.msra.mxu0 %v7243_v2  ;;  %3279 = vmatprep.subr.bf16.mxu1 %v7296_v3  ;;  %v7338_v1 = vld [vmem:[%s9499_s0 + $0x350] ss:$28 sps:$4 sm:$0xff]  }
  0xdd   :  { %2509 = vmatprep.subr.bf16.mxu0 %v7251_v4  ;;  %3280 = vmatpush1.bf16.msra.mxu1 %v7294_v5  ;;  %v7350_v2 = vld [vmem:[%s9499_s0 + $0x14] ss:$28 sps:$4 sm:$0xff]   ;;  %v7354_v5 = vld [vmem:[%s9499_s0 + $0x4c] ss:$28 sps:$4 sm:$0xff]  }
  0xde   :  { %3281 = vmatprep.subr.bf16.mxu1 %v7299_v6  ;;  %v7348_v3 = vld [vmem:[%s9499_s0 + $0x10] ss:$28 sps:$4 sm:$0xff]   ;;  %v7362_v6 = vld [vmem:[%s9498_s1 + $0x624] ss:$16 sps:$4 sm:$0xff]  }
  0xdf   :  { %v7351_v4 = vld [vmem:[%s9498_s1 + $0x600] ss:$16 sps:$4 sm:$0xff]  }
  0xe0   :  { %2510 = vmatpush1.bf16.msra.mxu0 %v7249_v7  ;;  %v7408_v7 = vld [vmem:[%s9498_s1 + $0x608] ss:$16 sps:$4 sm:$0xff]  }
  0xe1   :  { %2511 = vmatprep.subr.bf16.mxu0 %v7257_v8  ;;  %3282 = vmatpush1.bf16.msra.mxu1 %v7297_v9  ;;  %v7413_v8 = vld [vmem:[%s9498_s1 + $0x62c] ss:$16 sps:$4 sm:$0xff]   ;;  %v7360_v9 = vld [vmem:[%s9498_s1 + $0x620] ss:$16 sps:$4 sm:$0xff]  }
  0xe2   :  { %2375 = vmatmul.mubr.bf16.gmra.mrb[16].mxu0 %v7230_v10  ;;  %3147 = vmatmul.mubr.bf16.gmra.mrb[16].mxu1 %v7230_v10  ;;  %v7371_v10 = vld [vmem:[%s9498_s1 + $0x644] ss:$16 sps:$4 sm:$0xff]  }
  0xe3   :  { %2384 = vmatprep.mubr.bf16.mxu0 %v7234_v11  ;;  %3156 = vmatprep.mubr.bf16.mxu1 %v7234_v11  ;;  %v7411_v11 = vld [vmem:[%s9498_s1 + $0x628] ss:$16 sps:$4 sm:$0xff]  }
  0xe4   :  { %2512 = vmatpush1.bf16.msra.mxu0 %v7255_v12  ;;  %3283 = vmatprep.subr.bf16.mxu1 %v7308_v13  ;;  %v7356_v12 = vld [vmem:[%s9499_s0 + $0x48] ss:$28 sps:$4 sm:$0xff]  }
  0xe5   :  { %2513 = vmatprep.subr.bf16.mxu0 %v7269_v14  ;;  %3284 = vmatpush1.bf16.msra.mxu1 %v7306_v15  ;;  %v7357_v13 = vld [vmem:[%s9499_s0 + $0x84] ss:$28 sps:$4 sm:$0xff]   ;;  %v7419_v15 = vld [vmem:[%s9498_s1 + $0x64c] ss:$16 sps:$4 sm:$0xff]  }
  0xe6   :  { %3285 = vmatprep.subr.bf16.mxu1 %v7311_v16  ;;  %v7369_v14 = vld [vmem:[%s9498_s1 + $0x640] ss:$16 sps:$4 sm:$0xff]   ;;  %v7380_v16 = vld [vmem:[%s9498_s1 + $0x664] ss:$16 sps:$4 sm:$0xff]  }
  0xe8   :  { %2514 = vmatpush1.bf16.msra.mxu0 %v7267_v17  ;;  %v7417_v17 = vld [vmem:[%s9498_s1 + $0x648] ss:$16 sps:$4 sm:$0xff]  }
  0xe9   :  { %2515 = vmatprep.subr.bf16.mxu0 %v7281_v18  ;;  %3286 = vmatpush1.bf16.msra.mxu1 %v7309_v19  ;;  %v7422_v18 = vld [vmem:[%s9498_s1 + $0x66c] ss:$16 sps:$4 sm:$0xff]   ;;  %v7378_v19 = vld [vmem:[%s9498_s1 + $0x660] ss:$16 sps:$4 sm:$0xff]  }
  0xea   :  { %2385 = vmatmul.mubr.bf16.gmra.mrb[20].mxu0 %v7236_v20  ;;  %3157 = vmatmul.mubr.bf16.gmra.mrb[20].mxu1 %v7236_v20  ;;  %v7389_v20 = vld [vmem:[%s9498_s1 + $0x684] ss:$16 sps:$4 sm:$0xff]  }
  0xeb   :  { %2394 = vmatprep.mubr.bf16.mxu0 %v7240_v21  ;;  %3166 = vmatprep.mubr.bf16.mxu1 %v7240_v21  ;;  %v7420_v21 = vld [vmem:[%s9498_s1 + $0x668] ss:$16 sps:$4 sm:$0xff]  }
  0xec   :  { %2516 = vmatpush1.bf16.msra.mxu0 %v7279_v22  ;;  %3287 = vmatprep.subr.bf16.mxu1 %v7320_v23  ;;  %v7359_v22 = vld [vmem:[%s9499_s0 + $0x80] ss:$28 sps:$4 sm:$0xff]  }
  0xed   :  { %2517 = vmatprep.subr.bf16.mxu0 %v7293_v24  ;;  %3288 = vmatpush1.bf16.msra.mxu1 %v7318_v25  ;;  %v7363_v23 = vld [vmem:[%s9499_s0 + $0xbc] ss:$28 sps:$4 sm:$0xff]   ;;  %v7387_v24 = vld [vmem:[%s9498_s1 + $0x680] ss:$16 sps:$4 sm:$0xff]  }
  0xee   :  { %3289 = vmatprep.subr.bf16.mxu1 %v7323_v26  ;;  %v7431_v25 = vld [vmem:[%s9498_s1 + $0x68c] ss:$16 sps:$4 sm:$0xff]   ;;  %v7398_v26 = vld [vmem:[%s9498_s1 + $0x6a4] ss:$16 sps:$4 sm:$0xff]  }
  0xf0   :  { %2518 = vmatpush1.bf16.msra.mxu0 %v7291_v27  ;;  %v7429_v27 = vld [vmem:[%s9498_s1 + $0x688] ss:$16 sps:$4 sm:$0xff]  }
  0xf1   :  { %2519 = vmatprep.subr.bf16.mxu0 %v7305_v28  ;;  %3290 = vmatpush1.bf16.msra.mxu1 %v7321_v29  ;;  %v7434_v28 = vld [vmem:[%s9498_s1 + $0x6ac] ss:$16 sps:$4 sm:$0xff]   ;;  %v7396_v29 = vld [vmem:[%s9498_s1 + $0x6a0] ss:$16 sps:$4 sm:$0xff]  }
  0xf2   :  { %2395 = vmatmul.mubr.bf16.gmra.mrb[24].mxu0 %v7242_v30  ;;  %3167 = vmatmul.mubr.bf16.gmra.mrb[24].mxu1 %v7242_v30  ;;  %v7407_v30 = vld [vmem:[%s9498_s1 + $0x6c4] ss:$16 sps:$4 sm:$0xff]  }
  0xf3   :  { %2404 = vmatprep.mubr.bf16.mxu0 %v7246_v31  ;;  %3176 = vmatprep.mubr.bf16.mxu1 %v7246_v31  ;;  %v7432_v31 = vld [vmem:[%s9498_s1 + $0x6a8] ss:$16 sps:$4 sm:$0xff]  }
  0xf4   :  { %2520 = vmatpush1.bf16.msra.mxu0 %v7303_v32  ;;  %3291 = vmatprep.subr.bf16.mxu1 %v7332_v33  ;;  %v7365_v32 = vld [vmem:[%s9499_s0 + $0xb8] ss:$28 sps:$4 sm:$0xff]  }
  0xf5   :  { %2521 = vmatprep.subr.bf16.mxu0 %v7317_v34  ;;  %3292 = vmatpush1.bf16.msra.mxu1 %v7330_v35  ;;  %v7366_v33 = vld [vmem:[%s9499_s0 + $0xf4] ss:$28 sps:$4 sm:$0xff]   ;;  %v7440_v35 = vld [vmem:[%s9498_s1 + $0x6cc] ss:$16 sps:$4 sm:$0xff]  }
  0xf6   :  { %3293 = vmatprep.subr.bf16.mxu1 %v7335_v36  ;;  %v7405_v34 = vld [vmem:[%s9498_s1 + $0x6c0] ss:$16 sps:$4 sm:$0xff]   ;;  %v7428_v36 = vld [vmem:[%s9498_s1 + $0x6e4] ss:$16 sps:$4 sm:$0xff]  }
  0xf8   :  { %2522 = vmatpush1.bf16.msra.mxu0 %v7315_v37  ;;  %v7438_v37 = vld [vmem:[%s9498_s1 + $0x6c8] ss:$16 sps:$4 sm:$0xff]  }
  0xf9   :  { %2523 = vmatprep.subr.bf16.mxu0 %v7329_v38  ;;  %3294 = vmatpush1.bf16.msra.mxu1 %v7333_v39  ;;  %v7443_v38 = vld [vmem:[%s9498_s1 + $0x6ec] ss:$16 sps:$4 sm:$0xff]   ;;  %v7426_v39 = vld [vmem:[%s9498_s1 + $0x6e0] ss:$16 sps:$4 sm:$0xff]  }
  0xfa   :  { %2405 = vmatmul.mubr.bf16.gmra.mrb[28].mxu0 %v7248_v40  ;;  %3177 = vmatmul.mubr.bf16.gmra.mrb[28].mxu1 %v7248_v40  ;;  %v7441_v40 = vld [vmem:[%s9498_s1 + $0x6e8] ss:$16 sps:$4 sm:$0xff]  }
  0xfb   :  { %2414 = vmatprep.mubr.bf16.mxu0 %v7252_v41  ;;  %3186 = vmatprep.mubr.bf16.mxu1 %v7252_v41  ;;  %v7368_v41 = vld [vmem:[%s9499_s0 + $0xf0] ss:$28 sps:$4 sm:$0xff]  }
  0xfc   :  { %2524 = vmatpush1.bf16.msra.mxu0 %v7327_v42  ;;  %3295 = vmatprep.subr.bf16.mxu1 %v7344_v43  ;;  %v7372_v42 = vld [vmem:[%s9499_s0 + $0x12c] ss:$28 sps:$4 sm:$0xff]  }
  0xfd   :  { %2525 = vmatprep.subr.bf16.mxu0 %v7341_v44  ;;  %3296 = vmatpush1.bf16.msra.mxu1 %v7342_v45  ;;  %v7374_v43 = vld [vmem:[%s9499_s0 + $0x128] ss:$28 sps:$4 sm:$0xff]   ;;  %v7377_v45 = vld [vmem:[%s9499_s0 + $0x160] ss:$28 sps:$4 sm:$0xff]  }
  0xfe   :  { %3297 = vmatprep.subr.bf16.mxu1 %v7347_v46  ;;  %v7375_v44 = vld [vmem:[%s9499_s0 + $0x164] ss:$28 sps:$4 sm:$0xff]   ;;  %v7381_v46 = vld [vmem:[%s9499_s0 + $0x19c] ss:$28 sps:$4 sm:$0xff]  }
 0x100   :  { %2526 = vmatpush1.bf16.msra.mxu0 %v7339_v47  ;;  %v7383_v47 = vld [vmem:[%s9499_s0 + $0x198] ss:$28 sps:$4 sm:$0xff]  }
 0x101   :  { %3298 = vmatpush1.bf16.msra.mxu1 %v7345_v48  ;;  %2688 = vmatprep.subr.bf16.mxu0 %v7353_v49  ;;  %v7384_v48 = vld [vmem:[%s9499_s0 + $0x1d4] ss:$28 sps:$4 sm:$0xff]  }
 0x102   :  { %2415 = vmatmul.mubr.bf16.gmra.mrb[32].mxu0 %v7254_v50  ;;  %3187 = vmatmul.mubr.bf16.gmra.mrb[32].mxu1 %v7254_v50  ;;  %v7386_v49 = vld [vmem:[%s9499_s0 + $0x1d0] ss:$28 sps:$4 sm:$0xff]  }
 0x103   :  { %2424 = vmatprep.mubr.bf16.mxu0 %v7264_v51  ;;  %3196 = vmatprep.mubr.bf16.mxu1 %v7264_v51  ;;  %v7390_v50 = vld [vmem:[%s9499_s0 + $0x20c] ss:$28 sps:$4 sm:$0xff]  }
 0x104   :  { %3460 = vmatprep.subr.bf16.mxu1 %v7410_v60  ;;  %v7392_v51 = vld [vmem:[%s9499_s0 + $0x208] ss:$28 sps:$4 sm:$0xff]  }
 0x105   :  { %v7416_v60 = vld [vmem:[%s9499_s0 + $0x2e8] ss:$28 sps:$4 sm:$0xff]  }
 0x10a   :  { %2425 = vmatmul.mubr.bf16.gmra.mrb[36].mxu0 %v7266_v52  ;;  %3197 = vmatmul.mubr.bf16.gmra.mrb[36].mxu1 %v7266_v52  ;;  %v7393_v52 = vld [vmem:[%s9499_s0 + $0x244] ss:$28 sps:$4 sm:$0xff]  }
 0x10b   :  { %2434 = vmatprep.mubr.bf16.mxu0 %v7276_v53  ;;  %3206 = vmatprep.mubr.bf16.mxu1 %v7276_v53  ;;  %v7395_v53 = vld [vmem:[%s9499_s0 + $0x240] ss:$28 sps:$4 sm:$0xff]  }
 0x112   :  { %2435 = vmatmul.mubr.bf16.gmra.mrb[40].mxu0 %v7278_v54  ;;  %3207 = vmatmul.mubr.bf16.gmra.mrb[40].mxu1 %v7278_v54  ;;  %v7399_v54 = vld [vmem:[%s9499_s0 + $0x27c] ss:$28 sps:$4 sm:$0xff]  }
 0x113   :  { %2444 = vmatprep.mubr.bf16.mxu0 %v7288_v55  ;;  %3216 = vmatprep.mubr.bf16.mxu1 %v7288_v55  ;;  %v7401_v55 = vld [vmem:[%s9499_s0 + $0x278] ss:$28 sps:$4 sm:$0xff]  }
 0x11a   :  { %2445 = vmatmul.mubr.bf16.gmra.mrb[44].mxu0 %v7290_v56  ;;  %3217 = vmatmul.mubr.bf16.gmra.mrb[44].mxu1 %v7290_v56  ;;  %v7402_v56 = vld [vmem:[%s9499_s0 + $0x2b4] ss:$28 sps:$4 sm:$0xff]  }
 0x11b   :  { %2454 = vmatprep.mubr.bf16.mxu0 %v7300_v57  ;;  %3226 = vmatprep.mubr.bf16.mxu1 %v7300_v57  ;;  %v7404_v57 = vld [vmem:[%s9499_s0 + $0x2b0] ss:$28 sps:$4 sm:$0xff]  }
 0x122   :  { %2455 = vmatmul.mubr.bf16.gmra.mrb[48].mxu0 %v7302_v58  ;;  %3227 = vmatmul.mubr.bf16.gmra.mrb[48].mxu1 %v7302_v58  ;;  %v7458_v58 = vld [vmem:[%s9500_s3 + $0x4] ss:$8 sps:$4 sm:$0xff]  }
 0x123   :  { %2464 = vmatprep.mubr.bf16.mxu0 %v7312_v59  ;;  %3236 = vmatprep.mubr.bf16.mxu1 %v7312_v59  ;;  %v7414_v59 = vld [vmem:[%s9499_s0 + $0x2ec] ss:$28 sps:$4 sm:$0xff]  }
 0x12a   :  { %2465 = vmatmul.mubr.bf16.gmra.mrb[52].mxu0 %v7314_v61  ;;  %3237 = vmatmul.mubr.bf16.gmra.mrb[52].mxu1 %v7314_v61  ;;  %v7423_v61 = vld [vmem:[%s9499_s0 + $0x324] ss:$28 sps:$4 sm:$0xff]  }
 0x12b   :  { %2474 = vmatprep.mubr.bf16.mxu0 %v7324_v62  ;;  %3246 = vmatprep.mubr.bf16.mxu1 %v7324_v62  ;;  %v7425_v62 = vld [vmem:[%s9499_s0 + $0x320] ss:$28 sps:$4 sm:$0xff]  }
 0x132   :  { %2475 = vmatmul.mubr.bf16.gmra.mrb[56].mxu0 %v7326_v63  ;;  %3247 = vmatmul.mubr.bf16.gmra.mrb[56].mxu1 %v7326_v63  ;;  %v7435_v63 = vld [vmem:[%s9499_s0 + $0x35c] ss:$28 sps:$4 sm:$0xff]  }
 0x133   :  { %2484 = vmatprep.mubr.bf16.mxu0 %v7336_v0  ;;  %3256 = vmatprep.mubr.bf16.mxu1 %v7336_v0  ;;  %v7437_v0 = vld [vmem:[%s9499_s0 + $0x358] ss:$28 sps:$4 sm:$0xff]  }
 0x13a   :  { %2485 = vmatmul.mubr.bf16.gmra.mrb[60].mxu0 %v7338_v1  ;;  %3257 = vmatmul.mubr.bf16.gmra.mrb[60].mxu1 %v7338_v1  ;;  %v7584_v1 = vmov 0  }
 0x13b   :  { %2527 = vmatprep.mubr.bf16.mxu0 %v7350_v2  ;;  %3299 = vmatprep.mubr.bf16.mxu1 %v7350_v2  ;;  %v7444_v2 = vld [vmem:[%s9499_s0 + $0x18] ss:$28 sps:$4 sm:$0xff]  }
 0x142   :  { %2528 = vmatmul.mubr.bf16.vlgmr.msra.gmra.mrb[0].mxu0 %v7348_v3  ;;  %3300 = vmatmul.mubr.bf16.vlgmr.msra.gmra.mrb[0].mxu1 %v7348_v3  ;;  %v7456_v3 = vld [vmem:[%s9500_s3] ss:$8 sps:$4 sm:$0xff]  }
 0x143   :  { %2689 = vmatpush1.bf16.msra.mxu0 %v7351_v4  ;;  %2537 = vmatprep.mubr.bf16.mxu0 %v7354_v5  ;;  %v7462_v4 = vld [vmem:[%s9500_s3 + $0x14] ss:$8 sps:$4 sm:$0xff]  }
 0x144   :  { %3309 = vmatprep.mubr.bf16.mxu1 %v7354_v5  ;;  %2690 = vmatprep.subr.bf16.mxu0 %v7362_v6  ;;  %v7460_v5 = vld [vmem:[%s9500_s3 + $0x10] ss:$8 sps:$4 sm:$0xff]   ;;  %v7466_v6 = vld [vmem:[%s9500_s3 + $0x24] ss:$8 sps:$4 sm:$0xff]  }
 0x145   :  { %3461 = vmatpush1.bf16.msra.mxu1 %v7408_v7  ;;  %v7445_v7 = vld [vmem:[%s9499_s0 + $0x50] ss:$28 sps:$4 sm:$0xff]  }
 0x146   :  { %3462 = vmatprep.subr.bf16.mxu1 %v7413_v8  ;;  %v7464_v8 = vld [vmem:[%s9500_s3 + $0x20] ss:$8 sps:$4 sm:$0xff]  }
 0x147   :  { %2691 = vmatpush1.bf16.msra.mxu0 %v7360_v9  ;;  %v7470_v9 = vld [vmem:[%s9500_s3 + $0x34] ss:$8 sps:$4 sm:$0xff]  }
 0x148   :  { %2692 = vmatprep.subr.bf16.mxu0 %v7371_v10  ;;  %v7468_v10 = vld [vmem:[%s9500_s3 + $0x30] ss:$8 sps:$4 sm:$0xff]  }
 0x149   :  { %3463 = vmatpush1.bf16.msra.mxu1 %v7411_v11  ;;  %v7474_v11 = vld [vmem:[%s9500_s3 + $0x44] ss:$8 sps:$4 sm:$0xff]  }
 0x14a   :  { %2538 = vmatmul.mubr.bf16.gmra.mrb[4].mxu0 %v7356_v12  ;;  %3310 = vmatmul.mubr.bf16.gmra.mrb[4].mxu1 %v7356_v12  ;;  %v7446_v12 = vld [vmem:[%s9499_s0 + $0x88] ss:$28 sps:$4 sm:$0xff]  }
 0x14b   :  { %2547 = vmatprep.mubr.bf16.mxu0 %v7357_v13  ;;  %3319 = vmatprep.mubr.bf16.mxu1 %v7357_v13  ;;  %v7472_v13 = vld [vmem:[%s9500_s3 + $0x40] ss:$8 sps:$4 sm:$0xff]  }
 0x14c   :  { %2693 = vmatpush1.bf16.msra.mxu0 %v7369_v14  ;;  %3464 = vmatprep.subr.bf16.mxu1 %v7419_v15  ;;  %v7477_v14 = vld [vmem:[%s9500_s3 + $0x54] ss:$8 sps:$4 sm:$0xff]   ;;  %v7475_v15 = vld [vmem:[%s9500_s3 + $0x50] ss:$8 sps:$4 sm:$0xff]  }
 0x14d   :  { %2694 = vmatprep.subr.bf16.mxu0 %v7380_v16  ;;  %3465 = vmatpush1.bf16.msra.mxu1 %v7417_v17  ;;  %v7480_v16 = vld [vmem:[%s9500_s3 + $0x64] ss:$8 sps:$4 sm:$0xff]   ;;  %v7447_v17 = vld [vmem:[%s9499_s0 + $0xc0] ss:$28 sps:$4 sm:$0xff]  }
 0x14e   :  { %3466 = vmatprep.subr.bf16.mxu1 %v7422_v18  ;;  %v7478_v18 = vld [vmem:[%s9500_s3 + $0x60] ss:$8 sps:$4 sm:$0xff]  }
 0x150   :  { %2695 = vmatpush1.bf16.msra.mxu0 %v7378_v19  ;;  %v7483_v19 = vld [vmem:[%s9500_s3 + $0x74] ss:$8 sps:$4 sm:$0xff]  }
 0x151   :  { %2696 = vmatprep.subr.bf16.mxu0 %v7389_v20  ;;  %3467 = vmatpush1.bf16.msra.mxu1 %v7420_v21  ;;  %v7481_v20 = vld [vmem:[%s9500_s3 + $0x70] ss:$8 sps:$4 sm:$0xff]   ;;  %v7486_v21 = vld [vmem:[%s9500_s3 + $0x84] ss:$8 sps:$4 sm:$0xff]  }
 0x152   :  { %2548 = vmatmul.mubr.bf16.gmra.mrb[8].mxu0 %v7359_v22  ;;  %3320 = vmatmul.mubr.bf16.gmra.mrb[8].mxu1 %v7359_v22  ;;  %v7448_v22 = vld [vmem:[%s9499_s0 + $0xf8] ss:$28 sps:$4 sm:$0xff]  }
 0x153   :  { %2557 = vmatprep.mubr.bf16.mxu0 %v7363_v23  ;;  %3329 = vmatprep.mubr.bf16.mxu1 %v7363_v23  ;;  %v7484_v23 = vld [vmem:[%s9500_s3 + $0x80] ss:$8 sps:$4 sm:$0xff]  }
 0x154   :  { %2697 = vmatpush1.bf16.msra.mxu0 %v7387_v24  ;;  %3468 = vmatprep.subr.bf16.mxu1 %v7431_v25  ;;  %v7489_v24 = vld [vmem:[%s9500_s3 + $0x94] ss:$8 sps:$4 sm:$0xff]   ;;  %v7487_v25 = vld [vmem:[%s9500_s3 + $0x90] ss:$8 sps:$4 sm:$0xff]  }
 0x155   :  { %2698 = vmatprep.subr.bf16.mxu0 %v7398_v26  ;;  %3469 = vmatpush1.bf16.msra.mxu1 %v7429_v27  ;;  %v7492_v26 = vld [vmem:[%s9500_s3 + $0xa4] ss:$8 sps:$4 sm:$0xff]  }
 0x156   :  { %3470 = vmatprep.subr.bf16.mxu1 %v7434_v28  ;;  %v7449_v27 = vld [vmem:[%s9499_s0 + $0x130] ss:$28 sps:$4 sm:$0xff]   ;;  %v7490_v28 = vld [vmem:[%s9500_s3 + $0xa0] ss:$8 sps:$4 sm:$0xff]  }
 0x158   :  { %2699 = vmatpush1.bf16.msra.mxu0 %v7396_v29  ;;  %v7495_v29 = vld [vmem:[%s9500_s3 + $0xb4] ss:$8 sps:$4 sm:$0xff]  }
 0x159   :  { %2700 = vmatprep.subr.bf16.mxu0 %v7407_v30  ;;  %3471 = vmatpush1.bf16.msra.mxu1 %v7432_v31  ;;  %v7493_v30 = vld [vmem:[%s9500_s3 + $0xb0] ss:$8 sps:$4 sm:$0xff]   ;;  %v7498_v31 = vld [vmem:[%s9500_s3 + $0xc4] ss:$8 sps:$4 sm:$0xff]  }
 0x15a   :  { %2558 = vmatmul.mubr.bf16.gmra.mrb[12].mxu0 %v7365_v32  ;;  %3330 = vmatmul.mubr.bf16.gmra.mrb[12].mxu1 %v7365_v32  ;;  %v7450_v32 = vld [vmem:[%s9499_s0 + $0x168] ss:$28 sps:$4 sm:$0xff]  }
 0x15b   :  { %2567 = vmatprep.mubr.bf16.mxu0 %v7366_v33  ;;  %3339 = vmatprep.mubr.bf16.mxu1 %v7366_v33  ;;  %v7496_v33 = vld [vmem:[%s9500_s3 + $0xc0] ss:$8 sps:$4 sm:$0xff]  }
 0x15c   :  { %2701 = vmatpush1.bf16.msra.mxu0 %v7405_v34  ;;  %3472 = vmatprep.subr.bf16.mxu1 %v7440_v35  ;;  %v7501_v34 = vld [vmem:[%s9500_s3 + $0xd4] ss:$8 sps:$4 sm:$0xff]   ;;  %v7499_v35 = vld [vmem:[%s9500_s3 + $0xd0] ss:$8 sps:$4 sm:$0xff]  }
 0x15d   :  { %2702 = vmatprep.subr.bf16.mxu0 %v7428_v36  ;;  %3473 = vmatpush1.bf16.msra.mxu1 %v7438_v37  ;;  %v7504_v36 = vld [vmem:[%s9500_s3 + $0xe4] ss:$8 sps:$4 sm:$0xff]   ;;  %v7451_v37 = vld [vmem:[%s9499_s0 + $0x1a0] ss:$28 sps:$4 sm:$0xff]  }
 0x15e   :  { %3474 = vmatprep.subr.bf16.mxu1 %v7443_v38  ;;  %v7502_v38 = vld [vmem:[%s9500_s3 + $0xe0] ss:$8 sps:$4 sm:$0xff]  }
 0x160   :  { %2703 = vmatpush1.bf16.msra.mxu0 %v7426_v39  ;;  %v7452_v39 = vld [vmem:[%s9499_s0 + $0x1d8] ss:$28 sps:$4 sm:$0xff]  }
 0x161   :  { %3475 = vmatpush1.bf16.msra.mxu1 %v7441_v40  ;;  %4241 = vmatprep.subr.bf16.mxu0 %v7458_v58  ;;  %v7453_v40 = vld [vmem:[%s9499_s0 + $0x210] ss:$28 sps:$4 sm:$0xff]  }
 0x162   :  { %2568 = vmatmul.mubr.bf16.gmra.mrb[16].mxu0 %v7368_v41  ;;  %3340 = vmatmul.mubr.bf16.gmra.mrb[16].mxu1 %v7368_v41  ;;  %v7454_v41 = vld [vmem:[%s9499_s0 + $0x248] ss:$28 sps:$4 sm:$0xff]  }
 0x163   :  { %2577 = vmatprep.mubr.bf16.mxu0 %v7372_v42  ;;  %3349 = vmatprep.mubr.bf16.mxu1 %v7372_v42  ;;  %v7455_v42 = vld [vmem:[%s9499_s0 + $0x280] ss:$28 sps:$4 sm:$0xff]  }
 0x16a   :  { %2578 = vmatmul.mubr.bf16.gmra.mrb[20].mxu0 %v7374_v43  ;;  %3350 = vmatmul.mubr.bf16.gmra.mrb[20].mxu1 %v7374_v43  ;;  %v7507_v43 = vld [vmem:[%s9500_s3 + $0xf4] ss:$8 sps:$4 sm:$0xff]  }
 0x16b   :  { %2587 = vmatprep.mubr.bf16.mxu0 %v7375_v44  ;;  %3359 = vmatprep.mubr.bf16.mxu1 %v7375_v44  ;;  %v7505_v44 = vld [vmem:[%s9500_s3 + $0xf0] ss:$8 sps:$4 sm:$0xff]  }
 0x172   :  { %2588 = vmatmul.mubr.bf16.gmra.mrb[24].mxu0 %v7377_v45  ;;  %3360 = vmatmul.mubr.bf16.gmra.mrb[24].mxu1 %v7377_v45  ;;  %v7459_v45 = vld [vmem:[%s9499_s0 + $0x2b8] ss:$28 sps:$4 sm:$0xff]  }
 0x173   :  { %2597 = vmatprep.mubr.bf16.mxu0 %v7381_v46  ;;  %3369 = vmatprep.mubr.bf16.mxu1 %v7381_v46  ;;  %v7510_v46 = vld [vmem:[%s9500_s3 + $0x104] ss:$8 sps:$4 sm:$0xff]  }
 0x17a   :  { %2598 = vmatmul.mubr.bf16.gmra.mrb[28].mxu0 %v7383_v47  ;;  %3370 = vmatmul.mubr.bf16.gmra.mrb[28].mxu1 %v7383_v47  ;;  %v7463_v47 = vld [vmem:[%s9499_s0 + $0x2f0] ss:$28 sps:$4 sm:$0xff]  }
 0x17b   :  { %2607 = vmatprep.mubr.bf16.mxu0 %v7384_v48  ;;  %3379 = vmatprep.mubr.bf16.mxu1 %v7384_v48  ;;  %v7467_v48 = vld [vmem:[%s9499_s0 + $0x328] ss:$28 sps:$4 sm:$0xff]  }
 0x182   :  { %2608 = vmatmul.mubr.bf16.gmra.mrb[32].mxu0 %v7386_v49  ;;  %3380 = vmatmul.mubr.bf16.gmra.mrb[32].mxu1 %v7386_v49  ;;  %v7471_v49 = vld [vmem:[%s9499_s0 + $0x360] ss:$28 sps:$4 sm:$0xff]  }
 0x183   :  { %2617 = vmatprep.mubr.bf16.mxu0 %v7390_v50  ;;  %3389 = vmatprep.mubr.bf16.mxu1 %v7390_v50  ;;  %v393_v50 = vlaneseq }
 0x18a   :  { %2618 = vmatmul.mubr.bf16.gmra.mrb[36].mxu0 %v7392_v51  ;;  %3390 = vmatmul.mubr.bf16.gmra.mrb[36].mxu1 %v7392_v51  ;;  %v8784_v51 = vshrl.u32 %v393_v50, 7 }
 0x18b   :  { %2627 = vmatprep.mubr.bf16.mxu0 %v7393_v52  ;;  %3399 = vmatprep.mubr.bf16.mxu1 %v7393_v52 }
 0x18c   :  { %v395_v52 = vsub.s32 0, %v8784_v51 }
 0x192   :  { %2628 = vmatmul.mubr.bf16.gmra.mrb[40].mxu0 %v7395_v53  ;;  %3400 = vmatmul.mubr.bf16.gmra.mrb[40].mxu1 %v7395_v53  ;;  %v403_v53 = vsub.s32 2, %v8784_v51 }
 0x193   :  { %2637 = vmatprep.mubr.bf16.mxu0 %v7399_v54  ;;  %3409 = vmatprep.mubr.bf16.mxu1 %v7399_v54  ;;  %v391_v54 = vld [vmem:[%s9501_s2] sm:$0xf] }
 0x194   :  { %v8797_v58 = vrot.slane %v391_v54, %v403_v53 }
 0x19a   :  { %2638 = vmatmul.mubr.bf16.gmra.mrb[44].mxu0 %v7401_v55  ;;  %3410 = vmatmul.mubr.bf16.gmra.mrb[44].mxu1 %v7401_v55  ;;  %v399_v55 = vsub.s32 1, %v8784_v51 }
 0x19b   :  { %2647 = vmatprep.mubr.bf16.mxu0 %v7402_v56  ;;  %3419 = vmatprep.mubr.bf16.mxu1 %v7402_v56  ;;  %v407_v56 = vsub.s32 3, %v8784_v51 }
 0x1a2   :  { %2648 = vmatmul.mubr.bf16.gmra.mrb[48].mxu0 %v7404_v57  ;;  %3420 = vmatmul.mubr.bf16.gmra.mrb[48].mxu1 %v7404_v57  ;;  %v8795_v57 = vrot.slane %v391_v54, %v395_v52 }
 0x1a3   :  { %2657 = vmatprep.mubr.bf16.mxu0 %v7414_v59  ;;  %3429 = vmatprep.mubr.bf16.mxu1 %v7414_v59  ;;  %v8801_v59 = vrot.slane %v391_v54, %v399_v55 }
 0x1aa   :  { %2658 = vmatmul.mubr.bf16.gmra.mrb[52].mxu0 %v7416_v60  ;;  %3430 = vmatmul.mubr.bf16.gmra.mrb[52].mxu1 %v7416_v60  ;;  %v8803_v60 = vrot.slane %v391_v54, %v407_v56 }
 0x1ab   :  { %2667 = vmatprep.mubr.bf16.mxu0 %v7423_v61  ;;  %3439 = vmatprep.mubr.bf16.mxu1 %v7423_v61 }
 0x1b2   :  { %2668 = vmatmul.mubr.bf16.gmra.mrb[56].mxu0 %v7425_v62  ;;  %3440 = vmatmul.mubr.bf16.gmra.mrb[56].mxu1 %v7425_v62 }
 0x1b3   :  { %2677 = vmatprep.mubr.bf16.mxu0 %v7435_v63  ;;  %3449 = vmatprep.mubr.bf16.mxu1 %v7435_v63 }
 0x1ba   :  { %2678 = vmatmul.mubr.bf16.gmra.mrb[60].mxu0 %v7437_v0  ;;  %3450 = vmatmul.mubr.bf16.gmra.mrb[60].mxu1 %v7437_v0 }
 0x1bb   :  { %2720 = vmatprep.mubr.bf16.mxu0 %v7584_v1  ;;  %3492 = vmatprep.mubr.bf16.mxu1 %v7584_v1 }
 0x1c2   :  { %2721 = vmatmul.mubr.bf16.vlgmr.msra.gmra.mrb[0].mxu0 %v7444_v2  ;;  %3493 = vmatmul.mubr.bf16.vlgmr.msra.gmra.mrb[0].mxu1 %v7444_v2 }
 0x1c3   :  { %2730 = vmatprep.mubr.bf16.mxu0 %v7584_v1  ;;  %3502 = vmatprep.mubr.bf16.mxu1 %v7584_v1 }
 0x1c4   :  { %4242 = vmatpush1.bf16.msra.mxu0 %v7456_v3 }
 0x1c5   :  { %4243 = vmatprep.subr.bf16.mxu0 %v7462_v4 }
 0x1c8   :  { %4244 = vmatpush1.bf16.msra.mxu0 %v7460_v5 }
 0x1c9   :  { %4245 = vmatprep.subr.bf16.mxu0 %v7466_v6 }
 0x1ca   :  { %2731 = vmatmul.mubr.bf16.gmra.mrb[4].mxu0 %v7445_v7  ;;  %3503 = vmatmul.mubr.bf16.gmra.mrb[4].mxu1 %v7445_v7 }
 0x1cb   :  { %2740 = vmatprep.mubr.bf16.mxu0 %v7584_v1  ;;  %3512 = vmatprep.mubr.bf16.mxu1 %v7584_v1 }
 0x1cc   :  { %4246 = vmatpush1.bf16.msra.mxu0 %v7464_v8 }
 0x1cd   :  { %4247 = vmatprep.subr.bf16.mxu0 %v7470_v9 }
 0x1d0   :  { %4248 = vmatpush1.bf16.msra.mxu0 %v7468_v10 }
 0x1d1   :  { %4249 = vmatprep.subr.bf16.mxu0 %v7474_v11 }
 0x1d2   :  { %2741 = vmatmul.mubr.bf16.gmra.mrb[8].mxu0 %v7446_v12  ;;  %3513 = vmatmul.mubr.bf16.gmra.mrb[8].mxu1 %v7446_v12 }
 0x1d3   :  { %2750 = vmatprep.mubr.bf16.mxu0 %v7584_v1  ;;  %3522 = vmatprep.mubr.bf16.mxu1 %v7584_v1 }
 0x1d4   :  { %4250 = vmatpush1.bf16.msra.mxu0 %v7472_v13 }
 0x1d5   :  { %4251 = vmatprep.subr.bf16.mxu0 %v7477_v14 }
 0x1d8   :  { %4252 = vmatpush1.bf16.msra.mxu0 %v7475_v15 }
 0x1d9   :  { %4253 = vmatprep.subr.bf16.mxu0 %v7480_v16 }
 0x1da   :  { %2751 = vmatmul.mubr.bf16.gmra.mrb[12].mxu0 %v7447_v17  ;;  %3523 = vmatmul.mubr.bf16.gmra.mrb[12].mxu1 %v7447_v17 }
 0x1db   :  { %2760 = vmatprep.mubr.bf16.mxu0 %v7584_v1  ;;  %3532 = vmatprep.mubr.bf16.mxu1 %v7584_v1 }
 0x1dc   :  { %4254 = vmatpush1.bf16.msra.mxu0 %v7478_v18 }
 0x1dd   :  { %4255 = vmatprep.subr.bf16.mxu0 %v7483_v19 }
 0x1e0   :  { %4256 = vmatpush1.bf16.msra.mxu0 %v7481_v20 }
 0x1e1   :  { %4257 = vmatprep.subr.bf16.mxu0 %v7486_v21 }
 0x1e2   :  { %2761 = vmatmul.mubr.bf16.gmra.mrb[16].mxu0 %v7448_v22  ;;  %3533 = vmatmul.mubr.bf16.gmra.mrb[16].mxu1 %v7448_v22 }
 0x1e3   :  { %2770 = vmatprep.mubr.bf16.mxu0 %v7584_v1  ;;  %3542 = vmatprep.mubr.bf16.mxu1 %v7584_v1 }
 0x1e4   :  { %4258 = vmatpush1.bf16.msra.mxu0 %v7484_v23 }
 0x1e5   :  { %4259 = vmatprep.subr.bf16.mxu0 %v7489_v24 }
 0x1e8   :  { %4260 = vmatpush1.bf16.msra.mxu0 %v7487_v25 }
 0x1e9   :  { %4261 = vmatprep.subr.bf16.mxu0 %v7492_v26 }
 0x1ea   :  { %2771 = vmatmul.mubr.bf16.gmra.mrb[20].mxu0 %v7449_v27  ;;  %3543 = vmatmul.mubr.bf16.gmra.mrb[20].mxu1 %v7449_v27  ;;  %v7508_v27 = vld [vmem:[%s9500_s3 + $0x100] ss:$8 sps:$4 sm:$0xff]  }
 0x1eb   :  { %2780 = vmatprep.mubr.bf16.mxu0 %v7584_v1  ;;  %3552 = vmatprep.mubr.bf16.mxu1 %v7584_v1 }
 0x1ec   :  { %4262 = vmatpush1.bf16.msra.mxu0 %v7490_v28 }
 0x1ed   :  { %4263 = vmatprep.subr.bf16.mxu0 %v7495_v29 }
 0x1f0   :  { %4264 = vmatpush1.bf16.msra.mxu0 %v7493_v30 }
 0x1f1   :  { %4265 = vmatprep.subr.bf16.mxu0 %v7498_v31 }
 0x1f2   :  { %2781 = vmatmul.mubr.bf16.gmra.mrb[24].mxu0 %v7450_v32  ;;  %3553 = vmatmul.mubr.bf16.gmra.mrb[24].mxu1 %v7450_v32  ;;  %v7513_v32 = vld [vmem:[%s9500_s3 + $0x114] ss:$8 sps:$4 sm:$0xff]  }
 0x1f3   :  { %2790 = vmatprep.mubr.bf16.mxu0 %v7584_v1  ;;  %3562 = vmatprep.mubr.bf16.mxu1 %v7584_v1 }
 0x1f4   :  { %4266 = vmatpush1.bf16.msra.mxu0 %v7496_v33 }
 0x1f5   :  { %4267 = vmatprep.subr.bf16.mxu0 %v7501_v34 }
 0x1f8   :  { %4268 = vmatpush1.bf16.msra.mxu0 %v7499_v35 }
 0x1f9   :  { %4269 = vmatprep.subr.bf16.mxu0 %v7504_v36 }
 0x1fa   :  { %2791 = vmatmul.mubr.bf16.gmra.mrb[28].mxu0 %v7451_v37  ;;  %3563 = vmatmul.mubr.bf16.gmra.mrb[28].mxu1 %v7451_v37 }
 0x1fb   :  { %2800 = vmatprep.mubr.bf16.mxu0 %v7584_v1  ;;  %3572 = vmatprep.mubr.bf16.mxu1 %v7584_v1 }
 0x1fc   :  { %4270 = vmatpush1.bf16.msra.mxu0 %v7502_v38 }
 0x1fd   :  { %4271 = vmatprep.subr.bf16.mxu0 %v7507_v43  ;;  %v7511_v43 = vld [vmem:[%s9500_s3 + $0x110] ss:$8 sps:$4 sm:$0xff]  }
 0x200   :  { %4272 = vmatpush1.bf16.msra.mxu0 %v7505_v44 }
 0x201   :  { %4434 = vmatprep.subr.bf16.mxu0 %v7510_v46 }
 0x202   :  { %2801 = vmatmul.mubr.bf16.gmra.mrb[32].mxu0 %v7452_v39  ;;  %3573 = vmatmul.mubr.bf16.gmra.mrb[32].mxu1 %v7452_v39 }
 0x203   :  { %2810 = vmatprep.mubr.bf16.mxu0 %v7584_v1  ;;  %3582 = vmatprep.mubr.bf16.mxu1 %v7584_v1 }
 0x20a   :  { %2811 = vmatmul.mubr.bf16.gmra.mrb[36].mxu0 %v7453_v40  ;;  %3583 = vmatmul.mubr.bf16.gmra.mrb[36].mxu1 %v7453_v40 }
 0x20b   :  { %2820 = vmatprep.mubr.bf16.mxu0 %v7584_v1  ;;  %3592 = vmatprep.mubr.bf16.mxu1 %v7584_v1 }
 0x212   :  { %2821 = vmatmul.mubr.bf16.gmra.mrb[40].mxu0 %v7454_v41  ;;  %3593 = vmatmul.mubr.bf16.gmra.mrb[40].mxu1 %v7454_v41 }
 0x213   :  { %2830 = vmatprep.mubr.bf16.mxu0 %v7584_v1  ;;  %3602 = vmatprep.mubr.bf16.mxu1 %v7584_v1 }
 0x21a   :  { %2831 = vmatmul.mubr.bf16.gmra.mrb[44].mxu0 %v7455_v42  ;;  %3603 = vmatmul.mubr.bf16.gmra.mrb[44].mxu1 %v7455_v42 }
 0x21b   :  { %2840 = vmatprep.mubr.bf16.mxu0 %v7584_v1  ;;  %3612 = vmatprep.mubr.bf16.mxu1 %v7584_v1 }
 0x222   :  { %2841 = vmatmul.mubr.bf16.gmra.mrb[48].mxu0 %v7459_v45  ;;  %3613 = vmatmul.mubr.bf16.gmra.mrb[48].mxu1 %v7459_v45 }
 0x223   :  { %2850 = vmatprep.mubr.bf16.mxu0 %v7584_v1  ;;  %3622 = vmatprep.mubr.bf16.mxu1 %v7584_v1 }
 0x22a   :  { %2851 = vmatmul.mubr.bf16.gmra.mrb[52].mxu0 %v7463_v47  ;;  %3623 = vmatmul.mubr.bf16.gmra.mrb[52].mxu1 %v7463_v47 }
 0x22b   :  { %2860 = vmatprep.mubr.bf16.mxu0 %v7584_v1  ;;  %3632 = vmatprep.mubr.bf16.mxu1 %v7584_v1 }
 0x232   :  { %2861 = vmatmul.mubr.bf16.gmra.mrb[56].mxu0 %v7467_v48  ;;  %3633 = vmatmul.mubr.bf16.gmra.mrb[56].mxu1 %v7467_v48  ;;  %v7516_v48 = vld [vmem:[%s9500_s3 + $0x124] ss:$8 sps:$4 sm:$0xff]  }
 0x233   :  { %2870 = vmatprep.mubr.bf16.mxu0 %v7584_v1  ;;  %3642 = vmatprep.mubr.bf16.mxu1 %v7584_v1 }
 0x23a   :  { %2871 = vmatmul.mubr.bf16.gmra.mrb[60].mxu0 %v7471_v49  ;;  %3643 = vmatmul.mubr.bf16.gmra.mrb[60].mxu1 %v7471_v49 }
 0x295   :  { %v2722_v61 = vpop.f32.mrb[0].mxu0  ;;  %v3494_v62 = vpop.f32.mrb[0].mxu1 }
 0x296   :  { %v6323_v63 = vadd.f32 %v2722_v61, %v8795_v57  ;;  %v6387_v0 = vadd.f32 %v3494_v62, %v8797_v58  ;;  %v2724_v1 = vpop.f32.mrb[1].mxu0  ;;  %v3496_v2 = vpop.f32.mrb[1].mxu1 }
 0x297   :  { %v6324_v3 = vadd.f32 %v2724_v1, %v8801_v59  ;;  %v6388_v4 = vadd.f32 %v3496_v2, %v8803_v60  ;;  %v2726_v5 = vpop.f32.mrb[2].mxu0  ;;  %v3498_v6 = vpop.f32.mrb[2].mxu1  ;;  %v7514_v2 = vld [vmem:[%s9500_s3 + $0x120] ss:$8 sps:$4 sm:$0xff]  }
 0x298   :  { %v6325_v7 = vadd.f32 %v2726_v5, %v8795_v57  ;;  %v6389_v8 = vadd.f32 %v3498_v6, %v8797_v58  ;;  %v2728_v9 = vpop.f32.mrb[3].mxu0  ;;  %v3500_v10 = vpop.f32.mrb[3].mxu1  ;;  %v3653_v13 = vmax.f32 %v6323_v63, 0.0  ;;  %v3655_v14 = vmax.f32 %v6387_v0, 0.0 }
 0x299   :  { %v6326_v11 = vadd.f32 %v2728_v9, %v8801_v59  ;;  %v6390_v12 = vadd.f32 %v3500_v10, %v8803_v60  ;;  %v3654_v17 = vmax.f32 %v6324_v3, 0.0  ;;  %v3656_v18 = vmax.f32 %v6388_v4, 0.0 }
 0x29a   :  { %v3657_v15 = vmax.f32 %v6325_v7, 0.0  ;;  %v3659_v16 = vmax.f32 %v6389_v8, 0.0  ;;  %v7519_v7 = vld [vmem:[%s9500_s3 + $0x134] ss:$8 sps:$4 sm:$0xff]  }
 0x29b   :  { %v3658_v19 = vmax.f32 %v6326_v11, 0.0  ;;  %v3660_v20 = vmax.f32 %v6390_v12, 0.0 }
 0x29c   :  { %v3781_v21 = vpack.c.bf16 %v3657_v15, %v3653_v13  ;;  %v8813_v22 = vpack.c.bf16 %v3659_v16, %v3655_v14 }
 0x29d   :  { %v3782_v23 = vpack.c.bf16 %v3658_v19, %v3654_v17  ;;  %v8815_v24 = vpack.c.bf16 %v3660_v20, %v3656_v18  ;;  %v2732_v25 = vpop.f32.mrb[4].mxu0  ;;  %v3504_v26 = vpop.f32.mrb[4].mxu1  ;;  %v7517_v18 = vld [vmem:[%s9500_s3 + $0x130] ss:$8 sps:$4 sm:$0xff]  }
 0x29e   :  { %v6327_v28 = vadd.f32 %v2732_v25, %v8795_v57  ;;  %v6391_v29 = vadd.f32 %v3504_v26, %v8797_v58  ;;  %v2734_v30 = vpop.f32.mrb[5].mxu0  ;;  %v3506_v31 = vpop.f32.mrb[5].mxu1  ;;  %v7522_v25 = vld [vmem:[%s9500_s3 + $0x144] ss:$8 sps:$4 sm:$0xff]  }
 0x29f   :  { %v6328_v33 = vadd.f32 %v2734_v30, %v8801_v59  ;;  %v6392_v34 = vadd.f32 %v3506_v31, %v8803_v60  ;;  %v2736_v35 = vpop.f32.mrb[6].mxu0  ;;  %v3508_v36 = vpop.f32.mrb[6].mxu1  ;;  %4273 = vmatprep.mubr.bf16.mxu0 %v3782_v23 }
 0x2a0   :  { %v6329_v37 = vadd.f32 %v2736_v35, %v8795_v57  ;;  %v6393_v38 = vadd.f32 %v3508_v36, %v8797_v58  ;;  %v2738_v39 = vpop.f32.mrb[7].mxu0  ;;  %v3510_v40 = vpop.f32.mrb[7].mxu1  ;;  %4274 = vmatmul.mubr.bf16.vlgmr.msra.gmra.mrb[64].mxu0 %v3781_v21  ;;  %v3661_v44 = vmax.f32 %v6327_v28, 0.0  ;;  %v3663_v45 = vmax.f32 %v6391_v29, 0.0  ;;  %v7520_v36 = vld [vmem:[%s9500_s3 + $0x140] ss:$8 sps:$4 sm:$0xff]  }
 0x2a1   :  { %v6330_v41 = vadd.f32 %v2738_v39, %v8801_v59  ;;  %v6394_v42 = vadd.f32 %v3510_v40, %v8803_v60  ;;  %4435 = vmatpush1.bf16.msra.mxu0 %v7508_v27  ;;  %v3662_v49 = vmax.f32 %v6328_v33, 0.0  ;;  %v3664_v50 = vmax.f32 %v6392_v34, 0.0 }
 0x2a2   :  { %v3665_v46 = vmax.f32 %v6329_v37, 0.0  ;;  %v3667_v47 = vmax.f32 %v6393_v38, 0.0  ;;  %4436 = vmatprep.subr.bf16.mxu0 %v7513_v32 }
 0x2a3   :  { %v3666_v53 = vmax.f32 %v6330_v41, 0.0  ;;  %v3668_v54 = vmax.f32 %v6394_v42, 0.0  ;;  %v7525_v41 = vld [vmem:[%s9500_s3 + $0x154] ss:$8 sps:$4 sm:$0xff]  }
 0x2a4   :  { %v3785_v56 = vpack.c.bf16 %v3665_v46, %v3661_v44  ;;  %v8837_v61 = vpack.c.bf16 %v3667_v47, %v3663_v45 }
 0x2a5   :  { %v3786_v62 = vpack.c.bf16 %v3666_v53, %v3662_v49  ;;  %v8839_v63 = vpack.c.bf16 %v3668_v54, %v3664_v50  ;;  %v2742_v0 = vpop.f32.mrb[8].mxu0  ;;  %v3514_v1 = vpop.f32.mrb[8].mxu1  ;;  %4437 = vmatpush1.bf16.msra.mxu0 %v7511_v43  ;;  %v7523_v54 = vld [vmem:[%s9500_s3 + $0x150] ss:$8 sps:$4 sm:$0xff]  }
 0x2a6   :  { %v6331_v3 = vadd.f32 %v2742_v0, %v8795_v57  ;;  %v6395_v4 = vadd.f32 %v3514_v1, %v8797_v58  ;;  %v2744_v5 = vpop.f32.mrb[9].mxu0  ;;  %v3516_v6 = vpop.f32.mrb[9].mxu1  ;;  %4438 = vmatprep.subr.bf16.mxu0 %v7516_v48 }
 0x2a7   :  { %v6332_v8 = vadd.f32 %v2744_v5, %v8801_v59  ;;  %v6396_v9 = vadd.f32 %v3516_v6, %v8803_v60  ;;  %v2746_v10 = vpop.f32.mrb[10].mxu0  ;;  %v3518_v11 = vpop.f32.mrb[10].mxu1  ;;  %4283 = vmatprep.mubr.bf16.mxu0 %v3786_v62 }
 0x2a8   :  { %v6333_v12 = vadd.f32 %v2746_v10, %v8795_v57  ;;  %v6397_v13 = vadd.f32 %v3518_v11, %v8797_v58  ;;  %v2748_v14 = vpop.f32.mrb[11].mxu0  ;;  %v3520_v15 = vpop.f32.mrb[11].mxu1  ;;  %4284 = vmatmul.mubr.bf16.gmra.mrb[68].mxu0 %v3785_v56  ;;  %v3669_v19 = vmax.f32 %v6331_v3, 0.0  ;;  %v3671_v20 = vmax.f32 %v6395_v4, 0.0 }
 0x2a9   :  { %v6334_v16 = vadd.f32 %v2748_v14, %v8801_v59  ;;  %v6398_v17 = vadd.f32 %v3520_v15, %v8803_v60  ;;  %4439 = vmatpush1.bf16.msra.mxu0 %v7514_v2  ;;  %v3670_v26 = vmax.f32 %v6332_v8, 0.0  ;;  %v3672_v27 = vmax.f32 %v6396_v9, 0.0  ;;  %v7528_v2 = vld [vmem:[%s9500_s3 + $0x164] ss:$8 sps:$4 sm:$0xff]  }
 0x2aa   :  { %v3673_v21 = vmax.f32 %v6333_v12, 0.0  ;;  %v3675_v23 = vmax.f32 %v6397_v13, 0.0  ;;  %4440 = vmatprep.subr.bf16.mxu0 %v7519_v7  ;;  %v7526_v13 = vld [vmem:[%s9500_s3 + $0x160] ss:$8 sps:$4 sm:$0xff]  }
 0x2ab   :  { %v3674_v28 = vmax.f32 %v6334_v16, 0.0  ;;  %v3676_v29 = vmax.f32 %v6398_v17, 0.0 }
 0x2ac   :  { %v3789_v30 = vpack.c.bf16 %v3673_v21, %v3669_v19  ;;  %v8861_v31 = vpack.c.bf16 %v3675_v23, %v3671_v20 }
 0x2ad   :  { %v3790_v32 = vpack.c.bf16 %v3674_v28, %v3670_v26  ;;  %v8863_v33 = vpack.c.bf16 %v3676_v29, %v3672_v27  ;;  %v2752_v34 = vpop.f32.mrb[12].mxu0  ;;  %v3524_v35 = vpop.f32.mrb[12].mxu1  ;;  %4441 = vmatpush1.bf16.msra.mxu0 %v7517_v18  ;;  %v7531_v18 = vld [vmem:[%s9500_s3 + $0x174] ss:$8 sps:$4 sm:$0xff]  }
 0x2ae   :  { %v6335_v37 = vadd.f32 %v2752_v34, %v8795_v57  ;;  %v6399_v38 = vadd.f32 %v3524_v35, %v8797_v58  ;;  %v2754_v39 = vpop.f32.mrb[13].mxu0  ;;  %v3526_v40 = vpop.f32.mrb[13].mxu1  ;;  %4442 = vmatprep.subr.bf16.mxu0 %v7522_v25 }
 0x2af   :  { %v6336_v42 = vadd.f32 %v2754_v39, %v8801_v59  ;;  %v6400_v43 = vadd.f32 %v3526_v40, %v8803_v60  ;;  %v2756_v44 = vpop.f32.mrb[14].mxu0  ;;  %v3528_v45 = vpop.f32.mrb[14].mxu1  ;;  %4293 = vmatprep.mubr.bf16.mxu0 %v3790_v32  ;;  %v7529_v32 = vld [vmem:[%s9500_s3 + $0x170] ss:$8 sps:$4 sm:$0xff]  }
 0x2b0   :  { %v6337_v46 = vadd.f32 %v2756_v44, %v8795_v57  ;;  %v6401_v47 = vadd.f32 %v3528_v45, %v8797_v58  ;;  %v2758_v48 = vpop.f32.mrb[15].mxu0  ;;  %v3530_v49 = vpop.f32.mrb[15].mxu1  ;;  %4294 = vmatmul.mubr.bf16.gmra.mrb[72].mxu0 %v3789_v30  ;;  %v3677_v56 = vmax.f32 %v6335_v37, 0.0  ;;  %v3679_v62 = vmax.f32 %v6399_v38, 0.0  ;;  %v7534_v38 = vld [vmem:[%s9500_s3 + $0x184] ss:$8 sps:$4 sm:$0xff]  }
 0x2b1   :  { %v6338_v50 = vadd.f32 %v2758_v48, %v8801_v59  ;;  %v6402_v53 = vadd.f32 %v3530_v49, %v8803_v60  ;;  %4443 = vmatpush1.bf16.msra.mxu0 %v7520_v36  ;;  %v3678_v3 = vmax.f32 %v6336_v42, 0.0  ;;  %v3680_v4 = vmax.f32 %v6400_v43, 0.0  ;;  %v7532_v49 = vld [vmem:[%s9500_s3 + $0x180] ss:$8 sps:$4 sm:$0xff]  }
 0x2b2   :  { %v3681_v0 = vmax.f32 %v6337_v46, 0.0  ;;  %v3683_v1 = vmax.f32 %v6401_v47, 0.0  ;;  %4444 = vmatprep.subr.bf16.mxu0 %v7525_v41 }
 0x2b3   :  { %v3682_v5 = vmax.f32 %v6338_v50, 0.0  ;;  %v3684_v6 = vmax.f32 %v6402_v53, 0.0 }
 0x2b4   :  { %v3793_v7 = vpack.c.bf16 %v3681_v0, %v3677_v56  ;;  %v8885_v8 = vpack.c.bf16 %v3683_v1, %v3679_v62  ;;  %v7537_v62 = vld [vmem:[%s9500_s3 + $0x194] ss:$8 sps:$4 sm:$0xff]  }
 0x2b5   :  { %v3794_v9 = vpack.c.bf16 %v3682_v5, %v3678_v3  ;;  %v8887_v10 = vpack.c.bf16 %v3684_v6, %v3680_v4  ;;  %v2762_v11 = vpop.f32.mrb[16].mxu0  ;;  %v3534_v12 = vpop.f32.mrb[16].mxu1  ;;  %4445 = vmatpush1.bf16.msra.mxu0 %v7523_v54 }
 0x2b6   :  { %v6339_v14 = vadd.f32 %v2762_v11, %v8795_v57  ;;  %v6403_v15 = vadd.f32 %v3534_v12, %v8797_v58  ;;  %v2764_v16 = vpop.f32.mrb[17].mxu0  ;;  %v3536_v17 = vpop.f32.mrb[17].mxu1  ;;  %4446 = vmatprep.subr.bf16.mxu0 %v7528_v2  ;;  %v7535_v12 = vld [vmem:[%s9500_s3 + $0x190] ss:$8 sps:$4 sm:$0xff]  }
 0x2b7   :  { %v6340_v19 = vadd.f32 %v2764_v16, %v8801_v59  ;;  %v6404_v20 = vadd.f32 %v3536_v17, %v8803_v60  ;;  %v2766_v21 = vpop.f32.mrb[18].mxu0  ;;  %v3538_v23 = vpop.f32.mrb[18].mxu1  ;;  %4303 = vmatprep.mubr.bf16.mxu0 %v3794_v9  ;;  %v7540_v17 = vld [vmem:[%s9500_s3 + $0x1a4] ss:$8 sps:$4 sm:$0xff]  }
 0x2b8   :  { %v6341_v25 = vadd.f32 %v2766_v21, %v8795_v57  ;;  %v6405_v26 = vadd.f32 %v3538_v23, %v8797_v58  ;;  %v2768_v27 = vpop.f32.mrb[19].mxu0  ;;  %v3540_v28 = vpop.f32.mrb[19].mxu1  ;;  %4304 = vmatmul.mubr.bf16.gmra.mrb[76].mxu0 %v3793_v7  ;;  %v3685_v34 = vmax.f32 %v6339_v14, 0.0  ;;  %v3687_v35 = vmax.f32 %v6403_v15, 0.0 }
 0x2b9   :  { %v6342_v29 = vadd.f32 %v2768_v27, %v8801_v59  ;;  %v6406_v30 = vadd.f32 %v3540_v28, %v8803_v60  ;;  %4447 = vmatpush1.bf16.msra.mxu0 %v7526_v13  ;;  %v3686_v39 = vmax.f32 %v6340_v19, 0.0  ;;  %v3688_v40 = vmax.f32 %v6404_v20, 0.0 }
 0x2ba   :  { %v3689_v36 = vmax.f32 %v6341_v25, 0.0  ;;  %v3691_v37 = vmax.f32 %v6405_v26, 0.0  ;;  %4448 = vmatprep.subr.bf16.mxu0 %v7531_v18 }
 0x2bb   :  { %v3690_v41 = vmax.f32 %v6342_v29, 0.0  ;;  %v3692_v42 = vmax.f32 %v6406_v30, 0.0  ;;  %v7538_v30 = vld [vmem:[%s9500_s3 + $0x1a0] ss:$8 sps:$4 sm:$0xff]  }
 0x2bc   :  { %v3797_v43 = vpack.c.bf16 %v3689_v36, %v3685_v34  ;;  %v8909_v44 = vpack.c.bf16 %v3691_v37, %v3687_v35  ;;  %v7543_v37 = vld [vmem:[%s9500_s3 + $0x1b4] ss:$8 sps:$4 sm:$0xff]  }
 0x2bd   :  { %v3798_v45 = vpack.c.bf16 %v3690_v41, %v3686_v39  ;;  %v8911_v46 = vpack.c.bf16 %v3692_v42, %v3688_v40  ;;  %v2772_v47 = vpop.f32.mrb[20].mxu0  ;;  %v3544_v48 = vpop.f32.mrb[20].mxu1  ;;  %4449 = vmatpush1.bf16.msra.mxu0 %v7529_v32 }
 0x2be   :  { %v6343_v50 = vadd.f32 %v2772_v47, %v8795_v57  ;;  %v6407_v53 = vadd.f32 %v3544_v48, %v8797_v58  ;;  %v2774_v54 = vpop.f32.mrb[21].mxu0  ;;  %v3546_v56 = vpop.f32.mrb[21].mxu1  ;;  %4450 = vmatprep.subr.bf16.mxu0 %v7534_v38 }
 0x2bf   :  { %v6344_v0 = vadd.f32 %v2774_v54, %v8801_v59  ;;  %v6408_v1 = vadd.f32 %v3546_v56, %v8803_v60  ;;  %v2776_v2 = vpop.f32.mrb[22].mxu0  ;;  %v3548_v3 = vpop.f32.mrb[22].mxu1  ;;  %4313 = vmatprep.mubr.bf16.mxu0 %v3798_v45 }
 0x2c0   :  { %v6345_v4 = vadd.f32 %v2776_v2, %v8795_v57  ;;  %v6409_v5 = vadd.f32 %v3548_v3, %v8797_v58  ;;  %v2778_v6 = vpop.f32.mrb[23].mxu0  ;;  %v3550_v7 = vpop.f32.mrb[23].mxu1  ;;  %4314 = vmatmul.mubr.bf16.gmra.mrb[80].mxu0 %v3797_v43  ;;  %v3693_v13 = vmax.f32 %v6343_v50, 0.0  ;;  %v3695_v14 = vmax.f32 %v6407_v53, 0.0  ;;  %v7541_v50 = vld [vmem:[%s9500_s3 + $0x1b0] ss:$8 sps:$4 sm:$0xff]  }
 0x2c1   :  { %v6346_v9 = vadd.f32 %v2778_v6, %v8801_v59  ;;  %v6410_v11 = vadd.f32 %v3550_v7, %v8803_v60  ;;  %4451 = vmatpush1.bf16.msra.mxu0 %v7532_v49  ;;  %v3694_v18 = vmax.f32 %v6344_v0, 0.0  ;;  %v3696_v19 = vmax.f32 %v6408_v1, 0.0  ;;  %v7546_v0 = vld [vmem:[%s9500_s3 + $0x1c4] ss:$8 sps:$4 sm:$0xff]  }
 0x2c2   :  { %v3697_v15 = vmax.f32 %v6345_v4, 0.0  ;;  %v3699_v16 = vmax.f32 %v6409_v5, 0.0  ;;  %4452 = vmatprep.subr.bf16.mxu0 %v7537_v62 }
 0x2c3   :  { %v3698_v20 = vmax.f32 %v6346_v9, 0.0  ;;  %v3700_v21 = vmax.f32 %v6410_v11, 0.0 }
 0x2c4   :  { %v3801_v23 = vpack.c.bf16 %v3697_v15, %v3693_v13  ;;  %v8933_v25 = vpack.c.bf16 %v3699_v16, %v3695_v14  ;;  %v7544_v13 = vld [vmem:[%s9500_s3 + $0x1c0] ss:$8 sps:$4 sm:$0xff]  }
 0x2c5   :  { %v3802_v26 = vpack.c.bf16 %v3698_v20, %v3694_v18  ;;  %v8935_v27 = vpack.c.bf16 %v3700_v21, %v3696_v19  ;;  %v2782_v28 = vpop.f32.mrb[24].mxu0  ;;  %v3554_v29 = vpop.f32.mrb[24].mxu1  ;;  %4453 = vmatpush1.bf16.msra.mxu0 %v7535_v12  ;;  %v7549_v18 = vld [vmem:[%s9500_s3 + $0x1d4] ss:$8 sps:$4 sm:$0xff]  }
 0x2c6   :  { %v6347_v32 = vadd.f32 %v2782_v28, %v8795_v57  ;;  %v6411_v34 = vadd.f32 %v3554_v29, %v8797_v58  ;;  %v2784_v35 = vpop.f32.mrb[25].mxu0  ;;  %v3556_v36 = vpop.f32.mrb[25].mxu1  ;;  %4454 = vmatprep.subr.bf16.mxu0 %v7540_v17 }
 0x2c7   :  { %v6348_v38 = vadd.f32 %v2784_v35, %v8801_v59  ;;  %v6412_v39 = vadd.f32 %v3556_v36, %v8803_v60  ;;  %v2786_v40 = vpop.f32.mrb[26].mxu0  ;;  %v3558_v41 = vpop.f32.mrb[26].mxu1  ;;  %4323 = vmatprep.mubr.bf16.mxu0 %v3802_v26  ;;  %v7547_v35 = vld [vmem:[%s9500_s3 + $0x1d0] ss:$8 sps:$4 sm:$0xff]  }
 0x2c8   :  { %v6349_v42 = vadd.f32 %v2786_v40, %v8795_v57  ;;  %v6413_v43 = vadd.f32 %v3558_v41, %v8797_v58  ;;  %v2788_v45 = vpop.f32.mrb[27].mxu0  ;;  %v3560_v47 = vpop.f32.mrb[27].mxu1  ;;  %4324 = vmatmul.mubr.bf16.gmra.mrb[84].mxu0 %v3801_v23  ;;  %v3701_v53 = vmax.f32 %v6347_v32, 0.0  ;;  %v3703_v54 = vmax.f32 %v6411_v34, 0.0  ;;  %v7552_v40 = vld [vmem:[%s9500_s3 + $0x1e4] ss:$8 sps:$4 sm:$0xff]  }
 0x2c9   :  { %v6350_v48 = vadd.f32 %v2788_v45, %v8801_v59  ;;  %v6414_v49 = vadd.f32 %v3560_v47, %v8803_v60  ;;  %4455 = vmatpush1.bf16.msra.mxu0 %v7538_v30  ;;  %v3702_v1 = vmax.f32 %v6348_v38, 0.0  ;;  %v3704_v2 = vmax.f32 %v6412_v39, 0.0 }
 0x2ca   :  { %v3705_v56 = vmax.f32 %v6349_v42, 0.0  ;;  %v3707_v62 = vmax.f32 %v6413_v43, 0.0  ;;  %4456 = vmatprep.subr.bf16.mxu0 %v7543_v37 }
 0x2cb   :  { %v3706_v3 = vmax.f32 %v6350_v48, 0.0  ;;  %v3708_v4 = vmax.f32 %v6414_v49, 0.0 }
 0x2cc   :  { %v3805_v5 = vpack.c.bf16 %v3705_v56, %v3701_v53  ;;  %v8957_v6 = vpack.c.bf16 %v3707_v62, %v3703_v54  ;;  %v7550_v56 = vld [vmem:[%s9500_s3 + $0x1e0] ss:$8 sps:$4 sm:$0xff]  }
 0x2cd   :  { %v3806_v7 = vpack.c.bf16 %v3706_v3, %v3702_v1  ;;  %v8959_v9 = vpack.c.bf16 %v3708_v4, %v3704_v2  ;;  %v2792_v11 = vpop.f32.mrb[28].mxu0  ;;  %v3564_v12 = vpop.f32.mrb[28].mxu1  ;;  %4457 = vmatpush1.bf16.msra.mxu0 %v7541_v50  ;;  %v7555_v3 = vld [vmem:[%s9500_s3 + $0x1f4] ss:$8 sps:$4 sm:$0xff]  }
 0x2ce   :  { %v6351_v14 = vadd.f32 %v2792_v11, %v8795_v57  ;;  %v6415_v15 = vadd.f32 %v3564_v12, %v8797_v58  ;;  %v2794_v16 = vpop.f32.mrb[29].mxu0  ;;  %v3566_v17 = vpop.f32.mrb[29].mxu1  ;;  %4458 = vmatprep.subr.bf16.mxu0 %v7546_v0 }
 0x2cf   :  { %v6352_v19 = vadd.f32 %v2794_v16, %v8801_v59  ;;  %v6416_v20 = vadd.f32 %v3566_v17, %v8803_v60  ;;  %v2796_v21 = vpop.f32.mrb[30].mxu0  ;;  %v3568_v23 = vpop.f32.mrb[30].mxu1  ;;  %4333 = vmatprep.mubr.bf16.mxu0 %v3806_v7 }
 0x2d0   :  { %v6353_v26 = vadd.f32 %v2796_v21, %v8795_v57  ;;  %v6417_v28 = vadd.f32 %v3568_v23, %v8797_v58  ;;  %v2798_v29 = vpop.f32.mrb[31].mxu0  ;;  %v3570_v30 = vpop.f32.mrb[31].mxu1  ;;  %4334 = vmatmul.mubr.bf16.gmra.mrb[88].mxu0 %v3805_v5  ;;  %v3709_v36 = vmax.f32 %v6351_v14, 0.0  ;;  %v3711_v37 = vmax.f32 %v6415_v15, 0.0 }
 0x2d1   :  { %v6354_v32 = vadd.f32 %v2798_v29, %v8801_v59  ;;  %v6418_v34 = vadd.f32 %v3570_v30, %v8803_v60  ;;  %4459 = vmatpush1.bf16.msra.mxu0 %v7544_v13  ;;  %v3710_v41 = vmax.f32 %v6352_v19, 0.0  ;;  %v3712_v42 = vmax.f32 %v6416_v20, 0.0 }
 0x2d2   :  { %v3713_v38 = vmax.f32 %v6353_v26, 0.0  ;;  %v3715_v39 = vmax.f32 %v6417_v28, 0.0  ;;  %4460 = vmatprep.subr.bf16.mxu0 %v7549_v18  ;;  %v7553_v18 = vld [vmem:[%s9500_s3 + $0x1f0] ss:$8 sps:$4 sm:$0xff]  }
 0x2d3   :  { %v3714_v43 = vmax.f32 %v6354_v32, 0.0  ;;  %v3716_v45 = vmax.f32 %v6418_v34, 0.0 }
 0x2d4   :  { %v3809_v47 = vpack.c.bf16 %v3713_v38, %v3709_v36  ;;  %v8981_v48 = vpack.c.bf16 %v3715_v39, %v3711_v37 }
 0x2d5   :  { %v3810_v49 = vpack.c.bf16 %v3714_v43, %v3710_v41  ;;  %v8983_v50 = vpack.c.bf16 %v3716_v45, %v3712_v42  ;;  %v2802_v53 = vpop.f32.mrb[32].mxu0  ;;  %v3574_v54 = vpop.f32.mrb[32].mxu1  ;;  %4461 = vmatpush1.bf16.msra.mxu0 %v7547_v35 }
 0x2d6   :  { %v6355_v62 = vadd.f32 %v2802_v53, %v8795_v57  ;;  %v6419_v0 = vadd.f32 %v3574_v54, %v8797_v58  ;;  %v2804_v1 = vpop.f32.mrb[33].mxu0  ;;  %v3576_v2 = vpop.f32.mrb[33].mxu1  ;;  %4462 = vmatprep.subr.bf16.mxu0 %v7552_v40 }
 0x2d7   :  { %v6356_v4 = vadd.f32 %v2804_v1, %v8801_v59  ;;  %v6420_v5 = vadd.f32 %v3576_v2, %v8803_v60  ;;  %v2806_v7 = vpop.f32.mrb[34].mxu0  ;;  %v3578_v11 = vpop.f32.mrb[34].mxu1  ;;  %4343 = vmatprep.mubr.bf16.mxu0 %v3810_v49 }
 0x2d8   :  { %v6357_v12 = vadd.f32 %v2806_v7, %v8795_v57  ;;  %v6421_v13 = vadd.f32 %v3578_v11, %v8797_v58  ;;  %v2808_v14 = vpop.f32.mrb[35].mxu0  ;;  %v3580_v15 = vpop.f32.mrb[35].mxu1  ;;  %4344 = vmatmul.mubr.bf16.gmra.mrb[92].mxu0 %v3809_v47  ;;  %v3717_v19 = vmax.f32 %v6355_v62, 0.0  ;;  %v3719_v20 = vmax.f32 %v6419_v0, 0.0 }
 0x2d9   :  { %v6358_v16 = vadd.f32 %v2808_v14, %v8801_v59  ;;  %v6422_v17 = vadd.f32 %v3580_v15, %v8803_v60  ;;  %4463 = vmatpush1.bf16.msra.mxu0 %v7550_v56  ;;  %v3718_v26 = vmax.f32 %v6356_v4, 0.0  ;;  %v3720_v28 = vmax.f32 %v6420_v5, 0.0 }
 0x2da   :  { %v3721_v21 = vmax.f32 %v6357_v12, 0.0  ;;  %v3723_v23 = vmax.f32 %v6421_v13, 0.0  ;;  %4464 = vmatprep.subr.bf16.mxu0 %v7555_v3 }
 0x2db   :  { %v3722_v29 = vmax.f32 %v6358_v16, 0.0  ;;  %v3724_v30 = vmax.f32 %v6422_v17, 0.0 }
 0x2dc   :  { %v3813_v32 = vpack.c.bf16 %v3721_v21, %v3717_v19  ;;  %v9002_v34 = vpack.c.bf16 %v3723_v23, %v3719_v20 }
 0x2dd   :  { %v3814_v35 = vpack.c.bf16 %v3722_v29, %v3718_v26  ;;  %v9004_v36 = vpack.c.bf16 %v3724_v30, %v3720_v28  ;;  %v2812_v37 = vpop.f32.mrb[36].mxu0  ;;  %v3584_v38 = vpop.f32.mrb[36].mxu1  ;;  %4465 = vmatpush1.bf16.msra.mxu0 %v7553_v18 }
 0x2de   :  { %v6359_v39 = vadd.f32 %v2812_v37, %v8795_v57  ;;  %v6423_v40 = vadd.f32 %v3584_v38, %v8797_v58  ;;  %v2814_v41 = vpop.f32.mrb[37].mxu0  ;;  %v3586_v42 = vpop.f32.mrb[37].mxu1 }
 0x2df   :  { %v6360_v43 = vadd.f32 %v2814_v41, %v8801_v59  ;;  %v6424_v45 = vadd.f32 %v3586_v42, %v8803_v60  ;;  %v2816_v47 = vpop.f32.mrb[38].mxu0  ;;  %v3588_v49 = vpop.f32.mrb[38].mxu1  ;;  %4353 = vmatprep.mubr.bf16.mxu0 %v3814_v35 }
 0x2e0   :  { %v6361_v53 = vadd.f32 %v2816_v47, %v8795_v57  ;;  %v6425_v54 = vadd.f32 %v3588_v49, %v8797_v58  ;;  %v2818_v56 = vpop.f32.mrb[39].mxu0  ;;  %v3590_v62 = vpop.f32.mrb[39].mxu1  ;;  %4354 = vmatmul.mubr.bf16.gmra.mrb[96].mxu0 %v3813_v32  ;;  %v3725_v2 = vmax.f32 %v6359_v39, 0.0  ;;  %v3727_v3 = vmax.f32 %v6423_v40, 0.0 }
 0x2e1   :  { %v6362_v0 = vadd.f32 %v2818_v56, %v8801_v59  ;;  %v6426_v1 = vadd.f32 %v3590_v62, %v8803_v60  ;;  %v3726_v7 = vmax.f32 %v6360_v43, 0.0  ;;  %v3728_v11 = vmax.f32 %v6424_v45, 0.0 }
 0x2e2   :  { %v3729_v4 = vmax.f32 %v6361_v53, 0.0  ;;  %v3731_v5 = vmax.f32 %v6425_v54, 0.0 }
 0x2e3   :  { %v3730_v12 = vmax.f32 %v6362_v0, 0.0  ;;  %v3732_v13 = vmax.f32 %v6426_v1, 0.0 }
 0x2e4   :  { %v3817_v14 = vpack.c.bf16 %v3729_v4, %v3725_v2  ;;  %v9014_v15 = vpack.c.bf16 %v3731_v5, %v3727_v3 }
 0x2e5   :  { %v3818_v16 = vpack.c.bf16 %v3730_v12, %v3726_v7  ;;  %v9016_v17 = vpack.c.bf16 %v3732_v13, %v3728_v11  ;;  %v2822_v18 = vpop.f32.mrb[40].mxu0  ;;  %v3594_v19 = vpop.f32.mrb[40].mxu1 }
 0x2e6   :  { %v6363_v20 = vadd.f32 %v2822_v18, %v8795_v57  ;;  %v6427_v21 = vadd.f32 %v3594_v19, %v8797_v58  ;;  %v2824_v23 = vpop.f32.mrb[41].mxu0  ;;  %v3596_v26 = vpop.f32.mrb[41].mxu1 }
 0x2e7   :  { %v6364_v28 = vadd.f32 %v2824_v23, %v8801_v59  ;;  %v6428_v29 = vadd.f32 %v3596_v26, %v8803_v60  ;;  %v2826_v30 = vpop.f32.mrb[42].mxu0  ;;  %v3598_v32 = vpop.f32.mrb[42].mxu1  ;;  %4363 = vmatprep.mubr.bf16.mxu0 %v3818_v16 }
 0x2e8   :  { %v6365_v35 = vadd.f32 %v2826_v30, %v8795_v57  ;;  %v6429_v37 = vadd.f32 %v3598_v32, %v8797_v58  ;;  %v2828_v38 = vpop.f32.mrb[43].mxu0  ;;  %v3600_v39 = vpop.f32.mrb[43].mxu1  ;;  %4364 = vmatmul.mubr.bf16.gmra.mrb[100].mxu0 %v3817_v14  ;;  %v3733_v42 = vmax.f32 %v6363_v20, 0.0  ;;  %v3735_v43 = vmax.f32 %v6427_v21, 0.0 }
 0x2e9   :  { %v6366_v40 = vadd.f32 %v2828_v38, %v8801_v59  ;;  %v6430_v41 = vadd.f32 %v3600_v39, %v8803_v60  ;;  %v3734_v49 = vmax.f32 %v6364_v28, 0.0  ;;  %v3736_v53 = vmax.f32 %v6428_v29, 0.0 }
 0x2ea   :  { %v3737_v45 = vmax.f32 %v6365_v35, 0.0  ;;  %v3739_v47 = vmax.f32 %v6429_v37, 0.0 }
 0x2eb   :  { %v3738_v54 = vmax.f32 %v6366_v40, 0.0  ;;  %v3740_v56 = vmax.f32 %v6430_v41, 0.0 }
 0x2ec   :  { %v3821_v62 = vpack.c.bf16 %v3737_v45, %v3733_v42  ;;  %v9026_v0 = vpack.c.bf16 %v3739_v47, %v3735_v43 }
 0x2ed   :  { %v3822_v1 = vpack.c.bf16 %v3738_v54, %v3734_v49  ;;  %v9028_v2 = vpack.c.bf16 %v3740_v56, %v3736_v53  ;;  %v2832_v3 = vpop.f32.mrb[44].mxu0  ;;  %v3604_v4 = vpop.f32.mrb[44].mxu1 }
 0x2ee   :  { %v6367_v5 = vadd.f32 %v2832_v3, %v8795_v57  ;;  %v6431_v7 = vadd.f32 %v3604_v4, %v8797_v58  ;;  %v2834_v11 = vpop.f32.mrb[45].mxu0  ;;  %v3606_v12 = vpop.f32.mrb[45].mxu1 }
 0x2ef   :  { %v6368_v13 = vadd.f32 %v2834_v11, %v8801_v59  ;;  %v6432_v14 = vadd.f32 %v3606_v12, %v8803_v60  ;;  %v2836_v16 = vpop.f32.mrb[46].mxu0  ;;  %v3608_v18 = vpop.f32.mrb[46].mxu1  ;;  %4373 = vmatprep.mubr.bf16.mxu0 %v3822_v1 }
 0x2f0   :  { %v6369_v19 = vadd.f32 %v2836_v16, %v8795_v57  ;;  %v6433_v20 = vadd.f32 %v3608_v18, %v8797_v58  ;;  %v2838_v21 = vpop.f32.mrb[47].mxu0  ;;  %v3610_v23 = vpop.f32.mrb[47].mxu1  ;;  %4374 = vmatmul.mubr.bf16.gmra.mrb[104].mxu0 %v3821_v62  ;;  %v3741_v29 = vmax.f32 %v6367_v5, 0.0  ;;  %v3743_v30 = vmax.f32 %v6431_v7, 0.0 }
 0x2f1   :  { %v6370_v26 = vadd.f32 %v2838_v21, %v8801_v59  ;;  %v6434_v28 = vadd.f32 %v3610_v23, %v8803_v60  ;;  %v3742_v37 = vmax.f32 %v6368_v13, 0.0  ;;  %v3744_v38 = vmax.f32 %v6432_v14, 0.0 }
 0x2f2   :  { %v3745_v32 = vmax.f32 %v6369_v19, 0.0  ;;  %v3747_v35 = vmax.f32 %v6433_v20, 0.0 }
 0x2f3   :  { %v3746_v39 = vmax.f32 %v6370_v26, 0.0  ;;  %v3748_v40 = vmax.f32 %v6434_v28, 0.0 }
 0x2f4   :  { %v3825_v41 = vpack.c.bf16 %v3745_v32, %v3741_v29  ;;  %v9038_v42 = vpack.c.bf16 %v3747_v35, %v3743_v30  ;;  %v7556_v30 = vld [vmem:[%s9502_s5 + $0x40] sm:$0xff]  }
 0x2f5   :  { %v3826_v43 = vpack.c.bf16 %v3746_v39, %v3742_v37  ;;  %v9040_v45 = vpack.c.bf16 %v3748_v40, %v3744_v38  ;;  %v2842_v47 = vpop.f32.mrb[48].mxu0  ;;  %v3614_v49 = vpop.f32.mrb[48].mxu1  ;;  %v7557_v32 = vld [vmem:[%s9502_s5] sm:$0xff]   ;;  %6079 = vmatprep.subr.bf16.mxu1 %v7556_v30 }
 0x2f6   :  { %v6371_v53 = vadd.f32 %v2842_v47, %v8795_v57  ;;  %v6435_v54 = vadd.f32 %v3614_v49, %v8797_v58  ;;  %v2844_v56 = vpop.f32.mrb[49].mxu0  ;;  %v3616_v62 = vpop.f32.mrb[49].mxu1  ;;  %6080 = vmatpush3.bf16.msra.mxu1 %v7557_v32 }
 0x2f7   :  { %v6372_v1 = vadd.f32 %v2844_v56, %v8801_v59  ;;  %v6436_v3 = vadd.f32 %v3616_v62, %v8803_v60  ;;  %v2846_v4 = vpop.f32.mrb[50].mxu0  ;;  %v3618_v5 = vpop.f32.mrb[50].mxu1  ;;  %4383 = vmatprep.mubr.bf16.mxu0 %v3826_v43 }
 0x2f8   :  { %v3749_v7 = vmax.f32 %v6371_v53, 0.0  ;;  %v3751_v11 = vmax.f32 %v6435_v54, 0.0  ;;  %v6373_v12 = vadd.f32 %v2846_v4, %v8795_v57  ;;  %v6437_v13 = vadd.f32 %v3618_v5, %v8797_v58  ;;  %v2848_v14 = vpop.f32.mrb[51].mxu0  ;;  %v3620_v16 = vpop.f32.mrb[51].mxu1  ;;  %4384 = vmatmul.mubr.bf16.gmra.mrb[108].mxu0 %v3825_v41 }
 0x2f9   :  { %v3750_v18 = vmax.f32 %v6372_v1, 0.0  ;;  %v3752_v19 = vmax.f32 %v6436_v3, 0.0  ;;  %v6374_v20 = vadd.f32 %v2848_v14, %v8801_v59  ;;  %v6438_v21 = vadd.f32 %v3620_v16, %v8803_v60 }
 0x2fa   :  { %v3753_v23 = vmax.f32 %v6373_v12, 0.0  ;;  %v3755_v26 = vmax.f32 %v6437_v13, 0.0 }
 0x2fb   :  { %v3754_v28 = vmax.f32 %v6374_v20, 0.0  ;;  %v3756_v29 = vmax.f32 %v6438_v21, 0.0 }
 0x2fc   :  { %v3829_v35 = vpack.c.bf16 %v3753_v23, %v3749_v7  ;;  %v9056_v37 = vpack.c.bf16 %v3755_v26, %v3751_v11 }
 0x2fd   :  { %v3830_v38 = vpack.c.bf16 %v3754_v28, %v3750_v18  ;;  %v9058_v39 = vpack.c.bf16 %v3756_v29, %v3752_v19  ;;  %v2852_v40 = vpop.f32.mrb[52].mxu0  ;;  %v3624_v41 = vpop.f32.mrb[52].mxu1 }
 0x2fe   :  { %v6375_v43 = vadd.f32 %v2852_v40, %v8795_v57  ;;  %v6439_v47 = vadd.f32 %v3624_v41, %v8797_v58  ;;  %v2854_v49 = vpop.f32.mrb[53].mxu0  ;;  %v3626_v53 = vpop.f32.mrb[53].mxu1 }
 0x2ff   :  { %v6376_v54 = vadd.f32 %v2854_v49, %v8801_v59  ;;  %v6440_v56 = vadd.f32 %v3626_v53, %v8803_v60  ;;  %v2856_v62 = vpop.f32.mrb[54].mxu0  ;;  %v3628_v1 = vpop.f32.mrb[54].mxu1  ;;  %4393 = vmatprep.mubr.bf16.mxu0 %v3830_v38 }
 0x300   :  { %v3757_v3 = vmax.f32 %v6375_v43, 0.0  ;;  %v3759_v4 = vmax.f32 %v6439_v47, 0.0  ;;  %v6377_v5 = vadd.f32 %v2856_v62, %v8795_v57  ;;  %v6441_v7 = vadd.f32 %v3628_v1, %v8797_v58  ;;  %v2858_v11 = vpop.f32.mrb[55].mxu0  ;;  %v3630_v12 = vpop.f32.mrb[55].mxu1  ;;  %4394 = vmatmul.mubr.bf16.gmra.mrb[112].mxu0 %v3829_v35 }
 0x301   :  { %v3758_v13 = vmax.f32 %v6376_v54, 0.0  ;;  %v3760_v14 = vmax.f32 %v6440_v56, 0.0  ;;  %v6378_v16 = vadd.f32 %v2858_v11, %v8801_v59  ;;  %v6442_v18 = vadd.f32 %v3630_v12, %v8803_v60  ;;  %v7558_v12 = vld [vmem:[%s9502_s5 + $0x48] sm:$0xff]  }
 0x302   :  { %v3761_v19 = vmax.f32 %v6377_v5, 0.0  ;;  %v3763_v20 = vmax.f32 %v6441_v7, 0.0  ;;  %6081 = vmatprep.subr.bf16.mxu1 %v7558_v12 }
 0x303   :  { %v3762_v21 = vmax.f32 %v6378_v16, 0.0  ;;  %v3764_v23 = vmax.f32 %v6442_v18, 0.0 }
 0x304   :  { %v3833_v26 = vpack.c.bf16 %v3761_v19, %v3757_v3  ;;  %v9068_v28 = vpack.c.bf16 %v3763_v20, %v3759_v4 }
 0x305   :  { %v3834_v29 = vpack.c.bf16 %v3762_v21, %v3758_v13  ;;  %v9070_v30 = vpack.c.bf16 %v3764_v23, %v3760_v14  ;;  %v2862_v32 = vpop.f32.mrb[56].mxu0  ;;  %v3634_v38 = vpop.f32.mrb[56].mxu1  ;;  %v7559_v13 = vld [vmem:[%s9502_s5 + $0x8] sm:$0xff]  }
 0x306   :  { %v6379_v35 = vadd.f32 %v2862_v32, %v8795_v57  ;;  %v6443_v40 = vadd.f32 %v3634_v38, %v8797_v58  ;;  %v2864_v41 = vpop.f32.mrb[57].mxu0  ;;  %v3636_v43 = vpop.f32.mrb[57].mxu1  ;;  %6082 = vmatpush3.bf16.msra.mxu1 %v7559_v13 }
 0x307   :  { %v6380_v47 = vadd.f32 %v2864_v41, %v8801_v59  ;;  %v6444_v49 = vadd.f32 %v3636_v43, %v8803_v60  ;;  %v2866_v53 = vpop.f32.mrb[58].mxu0  ;;  %v3638_v54 = vpop.f32.mrb[58].mxu1  ;;  %4403 = vmatprep.mubr.bf16.mxu0 %v3834_v29 }
 0x308   :  { %v6381_v56 = vadd.f32 %v2866_v53, %v8795_v57  ;;  %v6445_v62 = vadd.f32 %v3638_v54, %v8797_v58  ;;  %v2868_v1 = vpop.f32.mrb[59].mxu0  ;;  %v3640_v3 = vpop.f32.mrb[59].mxu1  ;;  %4404 = vmatmul.mubr.bf16.gmra.mrb[116].mxu0 %v3833_v26  ;;  %v3765_v4 = vmax.f32 %v6379_v35, 0.0  ;;  %v3767_v5 = vmax.f32 %v6443_v40, 0.0 }
 0x309   :  { %v6382_v7 = vadd.f32 %v2868_v1, %v8801_v59  ;;  %v6446_v11 = vadd.f32 %v3640_v3, %v8803_v60  ;;  %v3766_v18 = vmax.f32 %v6380_v47, 0.0  ;;  %v3768_v19 = vmax.f32 %v6444_v49, 0.0 }
 0x30a   :  { %v3769_v14 = vmax.f32 %v6381_v56, 0.0  ;;  %v3771_v16 = vmax.f32 %v6445_v62, 0.0 }
 0x30b   :  { %v3770_v20 = vmax.f32 %v6382_v7, 0.0  ;;  %v3772_v21 = vmax.f32 %v6446_v11, 0.0 }
 0x30c   :  { %v3837_v23 = vpack.c.bf16 %v3769_v14, %v3765_v4  ;;  %v9086_v26 = vpack.c.bf16 %v3771_v16, %v3767_v5 }
 0x30d   :  { %v3838_v29 = vpack.c.bf16 %v3770_v20, %v3766_v18  ;;  %v9088_v32 = vpack.c.bf16 %v3772_v21, %v3768_v19  ;;  %v2872_v38 = vpop.f32.mrb[60].mxu0  ;;  %v3644_v35 = vpop.f32.mrb[60].mxu1 }
 0x30e   :  { %v6383_v40 = vadd.f32 %v2872_v38, %v8795_v57  ;;  %v6447_v41 = vadd.f32 %v3644_v35, %v8797_v58  ;;  %v2874_v43 = vpop.f32.mrb[61].mxu0  ;;  %v3646_v53 = vpop.f32.mrb[61].mxu1  ;;  %v7564_v35 = vld [vmem:[%s9502_s5 + $0x60] sm:$0xff]  }
 0x30f   :  { %v6384_v47 = vadd.f32 %v2874_v43, %v8801_v59  ;;  %v6448_v49 = vadd.f32 %v3646_v53, %v8803_v60  ;;  %v2876_v54 = vpop.f32.mrb[62].mxu0  ;;  %v3648_v56 = vpop.f32.mrb[62].mxu1  ;;  %4413 = vmatprep.mubr.bf16.mxu0 %v3838_v29  ;;  %v7568_v43 = vld [vmem:[%s9502_s5 + $0x70] sm:$0xff]   ;;  %v7571_v53 = vld [vmem:[%s9502_s5 + $0x38] sm:$0xff]  }
 0x310   :  { %v6385_v62 = vadd.f32 %v2876_v54, %v8795_v57  ;;  %v6449_v1 = vadd.f32 %v3648_v56, %v8797_v58  ;;  %v2878_v3 = vpop.f32.mrb[63].mxu0  ;;  %v3650_v4 = vpop.f32.mrb[63].mxu1  ;;  %4414 = vmatmul.mubr.bf16.gmra.mrb[120].mxu0 %v3837_v23  ;;  %v3773_v11 = vmax.f32 %v6383_v40, 0.0  ;;  %v3775_v12 = vmax.f32 %v6447_v41, 0.0  ;;  %v7560_v58 = vld [vmem:[%s9502_s5 + $0x50] sm:$0xff]   ;;  %v7563_v23 = vld [vmem:[%s9502_s5 + $0x18] sm:$0xff]  }
 0x311   :  { %v6386_v5 = vadd.f32 %v2878_v3, %v8801_v59  ;;  %v6450_v7 = vadd.f32 %v3650_v4, %v8803_v60  ;;  %v3774_v16 = vmax.f32 %v6384_v47, 0.0  ;;  %v3776_v18 = vmax.f32 %v6448_v49, 0.0  ;;  %v7561_v59 = vld [vmem:[%s9502_s5 + $0x10] sm:$0xff]   ;;  %v7562_v60 = vld [vmem:[%s9502_s5 + $0x58] sm:$0xff]   ;;  %6083 = vmatprep.subr.bf16.mxu1 %v7560_v58  ;;  %v7565_v40 = vld [vmem:[%s9502_s5 + $0x20] sm:$0xff]  }
 0x312   :  { %v3777_v13 = vmax.f32 %v6385_v62, 0.0  ;;  %v3779_v14 = vmax.f32 %v6449_v1, 0.0  ;;  %6084 = vmatpush3.bf16.msra.mxu1 %v7561_v59  ;;  %v7567_v41 = vld [vmem:[%s9502_s5 + $0x28] sm:$0xff]   ;;  %v7575_v4 = vld [vmem:[%s9504_s7 + $0x18] sm:$0xff]  }
 0x313   :  { %v3778_v19 = vmax.f32 %v6386_v5, 0.0  ;;  %v3780_v20 = vmax.f32 %v6450_v7, 0.0  ;;  %6085 = vmatprep.subr.bf16.mxu1 %v7562_v60 }
 0x314   :  { %v3841_v21 = vpack.c.bf16 %v3777_v13, %v3773_v11  ;;  %v3843_v29 = vpack.c.bf16 %v3779_v14, %v3775_v12 }
 0x315   :  { %v3842_v57 = vpack.c.bf16 %v3778_v19, %v3774_v16  ;;  %v3844_v38 = vpack.c.bf16 %v3780_v20, %v3776_v18 }
 0x316   :  { %6086 = vmatpush3.bf16.msra.mxu1 %v7563_v23 }
 0x317   :  { %4423 = vmatprep.mubr.bf16.mxu0 %v3842_v57  ;;  %6087 = vmatprep.subr.bf16.mxu1 %v7564_v35 }
 0x318   :  { %4424 = vmatmul.mubr.bf16.gmra.mrb[124].mxu0 %v3841_v21 }
 0x319   :  { %4466 = vmatprep.mubr.bf16.mxu0 %v8815_v24  ;;  %v7566_v24 = vld [vmem:[%s9502_s5 + $0x68] sm:$0xff]  }
 0x31a   :  { %6088 = vmatpush3.bf16.msra.mxu1 %v7565_v40 }
 0x31b   :  { %6089 = vmatprep.subr.bf16.mxu1 %v7566_v24 }
 0x31e   :  { %6090 = vmatpush3.bf16.msra.mxu1 %v7567_v41 }
 0x31f   :  { %6091 = vmatprep.subr.bf16.mxu1 %v7568_v43 }
 0x320   :  { %4467 = vmatmul.mubr.bf16.vlgmr.msra.gmra.mrb[64].mxu0 %v8813_v22  ;;  %v7569_v22 = vld [vmem:[%s9502_s5 + $0x30] sm:$0xff]  }
 0x321   :  { %4476 = vmatprep.mubr.bf16.mxu0 %v8839_v63  ;;  %v7570_v63 = vld [vmem:[%s9502_s5 + $0x78] sm:$0xff]  }
 0x322   :  { %6092 = vmatpush3.bf16.msra.mxu1 %v7569_v22 }
 0x323   :  { %6093 = vmatprep.subr.bf16.mxu1 %v7570_v63 }
 0x326   :  { %6094 = vmatpush3.bf16.msra.mxu1 %v7571_v53 }
 0x328   :  { %4477 = vmatmul.mubr.bf16.gmra.mrb[68].mxu0 %v8837_v61  ;;  %v3909_v61 = vld [vmem:[%s9503_s4] sm:$0x3] }
 0x329   :  { %4486 = vmatprep.mubr.bf16.mxu0 %v8863_v33  ;;  %v9173_v33 = vrot.slane %v3909_v61, %v399_v55 }
 0x330   :  { %4487 = vmatmul.mubr.bf16.gmra.mrb[72].mxu0 %v8861_v31  ;;  %v9169_v31 = vrot.slane %v3909_v61, %v395_v52  ;;  %v7572_v52 = vld [vmem:[%s9504_s7] sm:$0xff]  }
 0x331   :  { %4496 = vmatprep.mubr.bf16.mxu0 %v8887_v10  ;;  %6235 = vmatprep.subr.bf16.mxu1 %v7572_v52 }
 0x338   :  { %4497 = vmatmul.mubr.bf16.gmra.mrb[76].mxu0 %v8885_v8 }
 0x339   :  { %4506 = vmatprep.mubr.bf16.mxu0 %v8911_v46 }
 0x340   :  { %4507 = vmatmul.mubr.bf16.gmra.mrb[80].mxu0 %v8909_v44 }
 0x341   :  { %4516 = vmatprep.mubr.bf16.mxu0 %v8935_v27 }
 0x348   :  { %4517 = vmatmul.mubr.bf16.gmra.mrb[84].mxu0 %v8933_v25 }
 0x349   :  { %4526 = vmatprep.mubr.bf16.mxu0 %v8959_v9 }
 0x350   :  { %4527 = vmatmul.mubr.bf16.gmra.mrb[88].mxu0 %v8957_v6 }
 0x351   :  { %4536 = vmatprep.mubr.bf16.mxu0 %v8983_v50 }
 0x358   :  { %4537 = vmatmul.mubr.bf16.gmra.mrb[92].mxu0 %v8981_v48 }
 0x359   :  { %4546 = vmatprep.mubr.bf16.mxu0 %v9004_v36 }
 0x360   :  { %4547 = vmatmul.mubr.bf16.gmra.mrb[96].mxu0 %v9002_v34 }
 0x361   :  { %4556 = vmatprep.mubr.bf16.mxu0 %v9016_v17 }
 0x368   :  { %4557 = vmatmul.mubr.bf16.gmra.mrb[100].mxu0 %v9014_v15 }
 0x369   :  { %4566 = vmatprep.mubr.bf16.mxu0 %v9028_v2  ;;  %v7573_v2 = vld [vmem:[%s9504_s7 + $0x8] sm:$0xff]  }
 0x370   :  { %4567 = vmatmul.mubr.bf16.gmra.mrb[104].mxu0 %v9026_v0 }
 0x371   :  { %4576 = vmatprep.mubr.bf16.mxu0 %v9040_v45 }
 0x378   :  { %4577 = vmatmul.mubr.bf16.gmra.mrb[108].mxu0 %v9038_v42 }
 0x379   :  { %4586 = vmatprep.mubr.bf16.mxu0 %v9058_v39 }
 0x380   :  { %4587 = vmatmul.mubr.bf16.gmra.mrb[112].mxu0 %v9056_v37 }
 0x381   :  { %4596 = vmatprep.mubr.bf16.mxu0 %v9070_v30 }
 0x388   :  { %4597 = vmatmul.mubr.bf16.gmra.mrb[116].mxu0 %v9068_v28 }
 0x389   :  { %4606 = vmatprep.mubr.bf16.mxu0 %v9088_v32  ;;  %v7574_v32 = vld [vmem:[%s9504_s7 + $0x10] sm:$0xff]  }
 0x390   :  { %4607 = vmatmul.mubr.bf16.gmra.mrb[120].mxu0 %v9086_v26 }
 0x391   :  { %4616 = vmatprep.mubr.bf16.mxu0 %v3844_v38 }
 0x398   :  { %4617 = vmatmul.mubr.bf16.gmra.mrb[124].mxu0 %v3843_v29 }
 0x3f3   :  { %v4468_v8 = vpop.f32.mrb[64].mxu0 }
 0x3f4   :  { %v6451_v10 = vadd.f32 %v4468_v8, %v9169_v31  ;;  %v4470_v44 = vpop.f32.mrb[65].mxu0 }
 0x3f5   :  { %v6452_v46 = vadd.f32 %v4470_v44, %v9173_v33  ;;  %v4472_v25 = vpop.f32.mrb[66].mxu0 }
 0x3f6   :  { %v6453_v27 = vadd.f32 %v4472_v25, %v9169_v31  ;;  %v4474_v6 = vpop.f32.mrb[67].mxu0  ;;  %v4627_v48 = vmax.f32 %v6451_v10, 0.0 }
 0x3f7   :  { %v6454_v9 = vadd.f32 %v4474_v6, %v9173_v33  ;;  %v4628_v55 = vmax.f32 %v6452_v46, 0.0 }
 0x3f8   :  { %v4629_v51 = vmax.f32 %v6453_v27, 0.0 }
 0x3f9   :  { %v4630_v50 = vmax.f32 %v6454_v9, 0.0 }
 0x3fa   :  { %v4691_v34 = vpack.c.bf16 %v4629_v51, %v4627_v48 }
 0x3fb   :  { %v4692_v36 = vpack.c.bf16 %v4630_v50, %v4628_v55  ;;  %v4478_v15 = vpop.f32.mrb[68].mxu0 }
 0x3fc   :  { %v6455_v17 = vadd.f32 %v4478_v15, %v9169_v31  ;;  %v4480_v0 = vpop.f32.mrb[69].mxu0 }
 0x3fd   :  { %v6456_v42 = vadd.f32 %v4480_v0, %v9173_v33  ;;  %v4482_v45 = vpop.f32.mrb[70].mxu0  ;;  %4890 = vmatprep.mubr.bf16.mxu1 %v4692_v36 }
 0x3fe   :  { %v6457_v37 = vadd.f32 %v4482_v45, %v9169_v31  ;;  %v4484_v39 = vpop.f32.mrb[71].mxu0  ;;  %4891 = vmatmul.mubr.bf16.vlgmr.msra.gmra.mrb[64].mxu1 %v4691_v34  ;;  %v4631_v30 = vmax.f32 %v6455_v17, 0.0 }
 0x3ff   :  { %v6458_v28 = vadd.f32 %v4484_v39, %v9173_v33  ;;  %6236 = vmatpush3.bf16.msra.mxu1 %v7572_v52  ;;  %v4632_v47 = vmax.f32 %v6456_v42, 0.0 }
 0x400   :  { %v4633_v26 = vmax.f32 %v6457_v37, 0.0  ;;  %6237 = vmatprep.subr.bf16.mxu1 %v7573_v2 }
 0x401   :  { %v4634_v49 = vmax.f32 %v6458_v28, 0.0 }
 0x402   :  { %v4693_v54 = vpack.c.bf16 %v4633_v26, %v4631_v30 }
 0x403   :  { %v4694_v56 = vpack.c.bf16 %v4634_v49, %v4632_v47  ;;  %v4488_v62 = vpop.f32.mrb[72].mxu0  ;;  %6238 = vmatpush3.bf16.msra.mxu1 %v7573_v2 }
 0x404   :  { %v6459_v1 = vadd.f32 %v4488_v62, %v9169_v31  ;;  %v4490_v3 = vpop.f32.mrb[73].mxu0  ;;  %6239 = vmatprep.subr.bf16.mxu1 %v7574_v32 }
 0x405   :  { %v6460_v5 = vadd.f32 %v4490_v3, %v9173_v33  ;;  %v4492_v7 = vpop.f32.mrb[74].mxu0  ;;  %4898 = vmatprep.mubr.bf16.mxu1 %v4694_v56 }
 0x406   :  { %v6461_v11 = vadd.f32 %v4492_v7, %v9169_v31  ;;  %v4494_v12 = vpop.f32.mrb[75].mxu0  ;;  %4899 = vmatmul.mubr.bf16.gmra.mrb[68].mxu1 %v4693_v54  ;;  %v4635_v14 = vmax.f32 %v6459_v1, 0.0 }
 0x407   :  { %v6462_v13 = vadd.f32 %v4494_v12, %v9173_v33  ;;  %6240 = vmatpush3.bf16.msra.mxu1 %v7574_v32  ;;  %v4636_v18 = vmax.f32 %v6460_v5, 0.0 }
 0x408   :  { %v4637_v16 = vmax.f32 %v6461_v11, 0.0  ;;  %6241 = vmatprep.subr.bf16.mxu1 %v7575_v4 }
 0x409   :  { %v4638_v19 = vmax.f32 %v6462_v13, 0.0 }
 0x40a   :  { %v4695_v20 = vpack.c.bf16 %v4637_v16, %v4635_v14 }
 0x40b   :  { %v4696_v21 = vpack.c.bf16 %v4638_v19, %v4636_v18  ;;  %v4498_v29 = vpop.f32.mrb[76].mxu0  ;;  %6242 = vmatpush3.bf16.msra.mxu1 %v7575_v4 }
 0x40c   :  { %v6463_v57 = vadd.f32 %v4498_v29, %v9169_v31  ;;  %v4500_v38 = vpop.f32.mrb[77].mxu0 }
 0x40d   :  { %v6464_v58 = vadd.f32 %v4500_v38, %v9173_v33  ;;  %v4502_v59 = vpop.f32.mrb[78].mxu0  ;;  %4906 = vmatprep.mubr.bf16.mxu1 %v4696_v21 }
 0x40e   :  { %v6465_v60 = vadd.f32 %v4502_v59, %v9169_v31  ;;  %v4504_v23 = vpop.f32.mrb[79].mxu0  ;;  %4907 = vmatmul.mubr.bf16.gmra.mrb[72].mxu1 %v4695_v20  ;;  %v4639_v40 = vmax.f32 %v6463_v57, 0.0 }
 0x40f   :  { %v6466_v35 = vadd.f32 %v4504_v23, %v9173_v33  ;;  %v4640_v41 = vmax.f32 %v6464_v58, 0.0 }
 0x410   :  { %v4641_v24 = vmax.f32 %v6465_v60, 0.0 }
 0x411   :  { %v4642_v43 = vmax.f32 %v6466_v35, 0.0 }
 0x412   :  { %v4697_v22 = vpack.c.bf16 %v4641_v24, %v4639_v40 }
 0x413   :  { %v4698_v63 = vpack.c.bf16 %v4642_v43, %v4640_v41  ;;  %v4508_v53 = vpop.f32.mrb[80].mxu0 }
 0x414   :  { %v6467_v61 = vadd.f32 %v4508_v53, %v9169_v31  ;;  %v4510_v8 = vpop.f32.mrb[81].mxu0 }
 0x415   :  { %v6468_v10 = vadd.f32 %v4510_v8, %v9173_v33  ;;  %v4512_v44 = vpop.f32.mrb[82].mxu0  ;;  %4914 = vmatprep.mubr.bf16.mxu1 %v4698_v63 }
 0x416   :  { %v6469_v46 = vadd.f32 %v4512_v44, %v9169_v31  ;;  %v4514_v25 = vpop.f32.mrb[83].mxu0  ;;  %4915 = vmatmul.mubr.bf16.gmra.mrb[76].mxu1 %v4697_v22  ;;  %v4643_v6 = vmax.f32 %v6467_v61, 0.0 }
 0x417   :  { %v6470_v27 = vadd.f32 %v4514_v25, %v9173_v33  ;;  %v4644_v52 = vmax.f32 %v6468_v10, 0.0 }
 0x418   :  { %v4645_v9 = vmax.f32 %v6469_v46, 0.0 }
 0x419   :  { %v4646_v48 = vmax.f32 %v6470_v27, 0.0 }
 0x41a   :  { %v4699_v51 = vpack.c.bf16 %v4645_v9, %v4643_v6 }
 0x41b   :  { %v4700_v55 = vpack.c.bf16 %v4646_v48, %v4644_v52  ;;  %v4518_v50 = vpop.f32.mrb[84].mxu0 }
 0x41c   :  { %v6471_v34 = vadd.f32 %v4518_v50, %v9169_v31  ;;  %v4520_v36 = vpop.f32.mrb[85].mxu0 }
 0x41d   :  { %v6472_v15 = vadd.f32 %v4520_v36, %v9173_v33  ;;  %v4522_v17 = vpop.f32.mrb[86].mxu0  ;;  %4922 = vmatprep.mubr.bf16.mxu1 %v4700_v55 }
 0x41e   :  { %v6473_v0 = vadd.f32 %v4522_v17, %v9169_v31  ;;  %v4524_v2 = vpop.f32.mrb[87].mxu0  ;;  %4923 = vmatmul.mubr.bf16.gmra.mrb[80].mxu1 %v4699_v51  ;;  %v4647_v45 = vmax.f32 %v6471_v34, 0.0 }
 0x41f   :  { %v6474_v42 = vadd.f32 %v4524_v2, %v9173_v33  ;;  %v4648_v39 = vmax.f32 %v6472_v15, 0.0 }
 0x420   :  { %v4649_v37 = vmax.f32 %v6473_v0, 0.0 }
 0x421   :  { %v4650_v28 = vmax.f32 %v6474_v42, 0.0 }
 0x422   :  { %v4701_v30 = vpack.c.bf16 %v4649_v37, %v4647_v45 }
 0x423   :  { %v4702_v26 = vpack.c.bf16 %v4650_v28, %v4648_v39  ;;  %v4528_v32 = vpop.f32.mrb[88].mxu0 }
 0x424   :  { %v6475_v47 = vadd.f32 %v4528_v32, %v9169_v31  ;;  %v4530_v49 = vpop.f32.mrb[89].mxu0 }
 0x425   :  { %v6476_v54 = vadd.f32 %v4530_v49, %v9173_v33  ;;  %v4532_v56 = vpop.f32.mrb[90].mxu0  ;;  %4930 = vmatprep.mubr.bf16.mxu1 %v4702_v26 }
 0x426   :  { %v6477_v62 = vadd.f32 %v4532_v56, %v9169_v31  ;;  %v4534_v1 = vpop.f32.mrb[91].mxu0  ;;  %4931 = vmatmul.mubr.bf16.gmra.mrb[84].mxu1 %v4701_v30  ;;  %v4651_v4 = vmax.f32 %v6475_v47, 0.0 }
 0x427   :  { %v6478_v3 = vadd.f32 %v4534_v1, %v9173_v33  ;;  %v4652_v7 = vmax.f32 %v6476_v54, 0.0 }
 0x428   :  { %v4653_v5 = vmax.f32 %v6477_v62, 0.0 }
 0x429   :  { %v4654_v11 = vmax.f32 %v6478_v3, 0.0 }
 0x42a   :  { %v4703_v12 = vpack.c.bf16 %v4653_v5, %v4651_v4 }
 0x42b   :  { %v4704_v13 = vpack.c.bf16 %v4654_v11, %v4652_v7  ;;  %v4538_v14 = vpop.f32.mrb[92].mxu0 }
 0x42c   :  { %v6479_v16 = vadd.f32 %v4538_v14, %v9169_v31  ;;  %v4540_v18 = vpop.f32.mrb[93].mxu0 }
 0x42d   :  { %v6480_v19 = vadd.f32 %v4540_v18, %v9173_v33  ;;  %v4542_v20 = vpop.f32.mrb[94].mxu0  ;;  %4938 = vmatprep.mubr.bf16.mxu1 %v4704_v13 }
 0x42e   :  { %v6481_v21 = vadd.f32 %v4542_v20, %v9169_v31  ;;  %v4544_v29 = vpop.f32.mrb[95].mxu0  ;;  %4939 = vmatmul.mubr.bf16.gmra.mrb[88].mxu1 %v4703_v12  ;;  %v4655_v38 = vmax.f32 %v6479_v16, 0.0 }
 0x42f   :  { %v6482_v57 = vadd.f32 %v4544_v29, %v9173_v33  ;;  %v4656_v59 = vmax.f32 %v6480_v19, 0.0 }
 0x430   :  { %v4657_v58 = vmax.f32 %v6481_v21, 0.0 }
 0x431   :  { %v4658_v60 = vmax.f32 %v6482_v57, 0.0 }
 0x432   :  { %v4705_v23 = vpack.c.bf16 %v4657_v58, %v4655_v38  ;;  %v7576_v58 = vld [vmem:[%s9504_s7 + $0x20] sm:$0xff]  }
 0x433   :  { %v4706_v35 = vpack.c.bf16 %v4658_v60, %v4656_v59  ;;  %v4548_v40 = vpop.f32.mrb[96].mxu0  ;;  %6243 = vmatprep.subr.bf16.mxu1 %v7576_v58 }
 0x434   :  { %v6483_v24 = vadd.f32 %v4548_v40, %v9169_v31  ;;  %v4550_v41 = vpop.f32.mrb[97].mxu0  ;;  %6244 = vmatpush3.bf16.msra.mxu1 %v7576_v58 }
 0x435   :  { %v6484_v43 = vadd.f32 %v4550_v41, %v9173_v33  ;;  %v4552_v22 = vpop.f32.mrb[98].mxu0  ;;  %4946 = vmatprep.mubr.bf16.mxu1 %v4706_v35 }
 0x436   :  { %v6485_v63 = vadd.f32 %v4552_v22, %v9169_v31  ;;  %v4554_v53 = vpop.f32.mrb[99].mxu0  ;;  %4947 = vmatmul.mubr.bf16.gmra.mrb[92].mxu1 %v4705_v23  ;;  %v4659_v8 = vmax.f32 %v6483_v24, 0.0 }
 0x437   :  { %v6486_v61 = vadd.f32 %v4554_v53, %v9173_v33  ;;  %v4660_v44 = vmax.f32 %v6484_v43, 0.0  ;;  %v7577_v43 = vld [vmem:[%s9504_s7 + $0x28] sm:$0xff]  }
 0x438   :  { %v4661_v10 = vmax.f32 %v6485_v63, 0.0  ;;  %6245 = vmatprep.subr.bf16.mxu1 %v7577_v43 }
 0x439   :  { %v4662_v46 = vmax.f32 %v6486_v61, 0.0  ;;  %6246 = vmatpush3.bf16.msra.mxu1 %v7577_v43 }
 0x43a   :  { %v4707_v25 = vpack.c.bf16 %v4661_v10, %v4659_v8 }
 0x43b   :  { %v4708_v27 = vpack.c.bf16 %v4662_v46, %v4660_v44  ;;  %v4558_v6 = vpop.f32.mrb[100].mxu0  ;;  %v7578_v46 = vld [vmem:[%s9504_s7 + $0x30] sm:$0xff]  }
 0x43c   :  { %v6487_v9 = vadd.f32 %v4558_v6, %v9169_v31  ;;  %v4560_v52 = vpop.f32.mrb[101].mxu0  ;;  %6247 = vmatprep.subr.bf16.mxu1 %v7578_v46 }
 0x43d   :  { %v6488_v48 = vadd.f32 %v4560_v52, %v9173_v33  ;;  %v4562_v51 = vpop.f32.mrb[102].mxu0  ;;  %4954 = vmatprep.mubr.bf16.mxu1 %v4708_v27  ;;  %6248 = vmatpush3.bf16.msra.mxu1 %v7578_v46 }
 0x43e   :  { %v6489_v55 = vadd.f32 %v4562_v51, %v9169_v31  ;;  %v4564_v50 = vpop.f32.mrb[103].mxu0  ;;  %4955 = vmatmul.mubr.bf16.gmra.mrb[96].mxu1 %v4707_v25  ;;  %v4663_v36 = vmax.f32 %v6487_v9, 0.0 }
 0x43f   :  { %v6490_v34 = vadd.f32 %v4564_v50, %v9173_v33  ;;  %v4664_v17 = vmax.f32 %v6488_v48, 0.0 }
 0x440   :  { %v4665_v15 = vmax.f32 %v6489_v55, 0.0  ;;  %v7579_v55 = vld [vmem:[%s9504_s7 + $0x38] sm:$0xff]  }
 0x441   :  { %v4666_v0 = vmax.f32 %v6490_v34, 0.0  ;;  %6249 = vmatprep.subr.bf16.mxu1 %v7579_v55 }
 0x442   :  { %v4709_v2 = vpack.c.bf16 %v4665_v15, %v4663_v36  ;;  %6250 = vmatpush3.bf16.msra.mxu1 %v7579_v55 }
 0x443   :  { %v4710_v42 = vpack.c.bf16 %v4666_v0, %v4664_v17  ;;  %v4568_v45 = vpop.f32.mrb[104].mxu0 }
 0x444   :  { %v6491_v37 = vadd.f32 %v4568_v45, %v9169_v31  ;;  %v4570_v39 = vpop.f32.mrb[105].mxu0 }
 0x445   :  { %v6492_v28 = vadd.f32 %v4570_v39, %v9173_v33  ;;  %v4572_v30 = vpop.f32.mrb[106].mxu0  ;;  %4962 = vmatprep.mubr.bf16.mxu1 %v4710_v42 }
 0x446   :  { %v6493_v26 = vadd.f32 %v4572_v30, %v9169_v31  ;;  %v4574_v32 = vpop.f32.mrb[107].mxu0  ;;  %4963 = vmatmul.mubr.bf16.gmra.mrb[100].mxu1 %v4709_v2  ;;  %v4667_v49 = vmax.f32 %v6491_v37, 0.0 }
 0x447   :  { %v6494_v47 = vadd.f32 %v4574_v32, %v9173_v33  ;;  %v4668_v56 = vmax.f32 %v6492_v28, 0.0 }
 0x448   :  { %v4669_v54 = vmax.f32 %v6493_v26, 0.0 }
 0x449   :  { %v4670_v62 = vmax.f32 %v6494_v47, 0.0 }
 0x44a   :  { %v4711_v1 = vpack.c.bf16 %v4669_v54, %v4667_v49 }
 0x44b   :  { %v4712_v3 = vpack.c.bf16 %v4670_v62, %v4668_v56  ;;  %v4578_v4 = vpop.f32.mrb[108].mxu0 }
 0x44c   :  { %v6495_v5 = vadd.f32 %v4578_v4, %v9169_v31  ;;  %v4580_v7 = vpop.f32.mrb[109].mxu0 }
 0x44d   :  { %v6496_v11 = vadd.f32 %v4580_v7, %v9173_v33  ;;  %v4582_v12 = vpop.f32.mrb[110].mxu0  ;;  %4970 = vmatprep.mubr.bf16.mxu1 %v4712_v3 }
 0x44e   :  { %v6497_v13 = vadd.f32 %v4582_v12, %v9169_v31  ;;  %v4584_v14 = vpop.f32.mrb[111].mxu0  ;;  %4971 = vmatmul.mubr.bf16.gmra.mrb[104].mxu1 %v4711_v1  ;;  %v4671_v18 = vmax.f32 %v6495_v5, 0.0 }
 0x44f   :  { %v6498_v16 = vadd.f32 %v4584_v14, %v9173_v33  ;;  %v4672_v20 = vmax.f32 %v6496_v11, 0.0 }
 0x450   :  { %v4673_v19 = vmax.f32 %v6497_v13, 0.0 }
 0x451   :  { %v4674_v21 = vmax.f32 %v6498_v16, 0.0 }
 0x452   :  { %v4713_v29 = vpack.c.bf16 %v4673_v19, %v4671_v18 }
 0x453   :  { %v4714_v57 = vpack.c.bf16 %v4674_v21, %v4672_v20  ;;  %v4588_v38 = vpop.f32.mrb[112].mxu0 }
 0x454   :  { %v6499_v59 = vadd.f32 %v4588_v38, %v9169_v31  ;;  %v4590_v60 = vpop.f32.mrb[113].mxu0 }
 0x455   :  { %v6500_v23 = vadd.f32 %v4590_v60, %v9173_v33  ;;  %v4592_v35 = vpop.f32.mrb[114].mxu0  ;;  %4978 = vmatprep.mubr.bf16.mxu1 %v4714_v57  ;;  %v9266_v57 = vld [vmem:[%s9505_s6] ss:$0 sm:$0xff] }
 0x456   :  { %v6501_v40 = vadd.f32 %v4592_v35, %v9169_v31  ;;  %v4594_v24 = vpop.f32.mrb[115].mxu0  ;;  %4979 = vmatmul.mubr.bf16.gmra.mrb[108].mxu1 %v4713_v29  ;;  %v4675_v22 = vmax.f32 %v6499_v59, 0.0 }
 0x457   :  { %v6502_v41 = vadd.f32 %v4594_v24, %v9173_v33  ;;  %v4676_v53 = vmax.f32 %v6500_v23, 0.0  ;;  %v7580_v23 = vld [vmem:[%s9506_s9] sm:$0xff]  }
 0x458   :  { %v4677_v63 = vmax.f32 %v6501_v40, 0.0  ;;  %6283 = vmatprep.subr.bf16.mxu1 %v7580_v23 }
 0x459   :  { %v4678_v61 = vmax.f32 %v6502_v41, 0.0 }
 0x45a   :  { %v4715_v8 = vpack.c.bf16 %v4677_v63, %v4675_v22 }
 0x45b   :  { %v4716_v10 = vpack.c.bf16 %v4678_v61, %v4676_v53  ;;  %v4598_v44 = vpop.f32.mrb[116].mxu0 }
 0x45c   :  { %v6503_v25 = vadd.f32 %v4598_v44, %v9169_v31  ;;  %v4600_v27 = vpop.f32.mrb[117].mxu0 }
 0x45d   :  { %v6504_v6 = vadd.f32 %v4600_v27, %v9173_v33  ;;  %v4602_v9 = vpop.f32.mrb[118].mxu0  ;;  %4986 = vmatprep.mubr.bf16.mxu1 %v4716_v10 }
 0x45e   :  { %v6505_v52 = vadd.f32 %v4602_v9, %v9169_v31  ;;  %v4604_v48 = vpop.f32.mrb[119].mxu0  ;;  %4987 = vmatmul.mubr.bf16.gmra.mrb[112].mxu1 %v4715_v8  ;;  %v4679_v50 = vmax.f32 %v6503_v25, 0.0 }
 0x45f   :  { %v6506_v51 = vadd.f32 %v4604_v48, %v9173_v33  ;;  %v4680_v36 = vmax.f32 %v6504_v6, 0.0 }
 0x460   :  { %v4681_v34 = vmax.f32 %v6505_v52, 0.0 }
 0x461   :  { %v4682_v15 = vmax.f32 %v6506_v51, 0.0  ;;  %v7581_v51 = vld [vmem:[%s9506_s9 + $0x8] sm:$0xff]  }
 0x462   :  { %v4717_v17 = vpack.c.bf16 %v4681_v34, %v4679_v50 }
 0x463   :  { %v4718_v0 = vpack.c.bf16 %v4682_v15, %v4680_v36  ;;  %v4608_v2 = vpop.f32.mrb[120].mxu0 }
 0x464   :  { %v6507_v42 = vadd.f32 %v4608_v2, %v9169_v31  ;;  %v4610_v45 = vpop.f32.mrb[121].mxu0 }
 0x465   :  { %v6508_v37 = vadd.f32 %v4610_v45, %v9173_v33  ;;  %v4612_v39 = vpop.f32.mrb[122].mxu0  ;;  %4994 = vmatprep.mubr.bf16.mxu1 %v4718_v0 }
 0x466   :  { %v6509_v28 = vadd.f32 %v4612_v39, %v9169_v31  ;;  %v4614_v30 = vpop.f32.mrb[123].mxu0  ;;  %4995 = vmatmul.mubr.bf16.gmra.mrb[116].mxu1 %v4717_v17  ;;  %v4683_v32 = vmax.f32 %v6507_v42, 0.0 }
 0x467   :  { %v6510_v26 = vadd.f32 %v4614_v30, %v9173_v33  ;;  %v4684_v49 = vmax.f32 %v6508_v37, 0.0 }
 0x468   :  { %v4685_v47 = vmax.f32 %v6509_v28, 0.0 }
 0x469   :  { %v4686_v54 = vmax.f32 %v6510_v26, 0.0 }
 0x46a   :  { %v4719_v56 = vpack.c.bf16 %v4685_v47, %v4683_v32 }
 0x46b   :  { %v4720_v62 = vpack.c.bf16 %v4686_v54, %v4684_v49  ;;  %v4618_v1 = vpop.f32.mrb[124].mxu0 }
 0x46c   :  { %v6511_v3 = vadd.f32 %v4618_v1, %v9169_v31  ;;  %v4620_v4 = vpop.f32.mrb[125].mxu0 }
 0x46d   :  { %v6512_v5 = vadd.f32 %v4620_v4, %v9173_v33  ;;  %v4622_v7 = vpop.f32.mrb[126].mxu0  ;;  %5002 = vmatprep.mubr.bf16.mxu1 %v4720_v62 }
 0x46e   :  { %v6513_v11 = vadd.f32 %v4622_v7, %v9169_v31  ;;  %v4624_v12 = vpop.f32.mrb[127].mxu0  ;;  %5003 = vmatmul.mubr.bf16.gmra.mrb[120].mxu1 %v4719_v56  ;;  %v4687_v14 = vmax.f32 %v6511_v3, 0.0 }
 0x46f   :  { %v6514_v13 = vadd.f32 %v4624_v12, %v9173_v33  ;;  %v4688_v18 = vmax.f32 %v6512_v5, 0.0 }
 0x470   :  { %v4689_v16 = vmax.f32 %v6513_v11, 0.0 }
 0x471   :  { %v4690_v19 = vmax.f32 %v6514_v13, 0.0 }
 0x472   :  { %v4721_v20 = vpack.c.bf16 %v4689_v16, %v4687_v14 }
 0x473   :  { %v4722_v21 = vpack.c.bf16 %v4690_v19, %v4688_v18 }
 0x475   :  { %5010 = vmatprep.mubr.bf16.mxu1 %v4722_v21 }
 0x476   :  { %5011 = vmatmul.mubr.bf16.gmra.mrb[124].mxu1 %v4721_v20 }
 0x4d1   :  { %v6095_v29 = vpop.f32.mrb[64].mxu1 }
 0x4d2   :  { %v6096_v38 = vpop.f32.mrb[65].mxu1 }
 0x4d3   :  { %v6097_v31 = vadd.f32 %v6096_v38, %v6095_v29  ;;  %v6098_v58 = vpop.f32.mrb[66].mxu1 }
 0x4d4   :  { %v6099_v59 = vpop.f32.mrb[67].mxu1 }
 0x4d5   :  { %v4893_v33 = vadd.f32 %v6097_v31, %v9266_v57  ;;  %v6100_v60 = vadd.f32 %v6099_v59, %v6098_v58 }
 0x4d7   :  { %v4896_v35 = vadd.f32 %v6100_v60, %v9266_v57  ;;  %v5019_v40 = vmax.f32 %v4893_v33, 0.0 }
 0x4d9   :  { %v5020_v24 = vmax.f32 %v4896_v35, 0.0  ;;  %v6101_v41 = vpop.f32.mrb[68].mxu1 }
 0x4da   :  { %v6102_v43 = vpop.f32.mrb[69].mxu1 }
 0x4db   :  { %v6103_v22 = vadd.f32 %v6102_v43, %v6101_v41  ;;  %v6104_v63 = vpop.f32.mrb[70].mxu1  ;;  %v5051_v53 = vpack.c.bf16 %v5020_v24, %v5019_v40 }
 0x4dc   :  { %v6105_v61 = vpop.f32.mrb[71].mxu1 }
 0x4dd   :  { %v4901_v8 = vadd.f32 %v6103_v22, %v9266_v57  ;;  %v6106_v10 = vadd.f32 %v6105_v61, %v6104_v63  ;;  %6251 = vmatprep.mubr.bf16.mxu1 %v5051_v53 }
 0x4df   :  { %v4904_v44 = vadd.f32 %v6106_v10, %v9266_v57  ;;  %v5021_v46 = vmax.f32 %v4901_v8, 0.0 }
 0x4e1   :  { %v5022_v25 = vmax.f32 %v4904_v44, 0.0  ;;  %v6107_v27 = vpop.f32.mrb[72].mxu1 }
 0x4e2   :  { %v6108_v6 = vpop.f32.mrb[73].mxu1 }
 0x4e3   :  { %v5052_v9 = vpack.c.bf16 %v5022_v25, %v5021_v46  ;;  %v6109_v52 = vadd.f32 %v6108_v6, %v6107_v27  ;;  %v6110_v48 = vpop.f32.mrb[74].mxu1 }
 0x4e4   :  { %v6111_v55 = vpop.f32.mrb[75].mxu1 }
 0x4e5   :  { %v4909_v50 = vadd.f32 %v6109_v52, %v9266_v57  ;;  %v6112_v34 = vadd.f32 %v6111_v55, %v6110_v48  ;;  %6252 = vmatmul.mubr.bf16.vlgmr.msra.gmra.mrb[128].mxu1 %v5052_v9 }
 0x4e6   :  { %6284 = vmatpush3.bf16.msra.mxu1 %v7580_v23 }
 0x4e7   :  { %v4912_v36 = vadd.f32 %v6112_v34, %v9266_v57  ;;  %6285 = vmatprep.subr.bf16.mxu1 %v7581_v51  ;;  %v5023_v15 = vmax.f32 %v4909_v50, 0.0 }
 0x4e9   :  { %v5024_v17 = vmax.f32 %v4912_v36, 0.0  ;;  %v6113_v0 = vpop.f32.mrb[76].mxu1 }
 0x4ea   :  { %v6114_v2 = vpop.f32.mrb[77].mxu1  ;;  %6286 = vmatpush3.bf16.msra.mxu1 %v7581_v51 }
 0x4eb   :  { %v6115_v42 = vadd.f32 %v6114_v2, %v6113_v0  ;;  %v6116_v45 = vpop.f32.mrb[78].mxu1  ;;  %v5053_v37 = vpack.c.bf16 %v5024_v17, %v5023_v15 }
 0x4ec   :  { %v6117_v39 = vpop.f32.mrb[79].mxu1 }
 0x4ed   :  { %v4917_v28 = vadd.f32 %v6115_v42, %v9266_v57  ;;  %v6118_v30 = vadd.f32 %v6117_v39, %v6116_v45  ;;  %6255 = vmatprep.mubr.bf16.mxu1 %v5053_v37 }
 0x4ef   :  { %v4920_v26 = vadd.f32 %v6118_v30, %v9266_v57  ;;  %v5025_v32 = vmax.f32 %v4917_v28, 0.0 }
 0x4f1   :  { %v5026_v47 = vmax.f32 %v4920_v26, 0.0  ;;  %v6119_v49 = vpop.f32.mrb[80].mxu1 }
 0x4f2   :  { %v6120_v54 = vpop.f32.mrb[81].mxu1 }
 0x4f3   :  { %v6121_v56 = vadd.f32 %v6120_v54, %v6119_v49  ;;  %v6122_v62 = vpop.f32.mrb[82].mxu1  ;;  %v5054_v1 = vpack.c.bf16 %v5026_v47, %v5025_v32 }
 0x4f4   :  { %v6123_v3 = vpop.f32.mrb[83].mxu1 }
 0x4f5   :  { %v4925_v4 = vadd.f32 %v6121_v56, %v9266_v57  ;;  %v6124_v5 = vadd.f32 %v6123_v3, %v6122_v62  ;;  %6256 = vmatmul.mubr.bf16.gmra.mrb[132].mxu1 %v5054_v1 }
 0x4f7   :  { %v4928_v7 = vadd.f32 %v6124_v5, %v9266_v57  ;;  %v5027_v11 = vmax.f32 %v4925_v4, 0.0 }
 0x4f9   :  { %v5028_v12 = vmax.f32 %v4928_v7, 0.0  ;;  %v6125_v13 = vpop.f32.mrb[84].mxu1 }
 0x4fa   :  { %v6126_v14 = vpop.f32.mrb[85].mxu1 }
 0x4fb   :  { %v6127_v16 = vadd.f32 %v6126_v14, %v6125_v13  ;;  %v6128_v18 = vpop.f32.mrb[86].mxu1  ;;  %v5055_v19 = vpack.c.bf16 %v5028_v12, %v5027_v11 }
 0x4fc   :  { %v6129_v20 = vpop.f32.mrb[87].mxu1 }
 0x4fd   :  { %v4933_v21 = vadd.f32 %v6127_v16, %v9266_v57  ;;  %v6130_v29 = vadd.f32 %v6129_v20, %v6128_v18  ;;  %6259 = vmatprep.mubr.bf16.mxu1 %v5055_v19 }
 0x4ff   :  { %v4936_v38 = vadd.f32 %v6130_v29, %v9266_v57  ;;  %v5029_v31 = vmax.f32 %v4933_v21, 0.0 }
 0x501   :  { %v5030_v58 = vmax.f32 %v4936_v38, 0.0  ;;  %v6131_v59 = vpop.f32.mrb[88].mxu1 }
 0x502   :  { %v6132_v33 = vpop.f32.mrb[89].mxu1 }
 0x503   :  { %v6133_v60 = vadd.f32 %v6132_v33, %v6131_v59  ;;  %v6134_v23 = vpop.f32.mrb[90].mxu1  ;;  %v5056_v35 = vpack.c.bf16 %v5030_v58, %v5029_v31 }
 0x504   :  { %v6135_v40 = vpop.f32.mrb[91].mxu1 }
 0x505   :  { %v4941_v24 = vadd.f32 %v6133_v60, %v9266_v57  ;;  %v6136_v41 = vadd.f32 %v6135_v40, %v6134_v23  ;;  %6260 = vmatmul.mubr.bf16.gmra.mrb[136].mxu1 %v5056_v35 }
 0x507   :  { %v4944_v43 = vadd.f32 %v6136_v41, %v9266_v57  ;;  %v5031_v22 = vmax.f32 %v4941_v24, 0.0 }
 0x509   :  { %v5032_v63 = vmax.f32 %v4944_v43, 0.0  ;;  %v6137_v53 = vpop.f32.mrb[92].mxu1 }
 0x50a   :  { %v6138_v61 = vpop.f32.mrb[93].mxu1 }
 0x50b   :  { %v6139_v8 = vadd.f32 %v6138_v61, %v6137_v53  ;;  %v6140_v10 = vpop.f32.mrb[94].mxu1  ;;  %v5057_v44 = vpack.c.bf16 %v5032_v63, %v5031_v22 }
 0x50c   :  { %v6141_v46 = vpop.f32.mrb[95].mxu1 }
 0x50d   :  { %v4949_v25 = vadd.f32 %v6139_v8, %v9266_v57  ;;  %v6142_v27 = vadd.f32 %v6141_v46, %v6140_v10  ;;  %6263 = vmatprep.mubr.bf16.mxu1 %v5057_v44  ;;  %v7582_v44 = vld [vmem:[%s9506_s9 + $0x10] sm:$0xff]  }
 0x50e   :  { %6287 = vmatprep.subr.bf16.mxu1 %v7582_v44 }
 0x50f   :  { %v4952_v6 = vadd.f32 %v6142_v27, %v9266_v57  ;;  %v5033_v9 = vmax.f32 %v4949_v25, 0.0  ;;  %6288 = vmatpush3.bf16.msra.mxu1 %v7582_v44 }
 0x511   :  { %v5034_v52 = vmax.f32 %v4952_v6, 0.0  ;;  %v6143_v48 = vpop.f32.mrb[96].mxu1 }
 0x512   :  { %v6144_v51 = vpop.f32.mrb[97].mxu1 }
 0x513   :  { %v6145_v55 = vadd.f32 %v6144_v51, %v6143_v48  ;;  %v6146_v50 = vpop.f32.mrb[98].mxu1  ;;  %v5058_v34 = vpack.c.bf16 %v5034_v52, %v5033_v9  ;;  %v7583_v51 = vld [vmem:[%s9506_s9 + $0x18] sm:$0xff]  }
 0x514   :  { %v6147_v36 = vpop.f32.mrb[99].mxu1  ;;  %6289 = vmatprep.subr.bf16.mxu1 %v7583_v51 }
 0x515   :  { %v4957_v15 = vadd.f32 %v6145_v55, %v9266_v57  ;;  %v6148_v17 = vadd.f32 %v6147_v36, %v6146_v50  ;;  %6264 = vmatmul.mubr.bf16.gmra.mrb[140].mxu1 %v5058_v34 }
 0x516   :  { %6290 = vmatpush3.bf16.msra.mxu1 %v7583_v51 }
 0x517   :  { %v4960_v0 = vadd.f32 %v6148_v17, %v9266_v57  ;;  %v5035_v2 = vmax.f32 %v4957_v15, 0.0 }
 0x519   :  { %v5036_v42 = vmax.f32 %v4960_v0, 0.0  ;;  %v6149_v45 = vpop.f32.mrb[100].mxu1 }
 0x51a   :  { %v6150_v37 = vpop.f32.mrb[101].mxu1 }
 0x51b   :  { %v6151_v39 = vadd.f32 %v6150_v37, %v6149_v45  ;;  %v6152_v28 = vpop.f32.mrb[102].mxu1  ;;  %v5059_v30 = vpack.c.bf16 %v5036_v42, %v5035_v2 }
 0x51c   :  { %v6153_v26 = vpop.f32.mrb[103].mxu1 }
 0x51d   :  { %v4965_v32 = vadd.f32 %v6151_v39, %v9266_v57  ;;  %v6154_v47 = vadd.f32 %v6153_v26, %v6152_v28  ;;  %6267 = vmatprep.mubr.bf16.mxu1 %v5059_v30 }
 0x51f   :  { %v4968_v49 = vadd.f32 %v6154_v47, %v9266_v57  ;;  %v5037_v54 = vmax.f32 %v4965_v32, 0.0 }
 0x521   :  { %v5038_v56 = vmax.f32 %v4968_v49, 0.0  ;;  %v6155_v62 = vpop.f32.mrb[104].mxu1 }
 0x522   :  { %v6156_v1 = vpop.f32.mrb[105].mxu1 }
 0x523   :  { %v6157_v3 = vadd.f32 %v6156_v1, %v6155_v62  ;;  %v6158_v4 = vpop.f32.mrb[106].mxu1  ;;  %v5060_v5 = vpack.c.bf16 %v5038_v56, %v5037_v54 }
 0x524   :  { %v6159_v7 = vpop.f32.mrb[107].mxu1 }
 0x525   :  { %v4973_v11 = vadd.f32 %v6157_v3, %v9266_v57  ;;  %v6160_v12 = vadd.f32 %v6159_v7, %v6158_v4  ;;  %6268 = vmatmul.mubr.bf16.gmra.mrb[144].mxu1 %v5060_v5 }
 0x527   :  { %v4976_v13 = vadd.f32 %v6160_v12, %v9266_v57  ;;  %v5039_v14 = vmax.f32 %v4973_v11, 0.0  ;;  %v9315_v11 = vld [vmem:[%s9507_s8] ss:$0 sm:$0xff] }
 0x529   :  { %v5040_v16 = vmax.f32 %v4976_v13, 0.0  ;;  %v6161_v18 = vpop.f32.mrb[108].mxu1 }
 0x52a   :  { %v6162_v19 = vpop.f32.mrb[109].mxu1 }
 0x52b   :  { %v6163_v20 = vadd.f32 %v6162_v19, %v6161_v18  ;;  %v6164_v21 = vpop.f32.mrb[110].mxu1  ;;  %v5061_v29 = vpack.c.bf16 %v5040_v16, %v5039_v14 }
 0x52c   :  { %v6165_v38 = vpop.f32.mrb[111].mxu1 }
 0x52d   :  { %v4981_v31 = vadd.f32 %v6163_v20, %v9266_v57  ;;  %v6166_v58 = vadd.f32 %v6165_v38, %v6164_v21  ;;  %6271 = vmatprep.mubr.bf16.mxu1 %v5061_v29 }
 0x52f   :  { %v4984_v59 = vadd.f32 %v6166_v58, %v9266_v57  ;;  %v5041_v33 = vmax.f32 %v4981_v31, 0.0 }
 0x531   :  { %v5042_v60 = vmax.f32 %v4984_v59, 0.0  ;;  %v6167_v23 = vpop.f32.mrb[112].mxu1 }
 0x532   :  { %v6168_v35 = vpop.f32.mrb[113].mxu1 }
 0x533   :  { %v6169_v40 = vadd.f32 %v6168_v35, %v6167_v23  ;;  %v6170_v24 = vpop.f32.mrb[114].mxu1  ;;  %v5062_v41 = vpack.c.bf16 %v5042_v60, %v5041_v33 }
 0x534   :  { %v6171_v43 = vpop.f32.mrb[115].mxu1 }
 0x535   :  { %v4989_v22 = vadd.f32 %v6169_v40, %v9266_v57  ;;  %v6172_v63 = vadd.f32 %v6171_v43, %v6170_v24  ;;  %6272 = vmatmul.mubr.bf16.gmra.mrb[148].mxu1 %v5062_v41 }
 0x537   :  { %v4992_v53 = vadd.f32 %v6172_v63, %v9266_v57  ;;  %v5043_v61 = vmax.f32 %v4989_v22, 0.0 }
 0x539   :  { %v5044_v8 = vmax.f32 %v4992_v53, 0.0  ;;  %v6173_v10 = vpop.f32.mrb[116].mxu1 }
 0x53a   :  { %v6174_v46 = vpop.f32.mrb[117].mxu1 }
 0x53b   :  { %v6175_v25 = vadd.f32 %v6174_v46, %v6173_v10  ;;  %v6176_v27 = vpop.f32.mrb[118].mxu1  ;;  %v5063_v6 = vpack.c.bf16 %v5044_v8, %v5043_v61 }
 0x53c   :  { %v6177_v9 = vpop.f32.mrb[119].mxu1 }
 0x53d   :  { %v4997_v52 = vadd.f32 %v6175_v25, %v9266_v57  ;;  %v6178_v48 = vadd.f32 %v6177_v9, %v6176_v27  ;;  %6275 = vmatprep.mubr.bf16.mxu1 %v5063_v6 }
 0x53f   :  { %v5000_v55 = vadd.f32 %v6178_v48, %v9266_v57  ;;  %v5045_v50 = vmax.f32 %v4997_v52, 0.0 }
 0x541   :  { %v5046_v34 = vmax.f32 %v5000_v55, 0.0  ;;  %v6179_v36 = vpop.f32.mrb[120].mxu1 }
 0x542   :  { %v6180_v15 = vpop.f32.mrb[121].mxu1 }
 0x543   :  { %v6181_v17 = vadd.f32 %v6180_v15, %v6179_v36  ;;  %v6182_v0 = vpop.f32.mrb[122].mxu1  ;;  %v5064_v2 = vpack.c.bf16 %v5046_v34, %v5045_v50 }
 0x544   :  { %v6183_v42 = vpop.f32.mrb[123].mxu1 }
 0x545   :  { %v5005_v45 = vadd.f32 %v6181_v17, %v9266_v57  ;;  %v6184_v37 = vadd.f32 %v6183_v42, %v6182_v0  ;;  %6276 = vmatmul.mubr.bf16.gmra.mrb[152].mxu1 %v5064_v2 }
 0x547   :  { %v5008_v39 = vadd.f32 %v6184_v37, %v9266_v57  ;;  %v5047_v28 = vmax.f32 %v5005_v45, 0.0 }
 0x549   :  { %v5048_v30 = vmax.f32 %v5008_v39, 0.0  ;;  %v6185_v26 = vpop.f32.mrb[124].mxu1 }
 0x54a   :  { %v6186_v32 = vpop.f32.mrb[125].mxu1 }
 0x54b   :  { %v6187_v47 = vadd.f32 %v6186_v32, %v6185_v26  ;;  %v6188_v49 = vpop.f32.mrb[126].mxu1  ;;  %v5065_v54 = vpack.c.bf16 %v5048_v30, %v5047_v28 }
 0x54c   :  { %v6189_v56 = vpop.f32.mrb[127].mxu1 }
 0x54d   :  { %v5013_v62 = vadd.f32 %v6187_v47, %v9266_v57  ;;  %v6190_v1 = vadd.f32 %v6189_v56, %v6188_v49  ;;  %6279 = vmatprep.mubr.bf16.mxu1 %v5065_v54 }
 0x54f   :  { %v5016_v3 = vadd.f32 %v6190_v1, %v9266_v57  ;;  %v5049_v4 = vmax.f32 %v5013_v62, 0.0 }
 0x551   :  { %v5050_v5 = vmax.f32 %v5016_v3, 0.0 }
 0x553   :  { %v5066_v7 = vpack.c.bf16 %v5050_v5, %v5049_v4 }
 0x555   :  { %6280 = vmatmul.mubr.bf16.gmra.mrb[156].mxu1 %v5066_v7 }
 0x5b8   :  { %v6253_v12 = vpop.f32.mrb[128].mxu1 }
 0x5b9   :  { %v5181_v13 = vadd.f32 %v6253_v12, %v9315_v11  ;;  %v5172_v14 = vpop.f32.mrb[129].mxu1 }
 0x5ba   :  { %v5173_v16 = vadd.f32 %v9315_v11, %v5172_v14  ;;  %v6254_v18 = vpop.f32.mrb[130].mxu1 }
 0x5bb   :  { %v5184_v19 = vadd.f32 %v6254_v18, %v9315_v11  ;;  %v5175_v20 = vpop.f32.mrb[131].mxu1  ;;  %v5301_v21 = vmax.f32 %v5181_v13, 0.0 }
 0x5bc   :  { %v5176_v57 = vadd.f32 %v9315_v11, %v5175_v20  ;;  %v5299_v38 = vmax.f32 %v5173_v16, 0.0 }
 0x5bd   :  { %v5302_v29 = vmax.f32 %v5184_v19, 0.0 }
 0x5be   :  { %v5300_v31 = vmax.f32 %v5176_v57, 0.0 }
 0x5bf   :  { %v5332_v58 = vpack.c.bf16 %v5302_v29, %v5301_v21 }
 0x5c0   :  { %v5331_v59 = vpack.c.bf16 %v5300_v31, %v5299_v38 }
 0x5c2   :  { %6291 = vmatprep.mubr.msk.bf16.mxu1 %vm5386_vm0, %v5331_v59 }
 0x5c3   :  { %6292 = vmatmul.mubr.msk.bf16.vlgmr.msra.gmra.mrb[160].mxu1 %vm5386_vm0, %v5332_v58 }
 0x5c8   :  { %v6257_v33 = vpop.f32.mrb[132].mxu1 }
 0x5c9   :  { %v5197_v60 = vadd.f32 %v6257_v33, %v9315_v11  ;;  %v5188_v23 = vpop.f32.mrb[133].mxu1 }
 0x5ca   :  { %v5189_v35 = vadd.f32 %v9315_v11, %v5188_v23  ;;  %v6258_v40 = vpop.f32.mrb[134].mxu1 }
 0x5cb   :  { %v5200_v24 = vadd.f32 %v6258_v40, %v9315_v11  ;;  %v5191_v41 = vpop.f32.mrb[135].mxu1  ;;  %v5305_v22 = vmax.f32 %v5197_v60, 0.0 }
 0x5cc   :  { %v5192_v43 = vadd.f32 %v9315_v11, %v5191_v41  ;;  %v5303_v53 = vmax.f32 %v5189_v35, 0.0 }
 0x5cd   :  { %v5306_v63 = vmax.f32 %v5200_v24, 0.0 }
 0x5ce   :  { %v5304_v61 = vmax.f32 %v5192_v43, 0.0 }
 0x5cf   :  { %v5334_v8 = vpack.c.bf16 %v5306_v63, %v5305_v22 }
 0x5d0   :  { %v5333_v10 = vpack.c.bf16 %v5304_v61, %v5303_v53 }
 0x5d2   :  { %6295 = vmatprep.mubr.msk.bf16.mxu1 %vm5386_vm0, %v5333_v10 }
 0x5d3   :  { %6296 = vmatmul.mubr.msk.bf16.gmra.mrb[164].mxu1 %vm5386_vm0, %v5334_v8 }
 0x5d8   :  { %v6261_v44 = vpop.f32.mrb[136].mxu1 }
 0x5d9   :  { %v5213_v46 = vadd.f32 %v6261_v44, %v9315_v11  ;;  %v5204_v25 = vpop.f32.mrb[137].mxu1 }
 0x5da   :  { %v5205_v27 = vadd.f32 %v9315_v11, %v5204_v25  ;;  %v6262_v6 = vpop.f32.mrb[138].mxu1 }
 0x5db   :  { %v5216_v9 = vadd.f32 %v6262_v6, %v9315_v11  ;;  %v5207_v52 = vpop.f32.mrb[139].mxu1  ;;  %v5309_v51 = vmax.f32 %v5213_v46, 0.0 }
 0x5dc   :  { %v5208_v48 = vadd.f32 %v9315_v11, %v5207_v52  ;;  %v5307_v50 = vmax.f32 %v5205_v27, 0.0 }
 0x5dd   :  { %v5310_v55 = vmax.f32 %v5216_v9, 0.0 }
 0x5de   :  { %v5308_v34 = vmax.f32 %v5208_v48, 0.0 }
 0x5df   :  { %v5336_v36 = vpack.c.bf16 %v5310_v55, %v5309_v51 }
 0x5e0   :  { %v5335_v15 = vpack.c.bf16 %v5308_v34, %v5307_v50 }
 0x5e2   :  { %6299 = vmatprep.mubr.msk.bf16.mxu1 %vm5386_vm0, %v5335_v15 }
 0x5e3   :  { %6300 = vmatmul.mubr.msk.bf16.gmra.mrb[168].mxu1 %vm5386_vm0, %v5336_v36 }
 0x5e8   :  { %v6265_v17 = vpop.f32.mrb[140].mxu1 }
 0x5e9   :  { %v5229_v0 = vadd.f32 %v6265_v17, %v9315_v11  ;;  %v5220_v2 = vpop.f32.mrb[141].mxu1 }
 0x5ea   :  { %v5221_v42 = vadd.f32 %v9315_v11, %v5220_v2  ;;  %v6266_v45 = vpop.f32.mrb[142].mxu1 }
 0x5eb   :  { %v5232_v37 = vadd.f32 %v6266_v45, %v9315_v11  ;;  %v5223_v39 = vpop.f32.mrb[143].mxu1  ;;  %v5313_v30 = vmax.f32 %v5229_v0, 0.0 }
 0x5ec   :  { %v5224_v28 = vadd.f32 %v9315_v11, %v5223_v39  ;;  %v5311_v32 = vmax.f32 %v5221_v42, 0.0 }
 0x5ed   :  { %v5314_v26 = vmax.f32 %v5232_v37, 0.0 }
 0x5ee   :  { %v5312_v47 = vmax.f32 %v5224_v28, 0.0  ;;  %v9368_v28 = vld [vmem:[%s9508_s10] ss:$0 sm:$0xff] }
 0x5ef   :  { %v5338_v49 = vpack.c.bf16 %v5314_v26, %v5313_v30 }
 0x5f0   :  { %v5337_v54 = vpack.c.bf16 %v5312_v47, %v5311_v32 }
 0x5f2   :  { %6303 = vmatprep.mubr.msk.bf16.mxu1 %vm5386_vm0, %v5337_v54 }
 0x5f3   :  { %6304 = vmatmul.mubr.msk.bf16.gmra.mrb[172].mxu1 %vm5386_vm0, %v5338_v49 }
 0x5f8   :  { %v6269_v56 = vpop.f32.mrb[144].mxu1 }
 0x5f9   :  { %v5245_v62 = vadd.f32 %v6269_v56, %v9315_v11  ;;  %v5236_v1 = vpop.f32.mrb[145].mxu1 }
 0x5fa   :  { %v5237_v3 = vadd.f32 %v9315_v11, %v5236_v1  ;;  %v6270_v4 = vpop.f32.mrb[146].mxu1 }
 0x5fb   :  { %v5248_v5 = vadd.f32 %v6270_v4, %v9315_v11  ;;  %v5239_v7 = vpop.f32.mrb[147].mxu1  ;;  %v5317_v13 = vmax.f32 %v5245_v62, 0.0 }
 0x5fc   :  { %v5240_v12 = vadd.f32 %v9315_v11, %v5239_v7  ;;  %v5315_v16 = vmax.f32 %v5237_v3, 0.0 }
 0x5fd   :  { %v5318_v14 = vmax.f32 %v5248_v5, 0.0 }
 0x5fe   :  { %v5316_v18 = vmax.f32 %v5240_v12, 0.0 }
 0x5ff   :  { %v5340_v19 = vpack.c.bf16 %v5318_v14, %v5317_v13 }
 0x600   :  { %v5339_v20 = vpack.c.bf16 %v5316_v18, %v5315_v16 }
 0x602   :  { %6307 = vmatprep.mubr.msk.bf16.mxu1 %vm5386_vm0, %v5339_v20 }
 0x603   :  { %6308 = vmatmul.mubr.msk.bf16.gmra.mrb[176].mxu1 %vm5386_vm0, %v5340_v19 }
 0x608   :  { %v6273_v57 = vpop.f32.mrb[148].mxu1 }
 0x609   :  { %v5261_v21 = vadd.f32 %v6273_v57, %v9315_v11  ;;  %v5252_v29 = vpop.f32.mrb[149].mxu1 }
 0x60a   :  { %v5253_v38 = vadd.f32 %v9315_v11, %v5252_v29  ;;  %v6274_v31 = vpop.f32.mrb[150].mxu1 }
 0x60b   :  { %v5264_v58 = vadd.f32 %v6274_v31, %v9315_v11  ;;  %v5255_v59 = vpop.f32.mrb[151].mxu1  ;;  %v5321_v60 = vmax.f32 %v5261_v21, 0.0 }
 0x60c   :  { %v5256_v33 = vadd.f32 %v9315_v11, %v5255_v59  ;;  %v5319_v35 = vmax.f32 %v5253_v38, 0.0 }
 0x60d   :  { %v5322_v23 = vmax.f32 %v5264_v58, 0.0 }
 0x60e   :  { %v5320_v40 = vmax.f32 %v5256_v33, 0.0 }
 0x60f   :  { %v5342_v24 = vpack.c.bf16 %v5322_v23, %v5321_v60 }
 0x610   :  { %v5341_v41 = vpack.c.bf16 %v5320_v40, %v5319_v35 }
 0x612   :  { %6311 = vmatprep.mubr.msk.bf16.mxu1 %vm5386_vm0, %v5341_v41 }
 0x613   :  { %6312 = vmatmul.mubr.msk.bf16.gmra.mrb[180].mxu1 %vm5386_vm0, %v5342_v24 }
 0x618   :  { %v6277_v43 = vpop.f32.mrb[152].mxu1 }
 0x619   :  { %v5277_v22 = vadd.f32 %v6277_v43, %v9315_v11  ;;  %v5268_v63 = vpop.f32.mrb[153].mxu1 }
 0x61a   :  { %v5269_v53 = vadd.f32 %v9315_v11, %v5268_v63  ;;  %v6278_v61 = vpop.f32.mrb[154].mxu1 }
 0x61b   :  { %v5280_v8 = vadd.f32 %v6278_v61, %v9315_v11  ;;  %v5271_v10 = vpop.f32.mrb[155].mxu1  ;;  %v5325_v46 = vmax.f32 %v5277_v22, 0.0 }
 0x61c   :  { %v5272_v44 = vadd.f32 %v9315_v11, %v5271_v10  ;;  %v5323_v27 = vmax.f32 %v5269_v53, 0.0 }
 0x61d   :  { %v5326_v25 = vmax.f32 %v5280_v8, 0.0 }
 0x61e   :  { %v5324_v6 = vmax.f32 %v5272_v44, 0.0 }
 0x61f   :  { %v5344_v9 = vpack.c.bf16 %v5326_v25, %v5325_v46 }
 0x620   :  { %v5343_v52 = vpack.c.bf16 %v5324_v6, %v5323_v27 }
 0x622   :  { %6315 = vmatprep.mubr.msk.bf16.mxu1 %vm5386_vm0, %v5343_v52 }
 0x623   :  { %6316 = vmatmul.mubr.msk.bf16.gmra.mrb[184].mxu1 %vm5386_vm0, %v5344_v9 }
 0x628   :  { %v6281_v48 = vpop.f32.mrb[156].mxu1 }
 0x629   :  { %v5293_v51 = vadd.f32 %v6281_v48, %v9315_v11  ;;  %v5284_v55 = vpop.f32.mrb[157].mxu1 }
 0x62a   :  { %v5285_v50 = vadd.f32 %v9315_v11, %v5284_v55  ;;  %v6282_v34 = vpop.f32.mrb[158].mxu1 }
 0x62b   :  { %v5296_v36 = vadd.f32 %v6282_v34, %v9315_v11  ;;  %v5287_v15 = vpop.f32.mrb[159].mxu1  ;;  %v5329_v0 = vmax.f32 %v5293_v51, 0.0 }
 0x62c   :  { %v5288_v17 = vadd.f32 %v9315_v11, %v5287_v15  ;;  %v5327_v42 = vmax.f32 %v5285_v50, 0.0 }
 0x62d   :  { %v5330_v2 = vmax.f32 %v5296_v36, 0.0 }
 0x62e   :  { %v5328_v45 = vmax.f32 %v5288_v17, 0.0 }
 0x62f   :  { %v5346_v37 = vpack.c.bf16 %v5330_v2, %v5329_v0 }
 0x630   :  { %v5345_v39 = vpack.c.bf16 %v5328_v45, %v5327_v42 }
 0x632   :  { %6319 = vmatprep.mubr.msk.bf16.mxu1 %vm5386_vm0, %v5345_v39 }
 0x633   :  { %6320 = vmatmul.mubr.msk.bf16.gmra.mrb[188].mxu1 %vm5386_vm0, %v5346_v37 }
 0x696   :  { %v6293_v30 = vpop.f32.mrb[160].mxu1 }
 0x697   :  { %v5478_v26 = vadd.f32 %v6293_v30, %v9368_v28  ;;  %v5469_v32 = vpop.f32.mrb[161].mxu1 }
 0x698   :  { %v5470_v11 = vadd.f32 %v9368_v28, %v5469_v32  ;;  %v6294_v47 = vpop.f32.mrb[162].mxu1 }
 0x699   :  { %5598 = vst [vmem:[%s9509_s11 + $0x10] sm:$0xff] %v5478_v26  ;;  %v5481_v49 = vadd.f32 %v6294_v47, %v9368_v28  ;;  %v5472_v54 = vpop.f32.mrb[163].mxu1 }
 0x69a   :  { %5596 = vst [vmem:[%s9509_s11] sm:$0xff] %v5470_v11  ;;  %v5473_v56 = vadd.f32 %v9368_v28, %v5472_v54 }
 0x69b   :  { %5599 = vst [vmem:[%s9509_s11 + $0x18] sm:$0xff] %v5481_v49 }
 0x69c   :  { %5597 = vst [vmem:[%s9509_s11 + $0x8] sm:$0xff] %v5473_v56 }
 0x6a6   :  { %v6297_v62 = vpop.f32.mrb[164].mxu1 }
 0x6a7   :  { %v5494_v1 = vadd.f32 %v6297_v62, %v9368_v28  ;;  %v5485_v3 = vpop.f32.mrb[165].mxu1 }
 0x6a8   :  { %v5486_v4 = vadd.f32 %v9368_v28, %v5485_v3  ;;  %v6298_v5 = vpop.f32.mrb[166].mxu1 }
 0x6a9   :  { %5602 = vst [vmem:[%s9509_s11 + $0x30] sm:$0xff] %v5494_v1  ;;  %v5497_v7 = vadd.f32 %v6298_v5, %v9368_v28  ;;  %v5488_v12 = vpop.f32.mrb[167].mxu1 }
 0x6aa   :  { %5600 = vst [vmem:[%s9509_s11 + $0x20] sm:$0xff] %v5486_v4  ;;  %v5489_v13 = vadd.f32 %v9368_v28, %v5488_v12 }
 0x6ab   :  { %5603 = vst [vmem:[%s9509_s11 + $0x38] sm:$0xff] %v5497_v7 }
 0x6ac   :  { %5601 = vst [vmem:[%s9509_s11 + $0x28] sm:$0xff] %v5489_v13 }
 0x6b6   :  { %v6301_v14 = vpop.f32.mrb[168].mxu1 }
 0x6b7   :  { %v5510_v16 = vadd.f32 %v6301_v14, %v9368_v28  ;;  %v5501_v18 = vpop.f32.mrb[169].mxu1 }
 0x6b8   :  { %v5502_v19 = vadd.f32 %v9368_v28, %v5501_v18  ;;  %v6302_v20 = vpop.f32.mrb[170].mxu1 }
 0x6b9   :  { %5606 = vst [vmem:[%s9509_s11 + $0x50] sm:$0xff] %v5510_v16  ;;  %v5513_v57 = vadd.f32 %v6302_v20, %v9368_v28  ;;  %v5504_v21 = vpop.f32.mrb[171].mxu1 }
 0x6ba   :  { %5604 = vst [vmem:[%s9509_s11 + $0x40] sm:$0xff] %v5502_v19  ;;  %v5505_v29 = vadd.f32 %v9368_v28, %v5504_v21 }
 0x6bb   :  { %5607 = vst [vmem:[%s9509_s11 + $0x58] sm:$0xff] %v5513_v57 }
 0x6bc   :  { %5605 = vst [vmem:[%s9509_s11 + $0x48] sm:$0xff] %v5505_v29 }
 0x6c6   :  { %v6305_v38 = vpop.f32.mrb[172].mxu1 }
 0x6c7   :  { %v5526_v31 = vadd.f32 %v6305_v38, %v9368_v28  ;;  %v5517_v58 = vpop.f32.mrb[173].mxu1 }
 0x6c8   :  { %v5518_v59 = vadd.f32 %v9368_v28, %v5517_v58  ;;  %v6306_v33 = vpop.f32.mrb[174].mxu1 }
 0x6c9   :  { %5610 = vst [vmem:[%s9509_s11 + $0x70] sm:$0xff] %v5526_v31  ;;  %v5529_v60 = vadd.f32 %v6306_v33, %v9368_v28  ;;  %v5520_v23 = vpop.f32.mrb[175].mxu1 }
 0x6ca   :  { %5608 = vst [vmem:[%s9509_s11 + $0x60] sm:$0xff] %v5518_v59  ;;  %v5521_v35 = vadd.f32 %v9368_v28, %v5520_v23 }
 0x6cb   :  { %5611 = vst [vmem:[%s9509_s11 + $0x78] sm:$0xff] %v5529_v60 }
 0x6cc   :  { %5609 = vst [vmem:[%s9509_s11 + $0x68] sm:$0xff] %v5521_v35 }
 0x6d6   :  { %v6309_v40 = vpop.f32.mrb[176].mxu1 }
 0x6d7   :  { %v5542_v24 = vadd.f32 %v6309_v40, %v9368_v28  ;;  %v5533_v41 = vpop.f32.mrb[177].mxu1 }
 0x6d8   :  { %v5534_v43 = vadd.f32 %v9368_v28, %v5533_v41  ;;  %v6310_v22 = vpop.f32.mrb[178].mxu1 }
 0x6d9   :  { %5614 = vst [vmem:[%s9509_s11 + $0x90] sm:$0xff] %v5542_v24  ;;  %v5545_v63 = vadd.f32 %v6310_v22, %v9368_v28  ;;  %v5536_v53 = vpop.f32.mrb[179].mxu1 }
 0x6da   :  { %5612 = vst [vmem:[%s9509_s11 + $0x80] sm:$0xff] %v5534_v43  ;;  %v5537_v61 = vadd.f32 %v9368_v28, %v5536_v53 }
 0x6db   :  { %5615 = vst [vmem:[%s9509_s11 + $0x98] sm:$0xff] %v5545_v63 }
 0x6dc   :  { %5613 = vst [vmem:[%s9509_s11 + $0x88] sm:$0xff] %v5537_v61 }
 0x6e6   :  { %v6313_v8 = vpop.f32.mrb[180].mxu1 }
 0x6e7   :  { %v5558_v10 = vadd.f32 %v6313_v8, %v9368_v28  ;;  %v5549_v44 = vpop.f32.mrb[181].mxu1 }
 0x6e8   :  { %v5550_v46 = vadd.f32 %v9368_v28, %v5549_v44  ;;  %v6314_v25 = vpop.f32.mrb[182].mxu1 }
 0x6e9   :  { %5618 = vst [vmem:[%s9509_s11 + $0xb0] sm:$0xff] %v5558_v10  ;;  %v5561_v27 = vadd.f32 %v6314_v25, %v9368_v28  ;;  %v5552_v6 = vpop.f32.mrb[183].mxu1 }
 0x6ea   :  { %5616 = vst [vmem:[%s9509_s11 + $0xa0] sm:$0xff] %v5550_v46  ;;  %v5553_v9 = vadd.f32 %v9368_v28, %v5552_v6 }
 0x6eb   :  { %5619 = vst [vmem:[%s9509_s11 + $0xb8] sm:$0xff] %v5561_v27 }
 0x6ec   :  { %5617 = vst [vmem:[%s9509_s11 + $0xa8] sm:$0xff] %v5553_v9 }
 0x6f6   :  { %v6317_v52 = vpop.f32.mrb[184].mxu1 }
 0x6f7   :  { %v5574_v48 = vadd.f32 %v6317_v52, %v9368_v28  ;;  %v5565_v51 = vpop.f32.mrb[185].mxu1 }
 0x6f8   :  { %v5566_v55 = vadd.f32 %v9368_v28, %v5565_v51  ;;  %v6318_v50 = vpop.f32.mrb[186].mxu1 }
 0x6f9   :  { %5622 = vst [vmem:[%s9509_s11 + $0xd0] sm:$0xff] %v5574_v48  ;;  %v5577_v34 = vadd.f32 %v6318_v50, %v9368_v28  ;;  %v5568_v36 = vpop.f32.mrb[187].mxu1 }
 0x6fa   :  { %5620 = vst [vmem:[%s9509_s11 + $0xc0] sm:$0xff] %v5566_v55  ;;  %v5569_v15 = vadd.f32 %v9368_v28, %v5568_v36 }
 0x6fb   :  { %5623 = vst [vmem:[%s9509_s11 + $0xd8] sm:$0xff] %v5577_v34 }
 0x6fc   :  { %5621 = vst [vmem:[%s9509_s11 + $0xc8] sm:$0xff] %v5569_v15 }
 0x706   :  { %v6321_v17 = vpop.f32.mrb[188].mxu1 }
 0x707   :  { %v5590_v0 = vadd.f32 %v6321_v17, %v9368_v28  ;;  %v5581_v2 = vpop.f32.mrb[189].mxu1 }
 0x708   :  { %v5582_v42 = vadd.f32 %v9368_v28, %v5581_v2  ;;  %v6322_v45 = vpop.f32.mrb[190].mxu1 }
 0x709   :  { %5626 = vst [vmem:[%s9509_s11 + $0xf0] sm:$0xff] %v5590_v0  ;;  %v5593_v37 = vadd.f32 %v6322_v45, %v9368_v28  ;;  %v5584_v39 = vpop.f32.mrb[191].mxu1 }
 0x70a   :  { %5624 = vst [vmem:[%s9509_s11 + $0xe0] sm:$0xff] %v5582_v42  ;;  %v5585_v30 = vadd.f32 %v9368_v28, %v5584_v39 }
 0x70b   :  { %5627 = vst [vmem:[%s9509_s11 + $0xf8] sm:$0xff] %v5593_v37 }
 0x70c   :  { %5625 = vst [vmem:[%s9509_s11 + $0xe8] sm:$0xff] %v5585_v30 }

</bundles_post_ra>
